<compile_context>
chip_gen: v6e
topology: v6e:2x2x1
jax: 0.10.0
libtpu: 0.0.40
codegen_flags: <defaults>
</compile_context>

<pallas_src>
import functools

import jax
import jax.numpy as jnp
from jax.experimental import pallas as pl
from jax.experimental.pallas import tpu as pltpu

PINN_LAYERS = (5, 100, 100, 100, 100, 2)

_IN_PAD = 8     # input rows fed to the kernel: [t, sx, sy, rx, ry, 0, 0, 0]
_HID_PAD = 128  # hidden width 100 -> 128 (full (8,128) tiles, MXU-native)
_OUT_PAD = 8    # output rows 2 -> 8 (unmasked sublane stores)


def _round_up(x, m):
    return ((x + m - 1) // m) * m


def _softplus(z, *, bf16_eup=False):
    # Branch-free, numerically stable softplus: max(z,0) + log1p(exp(-|z|)).
    # Matches torch.nn.Softplus(beta=1, threshold=20) to well under 1e-7 in f32.
    if bf16_eup:
        # Optional (v6e/v7x only): run the 2 transcendentals/elem on the EUP in
        # bf16 (~2x EUP rate); introduces ~1e-3 relative error in activations.
        tail = jnp.log1p(jnp.exp(-jnp.abs(z).astype(jnp.bfloat16))).astype(jnp.float32)
    else:
        tail = jnp.log1p(jnp.exp(-jnp.abs(z)))
    return jnp.maximum(z, 0.0) + tail


def pinn_kernel(x_ref, sel_ref,
                w0_ref, b0_ref, w1_ref, b1_ref, w2_ref, b2_ref,
                w3_ref, b3_ref, w4_ref, b4_ref,
                o_ref, *, softplus_bf16=False):
    X = x_ref[...]                               # (8, tm) f32, batch on lanes
    a = X

    hidden = ((w0_ref, b0_ref), (w1_ref, b1_ref),
              (w2_ref, b2_ref), (w3_ref, b3_ref))
    for w_ref, b_ref in hidden:
        # W: (128, in_pad), a: (in_pad, tm), b: (128, 1) broadcast along lanes.
        # NOTE: default TPU matmul precision (bf16 passes, f32 accumulate); the
        # pure-JAX reference uses the same default so parity holds.
        z = jnp.dot(w_ref[...], a, preferred_element_type=jnp.float32) + b_ref[...]
        a = _softplus(z, bf16_eup=softplus_bf16)

    # Final linear (rows 2..7 of W4/b4 are zero-padded): (8,128)@(128,tm)+(8,1)
    a = jnp.dot(w4_ref[...], a, preferred_element_type=jnp.float32) + b4_ref[...]

    # Boundary blend.  sel (16,8) gathers src=L[:,1:3] / rec=L[:,3:5] into dense
    # 8-row slabs (padded rows are zero), so the whole (8, tm) output block is
    # produced with a single unmasked store.  Rows 2..7 of the output are zero
    # and sliced off by the wrapper.
    Y = jnp.dot(sel_ref[...], X, preferred_element_type=jnp.float32)   # (16, tm)
    src8 = Y[0:8, :]
    rec8 = Y[8:16, :]
    t = X[0:1, :]                                # (1, tm), broadcast over rows
    o_ref[...] = (1.0 - t) * src8 + t * rec8 + t * (1.0 - t) * a


def _sel_matrix():
    # Rows 0..7 select src (L[:,1], L[:,2]); rows 8..15 select rec (L[:,3], L[:,4]).
    sel = jnp.zeros((2 * _OUT_PAD, _IN_PAD), jnp.float32)
    sel = sel.at[0, 1].set(1.0).at[1, 2].set(1.0)
    sel = sel.at[_OUT_PAD + 0, 3].set(1.0).at[_OUT_PAD + 1, 4].set(1.0)
    return sel


def _pad_params(params):
    """Zero-pad weights/biases to MXU-native shapes.

    Padded *input* columns of every weight are exactly zero so the softplus(0)
    values living in padded activation rows are annihilated downstream.
    """
    in_pads = (_IN_PAD, _HID_PAD, _HID_PAD, _HID_PAD, _HID_PAD)
    out_pads = (_HID_PAD, _HID_PAD, _HID_PAD, _HID_PAD, _OUT_PAD)
    padded = []
    for (W, b), pi, po in zip(params, in_pads, out_pads):
        o, i = W.shape
        Wp = jnp.zeros((po, pi), jnp.float32).at[:o, :i].set(W.astype(jnp.float32))
        bp = jnp.zeros((po, 1), jnp.float32).at[:o, :].set(
            jnp.reshape(b, (o, 1)).astype(jnp.float32))
        padded.append((Wp, bp))
    return padded


def pinn_forward(L, params, *, tm=8192, softplus_bf16=False):
    """params: list of (W (out,in), b (out,1)) for the 5 linear layers.

    L is (N, 5) float32, any N (padded internally). Returns (N, 2) float32.
    """
    N, F = L.shape
    assert F == PINN_LAYERS[0]
    out_dim = PINN_LAYERS[-1]

    # ---- grid / tile sizing --------------------------------------------------
    n128 = _round_up(N, 128)                         # lane-align only, no full-tile pad
    tm_des = _round_up(min(max(tm, 128), n128), 128)
    grid = pl.cdiv(n128, tm_des)
    if n128 >= 256:
        grid = max(grid, 2)                          # keep v7x's 2nd TensorCore busy
        if grid % 2:
            grid += 1                                # balanced split across 2 cores
    tm_eff = _round_up(pl.cdiv(n128, grid), 128)     # tail waste <= 127 cols/step
    n_pad = grid * tm_eff

    # ---- operands (transposed: batch on the 128-lane axis) -------------------
    X = jnp.pad(jnp.transpose(L.astype(jnp.float32)),
                ((0, _IN_PAD - F), (0, n_pad - N)))  # (8, n_pad), zero-padded
    sel = _sel_matrix()
    padded_params = _pad_params(params)

    flat_params = []
    in_specs = [pl.BlockSpec((_IN_PAD, tm_eff), lambda i: (0, i)),
                pl.BlockSpec(sel.shape, lambda i: (0, 0))]       # VMEM-resident
    for (W, b) in padded_params:
        flat_params.extend([W, b])
        in_specs.append(pl.BlockSpec(W.shape, lambda i: (0, 0)))  # VMEM-resident
        in_specs.append(pl.BlockSpec(b.shape, lambda i: (0, 0)))

    kernel = functools.partial(pinn_kernel, softplus_bf16=softplus_bf16)

    out = pl.pallas_call(
        kernel,
        out_shape=jax.ShapeDtypeStruct((_OUT_PAD, n_pad), jnp.float32),
        grid_spec=pltpu.PrefetchScalarGridSpec(
            num_scalar_prefetch=0,
            grid=(grid,),
            in_specs=in_specs,
            out_specs=pl.BlockSpec((_OUT_PAD, tm_eff), lambda i: (0, i)),
        ),
        compiler_params=pltpu.CompilerParams(
            dimension_semantics=("parallel",),
            vmem_limit_bytes=32 * 1024 * 1024,
        ),
    )(X, sel, *flat_params)

    return jnp.transpose(out[:out_dim, :N])          # (N, 2)


def init_params(key, layers=PINN_LAYERS, gain=0.1):
    """Xavier-normal weights (gain=0.1), zero biases — matches nn.init in __init__.

    Weights stored (out_features, in_features); biases (out_features, 1).
    """
    params = []
    for i in range(len(layers) - 1):
        fan_in, fan_out = layers[i], layers[i + 1]
        key, sub = jax.random.split(key)
        std = gain * jnp.sqrt(2.0 / (fan_in + fan_out))
        W = std * jax.random.normal(sub, (fan_out, fan_in), dtype=jnp.float32)
        b = jnp.zeros((fan_out, 1), dtype=jnp.float32)
        params.append((W, b))
    return params


def _softplus_ref(z):
    # Exact torch.nn.Softplus(beta=1, threshold=20) semantics for reference.
    return jnp.where(z > 20.0, z, jnp.log1p(jnp.exp(jnp.minimum(z, 20.0))))


def pinn_reference(L, params):
    """Pure-JAX reference of the PyTorch forward (for verification)."""
    a = L
    for (W, b) in params[:-1]:
        a = _softplus_ref(a @ W.T + b.T)
    W, b = params[-1]
    a = a @ W.T + b.T
    t = L[:, 0:1]
    return (1.0 - t) * L[:, 1:3] + t * L[:, 3:5] + t * (1.0 - t) * a


if __name__ == "__main__":
    key = jax.random.PRNGKey(0)
    key, k_in = jax.random.split(key)

    # Deliberately NOT a multiple of 128: exercises lane padding + the forced
    # 2-step grid path (v7x dual-TensorCore sharding).
    N = 300
    L = jax.random.uniform(k_in, (N, PINN_LAYERS[0]), dtype=jnp.float32)
    params = init_params(key)

    out = jax.block_until_ready(pinn_forward(L, params))
    ref = pinn_reference(L, params)
    assert out.shape == (N, 2)
    assert jnp.allclose(out, ref, atol=1e-5, rtol=1e-5), "mismatch vs reference"

    # Tiny batch -> single-grid-step path.
    N2 = 77
    L2 = jax.random.uniform(jax.random.PRNGKey(1), (N2, PINN_LAYERS[0]),
                            dtype=jnp.float32)
    out2 = jax.block_until_ready(pinn_forward(L2, params))
    ref2 = pinn_reference(L2, params)
    assert out2.shape == (N2, 2)
    assert jnp.allclose(out2, ref2, atol=1e-5, rtol=1e-5), "mismatch (small N)"

    # TODO(synk): loss_PDE/loss_ray (autograd-based) and the NN velocity model are
    # outside pinn.forward and are not implemented here.
    print("KERNEL_OK")
</pallas_src>

<mosaic_0001>
module attributes {stable_mosaic.version = 11 : i64} {
  func.func @pinn_kernel(%arg0: i32, %arg1: memref<8x256xf32, #tpu.memory_space<vmem>>, %arg2: memref<16x8xf32, #tpu.memory_space<vmem>>, %arg3: memref<128x8xf32, #tpu.memory_space<vmem>>, %arg4: memref<128x1xf32, #tpu.memory_space<vmem>>, %arg5: memref<128x128xf32, #tpu.memory_space<vmem>>, %arg6: memref<128x1xf32, #tpu.memory_space<vmem>>, %arg7: memref<128x128xf32, #tpu.memory_space<vmem>>, %arg8: memref<128x1xf32, #tpu.memory_space<vmem>>, %arg9: memref<128x128xf32, #tpu.memory_space<vmem>>, %arg10: memref<128x1xf32, #tpu.memory_space<vmem>>, %arg11: memref<8x128xf32, #tpu.memory_space<vmem>>, %arg12: memref<8x1xf32, #tpu.memory_space<vmem>>, %arg13: memref<8x256xf32, #tpu.memory_space<vmem>>) attributes {dimension_semantics = [#tpu.dimension_semantics<parallel>], iteration_bounds = array<i64: 2>, scalar_prefetch = 0 : i64, scratch_operands = 0 : i64, tpu.core_type = #tpu.core_type<tc>, window_params = [{transform_indices = @transform_0, window_bounds = array<i64: 8, 256>}, {pipeline_mode = #tpu.pipeline_mode<synchronous>, transform_indices = @transform_1, window_bounds = array<i64: 16, 8>}, {pipeline_mode = #tpu.pipeline_mode<synchronous>, transform_indices = @transform_2, window_bounds = array<i64: 128, 8>}, {pipeline_mode = #tpu.pipeline_mode<synchronous>, transform_indices = @transform_3, window_bounds = array<i64: 128, 1>}, {pipeline_mode = #tpu.pipeline_mode<synchronous>, transform_indices = @transform_4, window_bounds = array<i64: 128, 128>}, {pipeline_mode = #tpu.pipeline_mode<synchronous>, transform_indices = @transform_5, window_bounds = array<i64: 128, 1>}, {pipeline_mode = #tpu.pipeline_mode<synchronous>, transform_indices = @transform_6, window_bounds = array<i64: 128, 128>}, {pipeline_mode = #tpu.pipeline_mode<synchronous>, transform_indices = @transform_7, window_bounds = array<i64: 128, 1>}, {pipeline_mode = #tpu.pipeline_mode<synchronous>, transform_indices = @transform_8, window_bounds = array<i64: 128, 128>}, {pipeline_mode = #tpu.pipeline_mode<synchronous>, transform_indices = @transform_9, window_bounds = array<i64: 128, 1>}, {pipeline_mode = #tpu.pipeline_mode<synchronous>, transform_indices = @transform_10, window_bounds = array<i64: 8, 128>}, {pipeline_mode = #tpu.pipeline_mode<synchronous>, transform_indices = @transform_11, window_bounds = array<i64: 8, 1>}, {transform_indices = @transform_12, window_bounds = array<i64: 8, 256>}]} {
    %c0 = arith.constant 0 : index
    %c0_0 = arith.constant 0 : index
    %0 = vector.load %arg1[%c0, %c0_0] : memref<8x256xf32, #tpu.memory_space<vmem>>, vector<8x256xf32>
    %c0_1 = arith.constant 0 : index
    %c0_2 = arith.constant 0 : index
    %1 = vector.load %arg3[%c0_1, %c0_2] : memref<128x8xf32, #tpu.memory_space<vmem>>, vector<128x8xf32>
    %cst = arith.constant dense<0.000000e+00> : vector<128x256xf32>
    %2 = tpu.matmul %1, %0, %cst {dimension_numbers = #tpu.dot_dimension_numbers<[1], [0], [0], [1], [0, 0, 1, 1], [], []>} : vector<128x8xf32>, vector<8x256xf32>, vector<128x256xf32> -> vector<128x256xf32>
    %c0_3 = arith.constant 0 : index
    %c0_4 = arith.constant 0 : index
    %3 = vector.load %arg4[%c0_3, %c0_4] : memref<128x1xf32, #tpu.memory_space<vmem>>, vector<128x1xf32>
    %4 = vector.broadcast %3 : vector<128x1xf32> to vector<128x256xf32>
    %5 = arith.addf %2, %4 : vector<128x256xf32>
    %6 = math.absf %5 : vector<128x256xf32>
    %cst_5 = arith.constant 0.000000e+00 : f32
    %7 = vector.broadcast %cst_5 : f32 to vector<128x256xf32>
    %8 = arith.subf %7, %6 : vector<128x256xf32>
    %9 = math.exp %8 : vector<128x256xf32>
    %10 = math.log1p %9 : vector<128x256xf32>
    %cst_6 = arith.constant 0.000000e+00 : f32
    %11 = vector.broadcast %cst_6 : f32 to vector<128x256xf32>
    %12 = arith.maximumf %5, %11 : vector<128x256xf32>
    %13 = arith.addf %12, %10 : vector<128x256xf32>
    %c0_7 = arith.constant 0 : index
    %c0_8 = arith.constant 0 : index
    %14 = vector.load %arg5[%c0_7, %c0_8] : memref<128x128xf32, #tpu.memory_space<vmem>>, vector<128x128xf32>
    %cst_9 = arith.constant dense<0.000000e+00> : vector<128x256xf32>
    %15 = tpu.matmul %14, %13, %cst_9 {dimension_numbers = #tpu.dot_dimension_numbers<[1], [0], [0], [1], [0, 0, 1, 1], [], []>} : vector<128x128xf32>, vector<128x256xf32>, vector<128x256xf32> -> vector<128x256xf32>
    %c0_10 = arith.constant 0 : index
    %c0_11 = arith.constant 0 : index
    %16 = vector.load %arg6[%c0_10, %c0_11] : memref<128x1xf32, #tpu.memory_space<vmem>>, vector<128x1xf32>
    %17 = vector.broadcast %16 : vector<128x1xf32> to vector<128x256xf32>
    %18 = arith.addf %15, %17 : vector<128x256xf32>
    %19 = math.absf %18 : vector<128x256xf32>
    %cst_12 = arith.constant 0.000000e+00 : f32
    %20 = vector.broadcast %cst_12 : f32 to vector<128x256xf32>
    %21 = arith.subf %20, %19 : vector<128x256xf32>
    %22 = math.exp %21 : vector<128x256xf32>
    %23 = math.log1p %22 : vector<128x256xf32>
    %cst_13 = arith.constant 0.000000e+00 : f32
    %24 = vector.broadcast %cst_13 : f32 to vector<128x256xf32>
    %25 = arith.maximumf %18, %24 : vector<128x256xf32>
    %26 = arith.addf %25, %23 : vector<128x256xf32>
    %c0_14 = arith.constant 0 : index
    %c0_15 = arith.constant 0 : index
    %27 = vector.load %arg7[%c0_14, %c0_15] : memref<128x128xf32, #tpu.memory_space<vmem>>, vector<128x128xf32>
    %cst_16 = arith.constant dense<0.000000e+00> : vector<128x256xf32>
    %28 = tpu.matmul %27, %26, %cst_16 {dimension_numbers = #tpu.dot_dimension_numbers<[1], [0], [0], [1], [0, 0, 1, 1], [], []>} : vector<128x128xf32>, vector<128x256xf32>, vector<128x256xf32> -> vector<128x256xf32>
    %c0_17 = arith.constant 0 : index
    %c0_18 = arith.constant 0 : index
    %29 = vector.load %arg8[%c0_17, %c0_18] : memref<128x1xf32, #tpu.memory_space<vmem>>, vector<128x1xf32>
    %30 = vector.broadcast %29 : vector<128x1xf32> to vector<128x256xf32>
    %31 = arith.addf %28, %30 : vector<128x256xf32>
    %32 = math.absf %31 : vector<128x256xf32>
    %cst_19 = arith.constant 0.000000e+00 : f32
    %33 = vector.broadcast %cst_19 : f32 to vector<128x256xf32>
    %34 = arith.subf %33, %32 : vector<128x256xf32>
    %35 = math.exp %34 : vector<128x256xf32>
    %36 = math.log1p %35 : vector<128x256xf32>
    %cst_20 = arith.constant 0.000000e+00 : f32
    %37 = vector.broadcast %cst_20 : f32 to vector<128x256xf32>
    %38 = arith.maximumf %31, %37 : vector<128x256xf32>
    %39 = arith.addf %38, %36 : vector<128x256xf32>
    %c0_21 = arith.constant 0 : index
    %c0_22 = arith.constant 0 : index
    %40 = vector.load %arg9[%c0_21, %c0_22] : memref<128x128xf32, #tpu.memory_space<vmem>>, vector<128x128xf32>
    %cst_23 = arith.constant dense<0.000000e+00> : vector<128x256xf32>
    %41 = tpu.matmul %40, %39, %cst_23 {dimension_numbers = #tpu.dot_dimension_numbers<[1], [0], [0], [1], [0, 0, 1, 1], [], []>} : vector<128x128xf32>, vector<128x256xf32>, vector<128x256xf32> -> vector<128x256xf32>
    %c0_24 = arith.constant 0 : index
    %c0_25 = arith.constant 0 : index
    %42 = vector.load %arg10[%c0_24, %c0_25] : memref<128x1xf32, #tpu.memory_space<vmem>>, vector<128x1xf32>
    %43 = vector.broadcast %42 : vector<128x1xf32> to vector<128x256xf32>
    %44 = arith.addf %41, %43 : vector<128x256xf32>
    %45 = math.absf %44 : vector<128x256xf32>
    %cst_26 = arith.constant 0.000000e+00 : f32
    %46 = vector.broadcast %cst_26 : f32 to vector<128x256xf32>
    %47 = arith.subf %46, %45 : vector<128x256xf32>
    %48 = math.exp %47 : vector<128x256xf32>
    %49 = math.log1p %48 : vector<128x256xf32>
    %cst_27 = arith.constant 0.000000e+00 : f32
    %50 = vector.broadcast %cst_27 : f32 to vector<128x256xf32>
    %51 = arith.maximumf %44, %50 : vector<128x256xf32>
    %52 = arith.addf %51, %49 : vector<128x256xf32>
    %c0_28 = arith.constant 0 : index
    %c0_29 = arith.constant 0 : index
    %53 = vector.load %arg11[%c0_28, %c0_29] : memref<8x128xf32, #tpu.memory_space<vmem>>, vector<8x128xf32>
    %cst_30 = arith.constant dense<0.000000e+00> : vector<8x256xf32>
    %54 = tpu.matmul %53, %52, %cst_30 {dimension_numbers = #tpu.dot_dimension_numbers<[1], [0], [0], [1], [0, 0, 1, 1], [], []>} : vector<8x128xf32>, vector<128x256xf32>, vector<8x256xf32> -> vector<8x256xf32>
    %c0_31 = arith.constant 0 : index
    %c0_32 = arith.constant 0 : index
    %55 = vector.load %arg12[%c0_31, %c0_32] : memref<8x1xf32, #tpu.memory_space<vmem>>, vector<8x1xf32>
    %56 = vector.broadcast %55 : vector<8x1xf32> to vector<8x256xf32>
    %57 = arith.addf %54, %56 : vector<8x256xf32>
    %c0_33 = arith.constant 0 : index
    %c0_34 = arith.constant 0 : index
    %58 = vector.load %arg2[%c0_33, %c0_34] : memref<16x8xf32, #tpu.memory_space<vmem>>, vector<16x8xf32>
    %cst_35 = arith.constant dense<0.000000e+00> : vector<16x256xf32>
    %59 = tpu.matmul %58, %0, %cst_35 {dimension_numbers = #tpu.dot_dimension_numbers<[1], [0], [0], [1], [0, 0, 1, 1], [], []>} : vector<16x8xf32>, vector<8x256xf32>, vector<16x256xf32> -> vector<16x256xf32>
    %60 = vector.extract_strided_slice %59 {offsets = [0, 0], sizes = [8, 256], strides = [1, 1]} : vector<16x256xf32> to vector<8x256xf32>
    %61 = vector.extract_strided_slice %59 {offsets = [8, 0], sizes = [8, 256], strides = [1, 1]} : vector<16x256xf32> to vector<8x256xf32>
    %62 = vector.extract_strided_slice %0 {offsets = [0, 0], sizes = [1, 256], strides = [1, 1]} : vector<8x256xf32> to vector<1x256xf32>
    %cst_36 = arith.constant 1.000000e+00 : f32
    %63 = vector.broadcast %cst_36 : f32 to vector<1x256xf32>
    %64 = arith.subf %63, %62 : vector<1x256xf32>
    %65 = vector.broadcast %64 : vector<1x256xf32> to vector<8x256xf32>
    %66 = arith.mulf %65, %60 : vector<8x256xf32>
    %67 = vector.broadcast %62 : vector<1x256xf32> to vector<8x256xf32>
    %68 = arith.mulf %67, %61 : vector<8x256xf32>
    %69 = arith.addf %66, %68 : vector<8x256xf32>
    %cst_37 = arith.constant 1.000000e+00 : f32
    %70 = vector.broadcast %cst_37 : f32 to vector<1x256xf32>
    %71 = arith.subf %70, %62 : vector<1x256xf32>
    %72 = arith.mulf %62, %71 : vector<1x256xf32>
    %73 = vector.broadcast %72 : vector<1x256xf32> to vector<8x256xf32>
    %74 = arith.mulf %73, %57 : vector<8x256xf32>
    %75 = arith.addf %69, %74 : vector<8x256xf32>
    %c0_38 = arith.constant 0 : index
    %c0_39 = arith.constant 0 : index
    %76 = vector.load %arg13[%c0_38, %c0_39] : memref<8x256xf32, #tpu.memory_space<vmem>>, vector<8x256xf32>
    tpu.vector_store %arg13[%c0_38, %c0_39], %75 {strides = array<i32>} : memref<8x256xf32, #tpu.memory_space<vmem>>, vector<8x256xf32>,
    return
  }
  func.func @transform_0(%arg0: i32) -> (i32, i32) {
    %c0_i32 = arith.constant 0 : i32
    %c0_i32_0 = arith.constant 0 : i32
    return %c0_i32, %arg0 : i32, i32
  }
  func.func @transform_1(%arg0: i32) -> (i32, i32) {
    %c0_i32 = arith.constant 0 : i32
    %c0_i32_0 = arith.constant 0 : i32
    %c0_i32_1 = arith.constant 0 : i32
    return %c0_i32, %c0_i32_0 : i32, i32
  }
  func.func @transform_2(%arg0: i32) -> (i32, i32) {
    %c0_i32 = arith.constant 0 : i32
    %c0_i32_0 = arith.constant 0 : i32
    %c0_i32_1 = arith.constant 0 : i32
    return %c0_i32, %c0_i32_0 : i32, i32
  }
  func.func @transform_3(%arg0: i32) -> (i32, i32) {
    %c0_i32 = arith.constant 0 : i32
    %c0_i32_0 = arith.constant 0 : i32
    %c0_i32_1 = arith.constant 0 : i32
    return %c0_i32, %c0_i32_0 : i32, i32
  }
  func.func @transform_4(%arg0: i32) -> (i32, i32) {
    %c0_i32 = arith.constant 0 : i32
    %c0_i32_0 = arith.constant 0 : i32
    %c0_i32_1 = arith.constant 0 : i32
    return %c0_i32, %c0_i32_0 : i32, i32
  }
  func.func @transform_5(%arg0: i32) -> (i32, i32) {
    %c0_i32 = arith.constant 0 : i32
    %c0_i32_0 = arith.constant 0 : i32
    %c0_i32_1 = arith.constant 0 : i32
    return %c0_i32, %c0_i32_0 : i32, i32
  }
  func.func @transform_6(%arg0: i32) -> (i32, i32) {
    %c0_i32 = arith.constant 0 : i32
    %c0_i32_0 = arith.constant 0 : i32
    %c0_i32_1 = arith.constant 0 : i32
    return %c0_i32, %c0_i32_0 : i32, i32
  }
  func.func @transform_7(%arg0: i32) -> (i32, i32) {
    %c0_i32 = arith.constant 0 : i32
    %c0_i32_0 = arith.constant 0 : i32
    %c0_i32_1 = arith.constant 0 : i32
    return %c0_i32, %c0_i32_0 : i32, i32
  }
  func.func @transform_8(%arg0: i32) -> (i32, i32) {
    %c0_i32 = arith.constant 0 : i32
    %c0_i32_0 = arith.constant 0 : i32
    %c0_i32_1 = arith.constant 0 : i32
    return %c0_i32, %c0_i32_0 : i32, i32
  }
  func.func @transform_9(%arg0: i32) -> (i32, i32) {
    %c0_i32 = arith.constant 0 : i32
    %c0_i32_0 = arith.constant 0 : i32
    %c0_i32_1 = arith.constant 0 : i32
    return %c0_i32, %c0_i32_0 : i32, i32
  }
  func.func @transform_10(%arg0: i32) -> (i32, i32) {
    %c0_i32 = arith.constant 0 : i32
    %c0_i32_0 = arith.constant 0 : i32
    %c0_i32_1 = arith.constant 0 : i32
    return %c0_i32, %c0_i32_0 : i32, i32
  }
  func.func @transform_11(%arg0: i32) -> (i32, i32) {
    %c0_i32 = arith.constant 0 : i32
    %c0_i32_0 = arith.constant 0 : i32
    %c0_i32_1 = arith.constant 0 : i32
    return %c0_i32, %c0_i32_0 : i32, i32
  }
  func.func @transform_12(%arg0: i32) -> (i32, i32) {
    %c0_i32 = arith.constant 0 : i32
    %c0_i32_0 = arith.constant 0 : i32
    return %c0_i32, %arg0 : i32, i32
  }
}

</mosaic_0001>

<bundles_post_ra>
// kernel: tpu_custom_call.1
= control target key start
LH: loop header
LB: loop body
LE: loop exit
PB: predicated region body
PF: predicated region fallthrough
CT: control target
= control target key end

     0   :  { %s7955_s0 = inlined_call_operand.vmem [shape: f32[8,512], index: 0, kind: input, shape index: {}]   ;;  %s7956_s1 = inlined_call_operand.vmem [shape: f32[16,8], index: 1, kind: input, shape index: {}]   ;;  %s7957_s2 = inlined_call_operand.vmem [shape: f32[128,8], index: 2, kind: input, shape index: {}]   ;;  %s7958_s3 = inlined_call_operand.vmem [shape: f32[128,1], index: 3, kind: input, shape index: {}]   ;;  %s7959_s4 = inlined_call_operand.vmem [shape: f32[128,128], index: 4, kind: input, shape index: {}]   ;;  %s7960_s5 = inlined_call_operand.vmem [shape: f32[128,1], index: 5, kind: input, shape index: {}]   ;;  %s7961_s6 = inlined_call_operand.vmem [shape: f32[128,128], index: 6, kind: input, shape index: {}]   ;;  %s7962_s7 = inlined_call_operand.vmem [shape: f32[128,1], index: 7, kind: input, shape index: {}]   ;;  %s7963_s8 = inlined_call_operand.vmem [shape: f32[128,128], index: 8, kind: input, shape index: {}]   ;;  %s7964_s9 = inlined_call_operand.vmem [shape: f32[128,1], index: 9, kind: input, shape index: {}]   ;;  %s7965_s10 = inlined_call_operand.vmem [shape: f32[8,128], index: 10, kind: input, shape index: {}]   ;;  %s7966_s11 = inlined_call_operand.vmem [shape: f32[8,1], index: 11, kind: input, shape index: {}]   ;;  %s7967_s12 = inlined_call_operand.hbm [shape: f32[8,512], index: 12, kind: output, shape index: {}]  }
   0x1   :  { %8132 = sst [smem:[#allocation73_spill]] %s7955_s0 }
   0x2   :  { %17 = vsyncpa [#allocation3], 0 }
   0x3   :  { %19 = vsyncpa [#allocation3 + $0x1], 0  ;;  %s4473_s21 = smov 0   ;;  %s4475_s22 = smov 0  }
   0x4   :  { %s4477_s23 = smov 0   ;;  %s4479_s24 = smov 0  }
   0x5 LB: > { %8133 = sst [smem:[#allocation5_spill]] %s4399_s23  ;;  %s4494_s25 = sadd.s32 4294967295, %s4403_s24   ;;  %s4403_s24 = sphi %s4479_s24, %s8918_s24   ;;  %s4399_s23 = sphi %s4477_s23, %s8915_s23   ;;  %s4395_s22 = sphi %s4475_s22, %s8917_s22   ;;  %s4391_s21 = sphi %s4473_s21, %s8916_s21  }
   0x6   : > { %s3755_s26 = sadd.s32 4294967294, %s4403_s24   ;;  %s4498_s27 = sadd.s32 1, %s4403_s24  }
   0x7   : > { %s289_s28 = sadd.s32 1, %s4399_s23  ;;  %s286_s29 = ssub.s32 %s4403_s24, %s4498_s27 }
   0x8   : > { %p299_p0 = scmp.ne.s32.totalorder %s4399_s23, %s4395_s22  ;;  %p287_p1 = scmp.eq.s32.totalorder %s286_s29, 0 }
   0x9   : > { %p300_p2 = scmp.eq.s32.totalorder %s4494_s25, 1  ;;  %p305_p3 = scmp.ne.s32.totalorder %s4395_s22, %s4391_s21 }
   0xa   : > { %p306_p4 = scmp.eq.s32.totalorder %s3755_s26, 1  ;;  %p3758_p7 = scmp.ge.s32.totalorder %s4403_s24, 1 }
   0xb   : > { %s4509_s30 = scalar_select %p287_p1, %s4399_s23, %s289_s28  }
   0xc   : > { %p4511_p5 = por %p300_p2, %p299_p0  ;;  %p4515_p6 = por %p306_p4, %p305_p3 }
   0xd   : > { %8134 = sst [smem:[#allocation6_spill]] %s4509_s30  ;;  %p366_p8 = scmp.lt.s32.totalorder %s4403_s24, 3 }
   0xf   : > { %p367_p9 = pnand %p3758_p7, %p366_p8 }
  0x11   : > { %370 = sbr.rel (%p367_p9) target bundleno = 1640 (0x668), region = 68 }
  0x16   : > { %s3760_s15 = sshll.u32 %s4494_s25, 1  ;;  %v448_v0 = vld [vmem:[%s7958_s3 + $0x78] sm:$0xff]  ;;  %v7969_v1 = vmov 0.0   ;;  %v4406_v2 = vmov 0   ;;  %v446_v3 = vld [vmem:[%s7958_s3 + $0x68] sm:$0xff]  ;;  %v447_v4 = vld [vmem:[%s7958_s3 + $0x70] sm:$0xff] }
  0x17   : > { %p409_p10 = scmp.lt.s32.totalorder %s3760_s15, 3  ;;  %642 = vmatprep.mubr.f32.mxu0 %v7969_v1  ;;  %3827 = vset.pattern.permute.xlu0 %v4406_v2  ;;  %v445_v5 = vld [vmem:[%s7958_s3 + $0x60] sm:$0xff]  ;;  %s8137_s0 = sld [smem:[#allocation73_spill]]  ;;  %vm529_vm0 = vcmask 64512   ;;  %v444_v9 = vld [vmem:[%s7958_s3 + $0x58] sm:$0xff]  ;;  %v443_v10 = vld [vmem:[%s7958_s3 + $0x50] sm:$0xff] }
  0x18   : > { %526 = vperm.xlu0 %3827, %v448_v0   ;;  %3828 = vset.pattern.permute.xlu1 %v4406_v2  ;;  %v417_v6 = vld [vmem:[%s7957_s2] sm:$0xff]  ;;  %v418_v11 = vld [vmem:[%s7957_s2 + $0x8] sm:$0xff]  ;;  %v419_v14 = vld [vmem:[%s7957_s2 + $0x10] sm:$0xff]  ;;  %s3785_s29 = sshll.u32 %s4494_s25, 8  ;;  %s4407_s25 = smov [#allocation2]  }
  0x19   : > { %s8920_s15 = smov (!%p409_p10, %s3760_s15), 3  ;;  %516 = vperm.xlu1 %3828, %v446_v3   ;;  %1395 = vmatprep.mubr.f32.mxu1 %v7969_v1  ;;  %v442_v12 = vld [vmem:[%s7958_s3 + $0x48] sm:$0xff]  ;;  %v441_v13 = vld [vmem:[%s7958_s3 + $0x40] sm:$0xff]  ;;  %v440_v15 = vld [vmem:[%s7958_s3 + $0x38] sm:$0xff]  ;;  %s3694_s20 = scalar_lea.hbm %s7967_s12, %s3785_s29 }
  0x1a   : > { %s3761_s16 = sshll.u32 %s8920_s15, 3  ;;  %v439_v16 = vld [vmem:[%s7958_s3 + $0x30] sm:$0xff]  ;;  %v420_v17 = vld [vmem:[%s7957_s2 + $0x18] sm:$0xff]  ;;  %v438_v18 = vld [vmem:[%s7958_s3 + $0x28] sm:$0xff]  ;;  %s4347_s30 = sshll.u32 %s4407_s25, 4  ;;  %s4348_s30 = int_to_ptr.vmem [resolvable:$false] %s4347_s30 }
  0x1b   : > { %v437_v19 = vld [vmem:[%s7958_s3 + $0x20] sm:$0xff]  ;;  %v436_v21 = vld [vmem:[%s7958_s3 + $0x18] sm:$0xff]  ;;  %v435_v22 = vld [vmem:[%s7958_s3 + $0x10] sm:$0xff] }
  0x1c   : > { %521 = vperm.xlu0 %3827, %v447_v4   ;;  %v421_v20 = vld [vmem:[%s7957_s2 + $0x20] sm:$0xff]  ;;  %v422_v23 = vld [vmem:[%s7957_s2 + $0x28] sm:$0xff]  ;;  %v423_v26 = vld [vmem:[%s7957_s2 + $0x30] sm:$0xff] }
  0x1d   : > { %s4539_s23 = scalar_lea.vmem %s8137_s0, %s3761_s16  ;;  %511 = vperm.xlu1 %3828, %v445_v5   ;;  %v434_v24 = vld [vmem:[%s7958_s3 + $0x8] sm:$0xff]  ;;  %v433_v25 = vld [vmem:[%s7958_s3] sm:$0xff]  ;;  %v1250_v27 = vld [vmem:[%s7960_s5 + $0x78] sm:$0xff] }
  0x1e   : > { %v416_v7 = vld [vmem:[%s4539_s23 + $0x8] sm:$0xff]  ;;  %v415_v8 = vld [vmem:[%s4539_s23] sm:$0xff]  ;;  %v1249_v28 = vld [vmem:[%s7960_s5 + $0x70] sm:$0xff] }
  0x1f   : > { %608 = vmatprep.subr.mxu0 %v416_v7  ;;  %v424_v29 = vld [vmem:[%s7957_s2 + $0x38] sm:$0xff]  ;;  %v1248_v30 = vld [vmem:[%s7960_s5 + $0x68] sm:$0xff]  ;;  %v1247_v31 = vld [vmem:[%s7960_s5 + $0x60] sm:$0xff] }
  0x20   : > { %609 = vmatpush1.msra.mxu0 %v415_v8  ;;  %506 = vperm.xlu0 %3827, %v444_v9   ;;  %v425_v32 = vld [vmem:[%s7957_s2 + $0x40] sm:$0xff]  ;;  %v1246_v33 = vld [vmem:[%s7960_s5 + $0x58] sm:$0xff]  ;;  %v1245_v34 = vld [vmem:[%s7960_s5 + $0x50] sm:$0xff] }
  0x21   : > { %3762 = vmatmul.mubr.msk.f32.vlgmr.msra.gmra.mxu0 %vm529_vm0, %v417_v6  ;;  %501 = vperm.xlu1 %3828, %v443_v10   ;;  %v426_v35 = vld [vmem:[%s7957_s2 + $0x48] sm:$0xff]  ;;  %v1243_v37 = vld [vmem:[%s7960_s5 + $0x40] sm:$0xff]  ;;  %v427_v38 = vld [vmem:[%s7957_s2 + $0x50] sm:$0xff] }
  0x22   : > { %648 = vmatprep.mubr.f32.mxu0 %v7969_v1  ;;  %v1244_v36 = vld [vmem:[%s7960_s5 + $0x48] sm:$0xff]  ;;  %v1242_v39 = vld [vmem:[%s7960_s5 + $0x38] sm:$0xff]  ;;  %v1241_v40 = vld [vmem:[%s7960_s5 + $0x30] sm:$0xff] }
  0x23   : > { %v428_v41 = vld [vmem:[%s7957_s2 + $0x58] sm:$0xff]  ;;  %v1240_v42 = vld [vmem:[%s7960_s5 + $0x28] sm:$0xff]  ;;  %v1239_v43 = vld [vmem:[%s7960_s5 + $0x20] sm:$0xff] }
  0x24   : > { %496 = vperm.xlu0 %3827, %v442_v12   ;;  %v429_v44 = vld [vmem:[%s7957_s2 + $0x60] sm:$0xff]  ;;  %v1238_v45 = vld [vmem:[%s7960_s5 + $0x18] sm:$0xff]  ;;  %v1237_v46 = vld [vmem:[%s7960_s5 + $0x10] sm:$0xff] }
  0x25   : > { %3763 = vmatmul.mubr.msk.f32.gmra.mxu0 %vm529_vm0, %v418_v11  ;;  %491 = vperm.xlu1 %3828, %v441_v13   ;;  %v430_v47 = vld [vmem:[%s7957_s2 + $0x68] sm:$0xff]  ;;  %v1235_v49 = vld [vmem:[%s7960_s5] sm:$0xff]  ;;  %v431_v50 = vld [vmem:[%s7957_s2 + $0x70] sm:$0xff] }
  0x26   : > { %654 = vmatprep.mubr.f32.mxu0 %v7969_v1  ;;  %v1236_v48 = vld [vmem:[%s7960_s5 + $0x8] sm:$0xff]  ;;  %v2003_v51 = vld [vmem:[%s7962_s7 + $0x78] sm:$0xff]  ;;  %v2002_v52 = vld [vmem:[%s7962_s7 + $0x70] sm:$0xff] }
  0x27   : > { %v432_v53 = vld [vmem:[%s7957_s2 + $0x78] sm:$0xff]  ;;  %v2001_v54 = vld [vmem:[%s7962_s7 + $0x68] sm:$0xff]  ;;  %v2000_v55 = vld [vmem:[%s7962_s7 + $0x60] sm:$0xff] }
  0x28   : > { %486 = vperm.xlu0 %3827, %v440_v15   ;;  %v1999_v56 = vld [vmem:[%s7962_s7 + $0x58] sm:$0xff]  ;;  %v1998_v57 = vld [vmem:[%s7962_s7 + $0x50] sm:$0xff]  ;;  %v1997_v58 = vld [vmem:[%s7962_s7 + $0x48] sm:$0xff] }
  0x29   : > { %3764 = vmatmul.mubr.msk.f32.gmra.mxu0 %vm529_vm0, %v419_v14  ;;  %481 = vperm.xlu1 %3828, %v439_v16   ;;  %v1996_v59 = vld [vmem:[%s7962_s7 + $0x40] sm:$0xff]  ;;  %v1995_v60 = vld [vmem:[%s7962_s7 + $0x38] sm:$0xff]  ;;  %v1994_v61 = vld [vmem:[%s7962_s7 + $0x30] sm:$0xff] }
  0x2a   : > { %660 = vmatprep.mubr.f32.mxu0 %v7969_v1  ;;  %v1993_v62 = vld [vmem:[%s7962_s7 + $0x28] sm:$0xff]  ;;  %v1992_v63 = vld [vmem:[%s7962_s7 + $0x20] sm:$0xff]  ;;  %v1991_v0 = vld [vmem:[%s7962_s7 + $0x18] sm:$0xff] }
  0x2b   : > { %v1990_v2 = vld [vmem:[%s7962_s7 + $0x10] sm:$0xff]  ;;  %v1989_v3 = vld [vmem:[%s7962_s7 + $0x8] sm:$0xff]  ;;  %v1988_v4 = vld [vmem:[%s7962_s7] sm:$0xff] }
  0x2c   : > { %476 = vperm.xlu0 %3827, %v438_v18   ;;  %v2756_v5 = vld [vmem:[%s7964_s9 + $0x78] sm:$0xff]  ;;  %v2755_v6 = vld [vmem:[%s7964_s9 + $0x70] sm:$0xff]  ;;  %v2754_v7 = vld [vmem:[%s7964_s9 + $0x68] sm:$0xff] }
  0x2d   : > { %3765 = vmatmul.mubr.msk.f32.gmra.mxu0 %vm529_vm0, %v420_v17  ;;  %471 = vperm.xlu1 %3828, %v437_v19   ;;  %v2753_v8 = vld [vmem:[%s7964_s9 + $0x60] sm:$0xff]  ;;  %v2752_v9 = vld [vmem:[%s7964_s9 + $0x58] sm:$0xff]  ;;  %v2751_v10 = vld [vmem:[%s7964_s9 + $0x50] sm:$0xff] }
  0x2e   : > { %666 = vmatprep.mubr.f32.mxu0 %v7969_v1  ;;  %v2750_v11 = vld [vmem:[%s7964_s9 + $0x48] sm:$0xff]  ;;  %v2749_v12 = vld [vmem:[%s7964_s9 + $0x40] sm:$0xff]  ;;  %v2748_v13 = vld [vmem:[%s7964_s9 + $0x38] sm:$0xff] }
  0x2f   : > { %v2747_v14 = vld [vmem:[%s7964_s9 + $0x30] sm:$0xff]  ;;  %v2746_v15 = vld [vmem:[%s7964_s9 + $0x28] sm:$0xff]  ;;  %v2745_v16 = vld [vmem:[%s7964_s9 + $0x20] sm:$0xff] }
  0x30   : > { %466 = vperm.xlu0 %3827, %v436_v21   ;;  %v2744_v17 = vld [vmem:[%s7964_s9 + $0x18] sm:$0xff]  ;;  %v2743_v18 = vld [vmem:[%s7964_s9 + $0x10] sm:$0xff]  ;;  %v2742_v19 = vld [vmem:[%s7964_s9 + $0x8] sm:$0xff] }
  0x31   : > { %3766 = vmatmul.mubr.msk.f32.gmra.mxu0 %vm529_vm0, %v421_v20  ;;  %461 = vperm.xlu1 %3828, %v435_v22   ;;  %v2741_v20 = vld [vmem:[%s7964_s9] sm:$0xff] }
  0x32   : > { %672 = vmatprep.mubr.f32.mxu0 %v7969_v1  ;;  %v3479_v21 = vld [vmem:[%s7966_s11] sm:$0xff] }
  0x34   : > { %456 = vperm.xlu0 %3827, %v434_v24  }
  0x35   : > { %3767 = vmatmul.mubr.msk.f32.gmra.mxu0 %vm529_vm0, %v422_v23  ;;  %451 = vperm.xlu1 %3828, %v433_v25  }
  0x36   : > { %678 = vmatprep.mubr.f32.mxu0 %v7969_v1 }
  0x38   : > { %1328 = vperm.xlu0 %3827, %v1250_v27  }
  0x39   : > { %3768 = vmatmul.mubr.msk.f32.gmra.mxu0 %vm529_vm0, %v423_v26  ;;  %1323 = vperm.xlu1 %3828, %v1249_v28  }
  0x3a   : > { %684 = vmatprep.mubr.f32.mxu0 %v7969_v1 }
  0x3c   : > { %1318 = vperm.xlu0 %3827, %v1248_v30  }
  0x3d   : > { %3769 = vmatmul.mubr.msk.f32.gmra.mxu0 %vm529_vm0, %v424_v29  ;;  %1313 = vperm.xlu1 %3828, %v1247_v31  }
  0x3e   : > { %690 = vmatprep.mubr.f32.mxu0 %v7969_v1 }
  0x40   : > { %1308 = vperm.xlu0 %3827, %v1246_v33  }
  0x41   : > { %3770 = vmatmul.mubr.msk.f32.gmra.mxu0 %vm529_vm0, %v425_v32  ;;  %1303 = vperm.xlu1 %3828, %v1245_v34  }
  0x42   : > { %696 = vmatprep.mubr.f32.mxu0 %v7969_v1 }
  0x44   : > { %1298 = vperm.xlu0 %3827, %v1244_v36  }
  0x45   : > { %3771 = vmatmul.mubr.msk.f32.gmra.mxu0 %vm529_vm0, %v426_v35  ;;  %1293 = vperm.xlu1 %3828, %v1243_v37  }
  0x46   : > { %702 = vmatprep.mubr.f32.mxu0 %v7969_v1 }
  0x48   : > { %1288 = vperm.xlu0 %3827, %v1242_v39  }
  0x49   : > { %3772 = vmatmul.mubr.msk.f32.gmra.mxu0 %vm529_vm0, %v427_v38  ;;  %1283 = vperm.xlu1 %3828, %v1241_v40  }
  0x4a   : > { %708 = vmatprep.mubr.f32.mxu0 %v7969_v1 }
  0x4c   : > { %1278 = vperm.xlu0 %3827, %v1240_v42  }
  0x4d   : > { %3773 = vmatmul.mubr.msk.f32.gmra.mxu0 %vm529_vm0, %v428_v41  ;;  %1273 = vperm.xlu1 %3828, %v1239_v43  }
  0x4e   : > { %714 = vmatprep.mubr.f32.mxu0 %v7969_v1 }
  0x50   : > { %1268 = vperm.xlu0 %3827, %v1238_v45  }
  0x51   : > { %3774 = vmatmul.mubr.msk.f32.gmra.mxu0 %vm529_vm0, %v429_v44  ;;  %1263 = vperm.xlu1 %3828, %v1237_v46  }
  0x52   : > { %720 = vmatprep.mubr.f32.mxu0 %v7969_v1 }
  0x54   : > { %1258 = vperm.xlu0 %3827, %v1236_v48  }
  0x55   : > { %3775 = vmatmul.mubr.msk.f32.gmra.mxu0 %vm529_vm0, %v430_v47  ;;  %1253 = vperm.xlu1 %3828, %v1235_v49  }
  0x56   : > { %726 = vmatprep.mubr.f32.mxu0 %v7969_v1 }
  0x58   : > { %2081 = vperm.xlu0 %3827, %v2003_v51  }
  0x59   : > { %3776 = vmatmul.mubr.msk.f32.gmra.mxu0 %vm529_vm0, %v431_v50  ;;  %2076 = vperm.xlu1 %3828, %v2002_v52  }
  0x5a   : > { %732 = vmatprep.mubr.f32.mxu0 %v7969_v1 }
  0x5c   : > { %2071 = vperm.xlu0 %3827, %v2001_v54  }
  0x5d   : > { %3777 = vmatmul.mubr.msk.f32.gmra.mxu0 %vm529_vm0, %v432_v53  ;;  %2066 = vperm.xlu1 %3828, %v2000_v55  }
  0x5e   : > { %2148 = vmatprep.mubr.f32.mxu0 %v7969_v1 }
  0x60   : > { %2061 = vperm.xlu0 %3827, %v1999_v56  }
  0x61   : > { %2056 = vperm.xlu1 %3828, %v1998_v57  }
  0x64   : > { %2051 = vperm.xlu0 %3827, %v1997_v58  }
  0x65   : > { %2046 = vperm.xlu1 %3828, %v1996_v59  }
  0x68   : > { %2041 = vperm.xlu0 %3827, %v1995_v60  }
  0x69   : > { %2036 = vperm.xlu1 %3828, %v1994_v61  }
  0x6c   : > { %2031 = vperm.xlu0 %3827, %v1993_v62  }
  0x6d   : > { %2026 = vperm.xlu1 %3828, %v1992_v63  }
  0x70   : > { %2021 = vperm.xlu0 %3827, %v1991_v0  }
  0x71   : > { %2016 = vperm.xlu1 %3828, %v1990_v2  }
  0x74   : > { %2011 = vperm.xlu0 %3827, %v1989_v3  }
  0x75   : > { %2006 = vperm.xlu1 %3828, %v1988_v4  }
  0x78   : > { %2834 = vperm.xlu0 %3827, %v2756_v5  }
  0x79   : > { %2829 = vperm.xlu1 %3828, %v2755_v6  }
  0x7c   : > { %2824 = vperm.xlu0 %3827, %v2754_v7  }
  0x7d   : > { %2819 = vperm.xlu1 %3828, %v2753_v8  }
  0x80   : > { %2814 = vperm.xlu0 %3827, %v2752_v9  }
  0x81   : > { %2809 = vperm.xlu1 %3828, %v2751_v10  }
  0x84   : > { %2804 = vperm.xlu0 %3827, %v2750_v11  }
  0x85   : > { %2799 = vperm.xlu1 %3828, %v2749_v12  }
  0x88   : > { %2794 = vperm.xlu0 %3827, %v2748_v13  }
  0x89   : > { %2789 = vperm.xlu1 %3828, %v2747_v14  }
  0x8c   : > { %2784 = vperm.xlu0 %3827, %v2746_v15  }
  0x8d   : > { %2779 = vperm.xlu1 %3828, %v2745_v16  }
  0x90   : > { %2774 = vperm.xlu0 %3827, %v2744_v17  }
  0x91   : > { %2769 = vperm.xlu1 %3828, %v2743_v18  }
  0x93   : > { %v4808_v23 = vpop.permute.xlu0 %526 }
  0x94   : > { %2764 = vperm.xlu0 %3827, %v2742_v19   ;;  %v4806_v22 = vpop.permute.xlu1 %516 }
  0x95   : > { %2759 = vperm.xlu1 %3828, %v2741_v20  }
  0x97   : > { %v4812_v25 = vpop.permute.xlu0 %521 }
  0x98   : > { %3482 = vperm.xlu0 %3827, %v3479_v21   ;;  %v4810_v24 = vpop.permute.xlu1 %511 }
  0x9b   : > { %v4816_v27 = vpop.permute.xlu0 %506 }
  0x9c   : > { %v4814_v26 = vpop.permute.xlu1 %501 }
  0x9f   : > { %v4820_v29 = vpop.permute.xlu0 %496 }
  0xa0   : > { %v4818_v28 = vpop.permute.xlu1 %491 }
  0xa3   : > { %v4824_v31 = vpop.permute.xlu0 %486 }
  0xa4   : > { %v4822_v30 = vpop.permute.xlu1 %481 }
  0xa7   : > { %v477_v33 = vpop.permute.xlu0 %476 }
  0xa8   : > { %v472_v32 = vpop.permute.xlu1 %471 }
  0xab   : > { %v467_v35 = vpop.permute.xlu0 %466 }
  0xac   : > { %v462_v34 = vpop.permute.xlu1 %461 }
  0xaf   : > { %v457_v41 = vpop.permute.xlu0 %456 }
  0xb0   : > { %v452_v37 = vpop.permute.xlu1 %451 }
  0xe1   : > { %v644_v36 = vpop.f32.mrf.mxu0 }
  0xe2   : > { %v4826_v39 = vadd.f32 %v644_v36, %v452_v37 }
  0xe3   : > { %v646_v38 = vpop.f32.mrf.mxu0 }
  0xe4   : > { %8138 = vst [vmem:[#allocation7_spill] sm:$0xff] %v4826_v39  ;;  %v4828_v42 = vadd.f32 %v646_v38, %v452_v37  ;;  %v739_v44 = vand.u32 2147483647, %v4826_v39 }
  0xe5   : > { %v650_v40 = vpop.f32.mrf.mxu0 }
  0xe6   : > { %8139 = vst [vmem:[#allocation8_spill] sm:$0xff] %v4828_v42  ;;  %v4831_v45 = vadd.f32 %v650_v40, %v457_v41  ;;  %v740_v48 = vand.u32 2147483647, %v4828_v42  ;;  %v771_v50 = vsub.f32 0.0, %v739_v44 }
  0xe7   : > { %v652_v43 = vpop.f32.mrf.mxu0 }
  0xe8   : > { %8140 = vst [vmem:[#allocation9_spill] sm:$0xff] %v4831_v45  ;;  %v4833_v47 = vadd.f32 %v652_v43, %v457_v41  ;;  %v741_v51 = vand.u32 2147483647, %v4831_v45  ;;  %v772_v56 = vsub.f32 0.0, %v740_v48  ;;  %v803_v58 = vmul.f32 1.442695, %v771_v50 }
  0xe9   : > { %v656_v46 = vpop.f32.mrf.mxu0 }
  0xea   : > { %8141 = vst [vmem:[#allocation10_spill] sm:$0xff] %v4833_v47  ;;  %v4837_v52 = vadd.f32 %v656_v46, %v462_v34  ;;  %v742_v55 = vand.u32 2147483647, %v4833_v47  ;;  %v773_v59 = vsub.f32 0.0, %v741_v51  ;;  %v805_v2 = vmul.f32 1.442695, %v772_v56 }
  0xeb   : > { %v658_v49 = vpop.f32.mrf.mxu0  ;;  %3829 = vpow2.f32 %v803_v58 }
  0xec   : > { %8142 = vst [vmem:[#allocation11_spill] sm:$0xff] %v4837_v52  ;;  %v4839_v53 = vadd.f32 %v658_v49, %v462_v34  ;;  %v743_v60 = vand.u32 2147483647, %v4837_v52  ;;  %v774_v0 = vsub.f32 0.0, %v742_v55  ;;  %v807_v4 = vmul.f32 1.442695, %v773_v59 }
  0xed   : > { %v662_v54 = vpop.f32.mrf.mxu0  ;;  %3831 = vpow2.f32 %v805_v2 }
  0xee   : > { %8143 = vst [vmem:[#allocation12_spill] sm:$0xff] %v4839_v53  ;;  %v744_v61 = vand.u32 2147483647, %v4839_v53  ;;  %v4844_v62 = vadd.f32 %v662_v54, %v467_v35  ;;  %v775_v5 = vsub.f32 0.0, %v743_v60  ;;  %v809_v10 = vmul.f32 1.442695, %v774_v0 }
  0xef   : > { %v664_v57 = vpop.f32.mrf.mxu0  ;;  %3833 = vpow2.f32 %v807_v4 }
  0xf0   : > { %8144 = vst [vmem:[#allocation13_spill] sm:$0xff] %v4844_v62  ;;  %v4846_v6 = vadd.f32 %v664_v57, %v467_v35  ;;  %v776_v7 = vsub.f32 0.0, %v744_v61  ;;  %v745_v8 = vand.u32 2147483647, %v4844_v62  ;;  %v811_v14 = vmul.f32 1.442695, %v775_v5 }
  0xf1   : > { %v668_v63 = vpop.f32.mrf.mxu0  ;;  %3835 = vpow2.f32 %v809_v10 }
  0xf2   : > { %8145 = vst [vmem:[#allocation14_spill] sm:$0xff] %v4846_v6  ;;  %v4849_v11 = vadd.f32 %v668_v63, %v472_v32  ;;  %v746_v15 = vand.u32 2147483647, %v4846_v6  ;;  %v813_v16 = vmul.f32 1.442695, %v776_v7  ;;  %v777_v17 = vsub.f32 0.0, %v745_v8 }
  0xf3   : > { %v670_v3 = vpop.f32.mrf.mxu0  ;;  %3837 = vpow2.f32 %v811_v14 }
  0xf4   : > { %8146 = vst [vmem:[#allocation15_spill] sm:$0xff] %v4849_v11  ;;  %v4851_v12 = vadd.f32 %v670_v3, %v472_v32  ;;  %v747_v20 = vand.u32 2147483647, %v4849_v11  ;;  %v778_v32 = vsub.f32 0.0, %v746_v15  ;;  %3839 = vpow2.f32 %v813_v16 }
  0xf5   : > { %v674_v9 = vpop.f32.mrf.mxu0  ;;  %v815_v36 = vmul.f32 1.442695, %v777_v17 }
  0xf6   : > { %8147 = vst [vmem:[#allocation16_spill] sm:$0xff] %v4851_v12  ;;  %v4854_v18 = vadd.f32 %v674_v9, %v477_v33  ;;  %v748_v34 = vand.u32 2147483647, %v4851_v12  ;;  %v779_v41 = vsub.f32 0.0, %v747_v20  ;;  %v817_v48 = vmul.f32 1.442695, %v778_v32 }
  0xf7   : > { %v676_v13 = vpop.f32.mrf.mxu0  ;;  %3841 = vpow2.f32 %v815_v36 }
  0xf8   : > { %8148 = vst [vmem:[#allocation17_spill] sm:$0xff] %v4854_v18  ;;  %v4857_v21 = vadd.f32 %v676_v13, %v477_v33  ;;  %v749_v37 = vand.u32 2147483647, %v4854_v18  ;;  %v780_v44 = vsub.f32 0.0, %v748_v34  ;;  %v4868_v49 = vpop.eup %3829  ;;  %v819_v57 = vmul.f32 1.442695, %v779_v41 }
  0xf9   : > { %v680_v19 = vpop.f32.mrf.mxu0  ;;  %8152 = vst [vmem:[#allocation21_spill] sm:$0xff] %v4868_v49  ;;  %3843 = vpow2.f32 %v817_v48  ;;  %v4888_v5 = vadd.f32 1.0, %v4868_v49 }
  0xfa   : > { %8149 = vst [vmem:[#allocation18_spill] sm:$0xff] %v4857_v21  ;;  %v4862_v38 = vadd.f32 %v680_v19, %v4822_v30  ;;  %v750_v43 = vand.u32 2147483647, %v4857_v21  ;;  %v781_v51 = vsub.f32 0.0, %v749_v37  ;;  %v821_v60 = vmul.f32 1.442695, %v780_v44  ;;  %v4881_v2 = vpop.eup %3831 }
  0xfb   : > { %v682_v35 = vpop.f32.mrf.mxu0  ;;  %8155 = vst [vmem:[#allocation24_spill] sm:$0xff] %v4881_v2  ;;  %8157 = vst [vmem:[#allocation26_spill] sm:$0xff] %v4888_v5  ;;  %3845 = vpow2.f32 %v819_v57 }
  0xfc   : > { %8150 = vst [vmem:[#allocation19_spill] sm:$0xff] %v4862_v38  ;;  %v4866_v33 = vadd.f32 %v682_v35, %v4822_v30  ;;  %v751_v54 = vand.u32 2147483647, %v4862_v38  ;;  %v782_v58 = vsub.f32 0.0, %v750_v43  ;;  %v4890_v7 = vpop.eup %3833  ;;  %v823_v8 = vmul.f32 1.442695, %v781_v51 }
  0xfd   : > { %v686_v40 = vpop.f32.mrf.mxu0  ;;  %8158 = vst [vmem:[#allocation27_spill] sm:$0xff] %v4890_v7  ;;  %3847 = vpow2.f32 %v821_v60  ;;  %v4902_v35 = vadd.f32 1.0, %v4881_v2  ;;  %v4910_v37 = vadd.f32 1.0, %v4890_v7 }
  0xfe   : > { %8151 = vst [vmem:[#allocation20_spill] sm:$0xff] %v4866_v33  ;;  %v4874_v59 = vadd.f32 %v686_v40, %v4824_v31  ;;  %v752_v61 = vand.u32 2147483647, %v4866_v33  ;;  %v783_v10 = vsub.f32 0.0, %v751_v54  ;;  %v825_v14 = vmul.f32 1.442695, %v782_v58  ;;  %v4898_v17 = vpop.eup %3835 }
  0xff   : > { %v688_v46 = vpop.f32.mrf.mxu0  ;;  %8160 = vst [vmem:[#allocation29_spill] sm:$0xff] %v4898_v17  ;;  %8161 = vst [vmem:[#allocation30_spill] sm:$0xff] %v4902_v35  ;;  %3849 = vpow2.f32 %v823_v8 }
 0x100   : > { %8153 = vst [vmem:[#allocation22_spill] sm:$0xff] %v4874_v59  ;;  %v4879_v63 = vadd.f32 %v688_v46, %v4824_v31  ;;  %v753_v16 = vand.u32 2147483647, %v4874_v59  ;;  %v784_v19 = vsub.f32 0.0, %v752_v61  ;;  %8163 = vst [vmem:[#allocation32_spill] sm:$0xff] %v4910_v37  ;;  %v4912_v40 = vpop.eup %3837  ;;  %3851 = vpow2.f32 %v825_v14 }
 0x101   : > { %v692_v55 = vpop.f32.mrf.mxu0  ;;  %8164 = vst [vmem:[#allocation33_spill] sm:$0xff] %v4912_v40  ;;  %v827_v41 = vmul.f32 1.442695, %v783_v10  ;;  %v4916_v48 = vpop.eup %3839 }
 0x102   : > { %8154 = vst [vmem:[#allocation23_spill] sm:$0xff] %v4879_v63  ;;  %v4885_v4 = vadd.f32 %v692_v55, %v4818_v28  ;;  %v754_v20 = vand.u32 2147483647, %v4879_v63  ;;  %8165 = vst [vmem:[#allocation34_spill] sm:$0xff] %v4916_v48  ;;  %v785_v51 = vsub.f32 0.0, %v753_v16  ;;  %v4922_v55 = vadd.f32 1.0, %v4898_v17 }
 0x103   : > { %v694_v0 = vpop.f32.mrf.mxu0  ;;  %v829_v57 = vmul.f32 1.442695, %v784_v19  ;;  %3853 = vpow2.f32 %v827_v41 }
 0x104   : > { %8156 = vst [vmem:[#allocation25_spill] sm:$0xff] %v4885_v4  ;;  %v4894_v31 = vadd.f32 %v694_v0, %v4818_v28  ;;  %v755_v32 = vand.u32 2147483647, %v4885_v4  ;;  %8167 = vst [vmem:[#allocation36_spill] sm:$0xff] %v4922_v55  ;;  %v786_v60 = vsub.f32 0.0, %v754_v20  ;;  %v4937_v20 = vadd.f32 1.0, %v4916_v48 }
 0x105   : > { %v698_v13 = vpop.f32.mrf.mxu0  ;;  %3855 = vpow2.f32 %v829_v57 }
 0x106   : > { %8159 = vst [vmem:[#allocation28_spill] sm:$0xff] %v4894_v31  ;;  %v4907_v36 = vadd.f32 %v698_v13, %v4820_v29  ;;  %v756_v44 = vand.u32 2147483647, %v4894_v31  ;;  %v787_v8 = vsub.f32 0.0, %v755_v32  ;;  %8170 = vst [vmem:[#allocation39_spill] sm:$0xff] %v4937_v20 }
 0x107   : > { %v700_v34 = vpop.f32.mrf.mxu0 }
 0x108   : > { %8162 = vst [vmem:[#allocation31_spill] sm:$0xff] %v4907_v36  ;;  %v4919_v54 = vadd.f32 %v700_v34, %v4820_v29  ;;  %v757_v10 = vand.u32 2147483647, %v4907_v36  ;;  %v4933_v29 = vadd.f32 1.0, %v4912_v40  ;;  %v788_v16 = vsub.f32 0.0, %v756_v44  ;;  %v4939_v34 = vpop.eup %3841 }
 0x109   : > { %v704_v46 = vpop.f32.mrf.mxu0  ;;  %8171 = vst [vmem:[#allocation40_spill] sm:$0xff] %v4939_v34  ;;  %v835_v56 = vmul.f32 1.442695, %v787_v8  ;;  %v4955_v57 = vadd.f32 1.0, %v4939_v34 }
 0x10a   : > { %8166 = vst [vmem:[#allocation35_spill] sm:$0xff] %v4919_v54  ;;  %v4926_v61 = vadd.f32 %v704_v46, %v4814_v26  ;;  %8169 = vst [vmem:[#allocation38_spill] sm:$0xff] %v4933_v29  ;;  %v831_v46 = vmul.f32 1.442695, %v785_v51  ;;  %v758_v32 = vand.u32 2147483647, %v4919_v54  ;;  %v4949_v51 = vpop.eup %3843 }
 0x10b   : > { %v706_v0 = vpop.f32.mrf.mxu0  ;;  %v789_v30 = vsub.f32 0.0, %v757_v10  ;;  %8172 = vst [vmem:[#allocation41_spill] sm:$0xff] %v4949_v51  ;;  %v837_v15 = vmul.f32 1.442695, %v788_v16  ;;  %8173 = vst [vmem:[#allocation42_spill] sm:$0xff] %v4955_v57  ;;  %v4963_v10 = vpop.eup %3845 }
 0x10c   : > { %8168 = vst [vmem:[#allocation37_spill] sm:$0xff] %v4926_v61  ;;  %v4930_v13 = vadd.f32 %v706_v0, %v4814_v26  ;;  %v833_v0 = vmul.f32 1.442695, %v786_v60  ;;  %v759_v44 = vand.u32 2147483647, %v4926_v61  ;;  %v4958_v60 = vmul.f32 -0.5, %v4939_v34  ;;  %v4966_v14 = vpop.eup %3847 }
 0x10d   : > { %v710_v19 = vpop.f32.mrf.mxu0  ;;  %3857 = vpow2.f32 %v831_v46  ;;  %v790_v43 = vsub.f32 0.0, %v758_v32  ;;  %8175 = vst [vmem:[#allocation44_spill] sm:$0xff] %v4963_v10  ;;  %8176 = vst [vmem:[#allocation45_spill] sm:$0xff] %v4966_v14  ;;  %v839_v41 = vmul.f32 1.442695, %v789_v30 }
 0x10e   : > { %v760_v1 = vand.u32 2147483647, %v4930_v13  ;;  %v4944_v26 = vadd.f32 %v710_v19, %v4816_v27  ;;  %8174 = vst [vmem:[#allocation43_spill] sm:$0xff] %v4958_v60  ;;  %3859 = vpow2.f32 %v833_v0  ;;  %v791_v16 = vsub.f32 0.0, %v759_v44  ;;  %v4973_v44 = vpop.eup %3849 }
 0x10f   : > { %v712_v50 = vpop.f32.mrf.mxu0  ;;  %3861 = vpow2.f32 %v835_v56  ;;  %8177 = vst [vmem:[#allocation46_spill] sm:$0xff] %v4973_v44  ;;  %v4978_v56 = vpop.eup %3851  ;;  %v5033_v53 = vadd.f32 1.0, %v4973_v44 }
 0x110   : > { %v792_v3 = vsub.f32 0.0, %v760_v1  ;;  %v761_v9 = vand.u32 2147483647, %v4944_v26  ;;  %v4952_v28 = vadd.f32 %v712_v50, %v4816_v27  ;;  %3863 = vpow2.f32 %v837_v15  ;;  %8178 = vst [vmem:[#allocation47_spill] sm:$0xff] %v4978_v56 }
 0x111   : > { %v716_v19 = vpop.f32.mrf.mxu0  ;;  %v843_v30 = vmul.f32 1.442695, %v791_v16  ;;  %v4989_v16 = vmul.f32 -0.5, %v4949_v51  ;;  %8194 = vst [vmem:[#allocation63_spill] sm:$0xff] %v5033_v53 }
 0x112   : > { %v793_v8 = vsub.f32 0.0, %v761_v9  ;;  %v4961_v1 = vadd.f32 %v716_v19, %v4810_v24  ;;  %v845_v58 = vmul.f32 1.442695, %v792_v3  ;;  %v762_v27 = vand.u32 2147483647, %v4952_v28 }
 0x113   : > { %v718_v50 = vpop.f32.mrf.mxu0  ;;  %v841_v3 = vmul.f32 1.442695, %v790_v43  ;;  %8181 = vst [vmem:[#allocation50_spill] sm:$0xff] %v4989_v16 }
 0x114   : > { %v847_v39 = vmul.f32 1.442695, %v793_v8  ;;  %v763_v46 = vand.u32 2147483647, %v4961_v1  ;;  %v794_v32 = vsub.f32 0.0, %v762_v27  ;;  %v4971_v19 = vadd.f32 %v718_v50, %v4810_v24 }
 0x115   : > { %v722_v0 = vpop.f32.mrf.mxu0 }
 0x116   : > { %3865 = vpow2.f32 %v847_v39  ;;  %v795_v42 = vsub.f32 0.0, %v763_v46  ;;  %v4976_v45 = vadd.f32 %v722_v0, %v4806_v22  ;;  %v849_v15 = vmul.f32 1.442695, %v794_v32 }
 0x117   : > { %3867 = vpow2.f32 %v845_v58  ;;  %v764_v8 = vand.u32 2147483647, %v4971_v19  ;;  %v724_v27 = vpop.f32.mrf.mxu0  ;;  %v4986_v46 = vadd.f32 1.0, %v4949_v51  ;;  %v4991_v58 = vpop.eup %3853 }
 0x118   : > { %3869 = vpow2.f32 %v839_v41  ;;  %v851_v24 = vmul.f32 1.442695, %v795_v42  ;;  %v765_v50 = vand.u32 2147483647, %v4976_v45  ;;  %v4983_v9 = vadd.f32 %v724_v27, %v4806_v22  ;;  %8182 = vst [vmem:[#allocation51_spill] sm:$0xff] %v4991_v58  ;;  %v4999_v27 = vpop.eup %3855 }
 0x119   : > { %3871 = vpow2.f32 %v849_v15  ;;  %v796_v39 = vsub.f32 0.0, %v764_v8  ;;  %v728_v43 = vpop.f32.mrf.mxu0  ;;  %8180 = vst [vmem:[#allocation49_spill] sm:$0xff] %v4986_v46  ;;  %8184 = vst [vmem:[#allocation53_spill] sm:$0xff] %v4999_v27  ;;  %v5053_v5 = vmul.f32 -0.5, %v4991_v58 }
 0x11a   : > { %8179 = vst [vmem:[#allocation48_spill] sm:$0xff] %v4983_v9  ;;  %3873 = vpow2.f32 %v851_v24  ;;  %v797_v32 = vsub.f32 0.0, %v765_v50  ;;  %v766_v42 = vand.u32 2147483647, %v4983_v9  ;;  %v4997_v15 = vadd.f32 %v728_v43, %v4812_v25 }
 0x11b   : > { %3875 = vpow2.f32 %v843_v30  ;;  %v853_v0 = vmul.f32 1.442695, %v796_v39  ;;  %v730_v8 = vpop.f32.mrf.mxu0  ;;  %v5007_v30 = vadd.f32 1.0, %v4963_v10  ;;  %8199 = vst [vmem:[#allocation68_spill] sm:$0xff] %v5053_v5 }
 0x11c   : > { %8183 = vst [vmem:[#allocation52_spill] sm:$0xff] %v4997_v15  ;;  %3877 = vpow2.f32 %v841_v3  ;;  %v855_v47 = vmul.f32 1.442695, %v797_v32  ;;  %v798_v52 = vsub.f32 0.0, %v766_v42  ;;  %v5002_v24 = vadd.f32 %v730_v8, %v4812_v25  ;;  %v5013_v32 = vpop.eup %3857 }
 0x11d   : > { %3879 = vpow2.f32 %v853_v0  ;;  %v767_v41 = vand.u32 2147483647, %v4997_v15  ;;  %v734_v22 = vpop.f32.mrf.mxu0  ;;  %8186 = vst [vmem:[#allocation55_spill] sm:$0xff] %v5007_v30  ;;  %v5011_v3 = vadd.f32 1.0, %v4966_v14  ;;  %8188 = vst [vmem:[#allocation57_spill] sm:$0xff] %v5013_v32  ;;  %v5019_v8 = vmul.f32 -0.5, %v4966_v14  ;;  %v5022_v49 = vpop.eup %3859 }
 0x11e   : > { %8185 = vst [vmem:[#allocation54_spill] sm:$0xff] %v5002_v24  ;;  %3881 = vpow2.f32 %v855_v47  ;;  %v857_v39 = vmul.f32 1.442695, %v798_v52  ;;  %v768_v43 = vand.u32 2147483647, %v5002_v24  ;;  %v5016_v42 = vadd.f32 %v734_v22, %v4808_v23  ;;  %8191 = vst [vmem:[#allocation60_spill] sm:$0xff] %v5022_v49  ;;  %v5028_v62 = vpop.eup %3861 }
 0x11f   : > { %8187 = vst [vmem:[#allocation56_spill] sm:$0xff] %v5011_v3  ;;  %v799_v25 = vsub.f32 0.0, %v767_v41  ;;  %v736_v0 = vpop.f32.mrf.mxu0  ;;  %8190 = vst [vmem:[#allocation59_spill] sm:$0xff] %v5019_v8  ;;  %v5035_v50 = vpop.eup %3863  ;;  %v5048_v41 = vadd.f32 1.0, %v4991_v58  ;;  %v5067_v34 = vadd.f32 1.0, %v5013_v32  ;;  %v5070_v11 = vmul.f32 -0.5, %v5013_v32 }
 0x120   : > { %8189 = vst [vmem:[#allocation58_spill] sm:$0xff] %v5016_v42  ;;  %3883 = vpow2.f32 %v857_v39  ;;  %v800_v52 = vsub.f32 0.0, %v768_v43  ;;  %v5026_v2 = vadd.f32 %v736_v0, %v4808_v23  ;;  %8193 = vst [vmem:[#allocation62_spill] sm:$0xff] %v5028_v62  ;;  %v769_v6 = vand.u32 2147483647, %v5016_v42 }
 0x121   : > { %v859_v22 = vmul.f32 1.442695, %v799_v25  ;;  %8195 = vst [vmem:[#allocation64_spill] sm:$0xff] %v5035_v50  ;;  %v5039_v39 = vadd.f32 1.0, %v4978_v56  ;;  %v5042_v23 = vmul.f32 -0.5, %v4978_v56  ;;  %8198 = vst [vmem:[#allocation67_spill] sm:$0xff] %v5048_v41 }
 0x122   : > { %8192 = vst [vmem:[#allocation61_spill] sm:$0xff] %v5026_v2  ;;  %v861_v7 = vmul.f32 1.442695, %v800_v52  ;;  %v770_v47 = vand.u32 2147483647, %v5026_v2  ;;  %v801_v0 = vsub.f32 0.0, %v769_v6 }
 0x123   : > { %8196 = vst [vmem:[#allocation65_spill] sm:$0xff] %v5039_v39  ;;  %8197 = vst [vmem:[#allocation66_spill] sm:$0xff] %v5042_v23  ;;  %v5044_v43 = vpop.eup %3865  ;;  %3885 = vpow2.f32 %v859_v22  ;;  %v5061_v6 = vadd.f32 1.0, %v4999_v27  ;;  %v5082_v37 = vadd.f32 1.0, %v5022_v49  ;;  %v5088_v55 = vadd.f32 1.0, %v5028_v62 }
 0x124   : > { %v5050_v17 = vpop.eup %3867  ;;  %3887 = vpow2.f32 %v861_v7  ;;  %v802_v52 = vsub.f32 0.0, %v770_v47  ;;  %v863_v40 = vmul.f32 1.442695, %v801_v0  ;;  %v1065_v22 = vadd.f32 1.0, %v5044_v43  ;;  %8201 = vst [vmem:[#allocation70_spill] sm:$0xff] %v5070_v11 }
 0x125   : > { %v5056_v35 = vpop.eup %3869  ;;  %8200 = vst [vmem:[#allocation69_spill] sm:$0xff] %v5061_v6  ;;  %v1056_v51 = vadd.f32 1.0, %v5050_v17  ;;  %v5091_v60 = vmul.f32 -0.5, %v5028_v62  ;;  %v5097_v7 = vadd.f32 1.0, %v5035_v50  ;;  %v5100_v21 = vmul.f32 -0.5, %v5035_v50 }
 0x126   : > { %v5063_v25 = vpop.eup %3871  ;;  %v865_v47 = vmul.f32 1.442695, %v802_v52  ;;  %3889 = vpow2.f32 %v863_v40  ;;  %v1059_v20 = vmul.f32 -0.5, %v5050_v17  ;;  %v1071_v46 = vand.u32 2147483647, %v5044_v43 }
 0x127   : > { %v5072_v12 = vpop.eup %3873  ;;  %v1074_v0 = vadd.f32 1.0, %v5063_v25  ;;  %8202 = vst [vmem:[#allocation71_spill] sm:$0xff] %v5091_v60  ;;  %8203 = vst [vmem:[#allocation72_spill] sm:$0xff] %v5100_v21 }
 0x128   : > { %v5077_v18 = vpop.eup %3875  ;;  %3891 = vpow2.f32 %v865_v47  ;;  %v1083_v52 = vadd.f32 1.0, %v5072_v12  ;;  %v1086_v33 = vmul.f32 -0.5, %v5072_v12  ;;  %v1089_v58 = vand.u32 2147483647, %v5072_v12 }
 0x129   : > { %v5084_v48 = vpop.eup %3877  ;;  %3893 = vlog2.f32 %v1065_v22  ;;  %v1047_v40 = vadd.f32 1.0, %v5077_v18  ;;  %v1060_v54 = vadd.f32 1.0, %v1059_v20  ;;  %vm5158_vm2 = vcmp.lt.f32.partialorder %v1071_v46, 0.0004427343 }
 0x12a   : > { %v5093_v16 = vpop.eup %3879  ;;  %3895 = vlog2.f32 %v1074_v0  ;;  %v1068_v0 = vmul.f32 -0.5, %v5044_v43  ;;  %v5114_v63 = vadd.f32 1.0, %v5084_v48  ;;  %v5124_v4 = vmul.f32 -0.5, %v5084_v48 }
 0x12b   : > { %v5102_v38 = vpop.eup %3881  ;;  %v1092_v22 = vadd.f32 1.0, %v5093_v16  ;;  %3897 = vlog2.f32 %v1056_v51  ;;  %v5117_v51 = vadd.f32 1.0, %v5056_v35  ;;  %v1095_v44 = vmul.f32 -0.5, %v5093_v16 }
 0x12c   : > { %v1101_v47 = vadd.f32 1.0, %v5102_v38  ;;  %3899 = vlog2.f32 %v1083_v52  ;;  %v1077_v52 = vmul.f32 -0.5, %v5063_v25  ;;  %v1069_v31 = vadd.f32 1.0, %v1068_v0 }
 0x12d   : > { %v5110_v29 = vpop.eup %3883  ;;  %3901 = vlog2.f32 %v1092_v22  ;;  %v1087_v56 = vadd.f32 1.0, %v1086_v33  ;;  %v1098_v0 = vand.u32 2147483647, %v5093_v16  ;;  %v1107_v23 = vand.u32 2147483647, %v5102_v38 }
 0x12e   : > { %v1110_v14 = vadd.f32 1.0, %v5110_v29  ;;  %3903 = vlog2.f32 %v1101_v47  ;;  %v1062_v47 = vand.u32 2147483647, %v5050_v17  ;;  %v1078_v8 = vadd.f32 1.0, %v1077_v52 }
 0x12f   : > { %3905 = vlog2.f32 %v1047_v40  ;;  %v1080_v40 = vand.u32 2147483647, %v5063_v25  ;;  %v1113_v30 = vmul.f32 -0.5, %v5110_v29  ;;  %v5147_v5 = vmul.f32 %v5044_v43, %v1069_v31 }
 0x130   : > { %v5127_v59 = vpop.eup %3885  ;;  %3907 = vlog2.f32 %v1110_v14  ;;  %v1104_v14 = vmul.f32 -0.5, %v5102_v38  ;;  %v1096_v43 = vadd.f32 1.0, %v1095_v44  ;;  %v5164_v11 = vmul.f32 %v5072_v12, %v1087_v56 }
 0x131   : > { %v5131_v10 = vpop.eup %3887  ;;  %v1119_v57 = vadd.f32 1.0, %v5127_v59  ;;  %v1122_v53 = vmul.f32 -0.5, %v5127_v59  ;;  %vm5154_vm1 = vcmp.lt.f32.partialorder %v1080_v40, 0.0004427343  ;;  %v1079_v50 = vmul.f32 %v5063_v25, %v1078_v8 }
 0x132   : > { %v1128_v22 = vadd.f32 1.0, %v5131_v10  ;;  %v1131_v52 = vmul.f32 -0.5, %v5131_v10  ;;  %vm5167_vm3 = vcmp.lt.f32.partialorder %v1062_v47, 0.0004427343  ;;  %v1116_v15 = vand.u32 2147483647, %v5110_v29 }
 0x133   : > { %v5142_v36 = vpop.eup %3889  ;;  %v1105_v39 = vadd.f32 1.0, %v1104_v14  ;;  %vm5173_vm4 = vcmp.lt.f32.partialorder %v1098_v0, 0.0004427343  ;;  %vm5177_vm5 = vcmp.lt.f32.partialorder %v1089_v58, 0.0004427343  ;;  %v1114_v8 = vadd.f32 1.0, %v1113_v30 }
 0x134   : > { %3909 = vlog2.f32 %v1128_v22  ;;  %v1137_v33 = vadd.f32 1.0, %v5142_v36  ;;  %v1140_v46 = vmul.f32 -0.5, %v5142_v36  ;;  %v1125_v56 = vand.u32 2147483647, %v5127_v59 }
 0x135   : > { %v5149_v3 = vpop.eup %3891  ;;  %3911 = vlog2.f32 %v1119_v57  ;;  %v1050_v25 = vmul.f32 -0.5, %v5077_v18  ;;  %v1132_v24 = vadd.f32 1.0, %v1131_v52  ;;  %v1134_v14 = vand.u32 2147483647, %v5131_v10 }
 0x136   : > { %v3894_v32 = vpop.eup %3893  ;;  %v1146_v31 = vadd.f32 1.0, %v5149_v3  ;;  %3913 = vlog2.f32 %v1137_v33  ;;  %v1149_v33 = vmul.f32 -0.5, %v5149_v3  ;;  %v1123_v0 = vadd.f32 1.0, %v1122_v53 }
 0x137   : > { %v3896_v40 = vpop.eup %3895  ;;  %vm5185_vm6 = vcmp.lt.f32.partialorder %v1107_v23, 0.0004427343  ;;  %v1143_v62 = vand.u32 2147483647, %v5142_v36  ;;  %v1067_v42 = vmul.f32 0.6931472, %v3894_v32  ;;  %v1061_v30 = vmul.f32 %v5050_v17, %v1060_v54 }
 0x138   : > { %v3898_v44 = vpop.eup %3897  ;;  %3915 = vlog2.f32 %v1146_v31  ;;  %v1076_v31 = vmul.f32 0.6931472, %v3896_v40  ;;  %v1152_v60 = vand.u32 2147483647, %v5149_v3  ;;  %v1141_v2 = vadd.f32 1.0, %v1140_v46 }
 0x139   : > { %v3900_v47 = vpop.eup %3899  ;;  %vm5192_vm7 = vcmp.lt.f32.partialorder %v1116_v15, 0.0004427343  ;;  %v1097_v53 = vmul.f32 %v5093_v16, %v1096_v43  ;;  %v1058_v23 = vmul.f32 0.6931472, %v3898_v44  ;;  %v1106_v21 = vmul.f32 %v5102_v38, %v1105_v39  ;;  %v8243_v16 = vld [vmem:[#allocation61_spill] sm:$0xff] }
 0x13a   : > { %v3902_v58 = vpop.eup %3901  ;;  %v1085_v9 = vmul.f32 0.6931472, %v3900_v47  ;;  %3917 = vlog2.f32 %v5114_v63  ;;  %v1150_v17 = vadd.f32 1.0, %v1149_v33  ;;  %v5200_v54 = vmul.f32 %v5131_v10, %v1132_v24 }
 0x13b   : > { %v3904_v49 = vpop.eup %3903  ;;  %v1094_v61 = vmul.f32 0.6931472, %v3902_v58  ;;  %v5203_v15 = vmul.f32 %v5127_v59, %v1123_v0  ;;  %v1115_v40 = vmul.f32 %v5110_v29, %v1114_v8  ;;  %vm5206_vm8 = vcmp.lt.f32.partialorder %v1143_v62, 0.0004427343  ;;  %v8251_v62 = vld [vmem:[#allocation62_spill] sm:$0xff] }
 0x13c   : > { %v3906_v6 = vpop.eup %3905  ;;  %v1103_v43 = vmul.f32 0.6931472, %v3904_v49  ;;  %v1082_v38 = vsel %vm5154_vm1, %v1079_v50, %v1076_v31  ;;  %v1073_v63 = vsel %vm5158_vm2, %v5147_v5, %v1067_v42  ;;  %v1051_v39 = vadd.f32 1.0, %v1050_v25 }
 0x13d   : > { %v3908_v32 = vpop.eup %3907  ;;  %vm5215_vm9 = vcmp.lt.f32.partialorder %v1152_v60, 0.0004427343  ;;  %v1142_v59 = vmul.f32 %v5142_v36, %v1141_v2  ;;  %vm5220_vm10 = vcmp.lt.f32.partialorder %v1134_v14, 0.0004427343  ;;  %v1064_v49 = vsel %vm5167_vm3, %v1061_v30, %v1058_v23 }
 0x13e   : > { %v1053_v29 = vand.u32 2147483647, %v5077_v18  ;;  %3919 = vlog2.f32 %v5117_v51  ;;  %vm5228_vm11 = vcmp.lt.f32.partialorder %v1125_v56, 0.0004427343  ;;  %v1112_v60 = vmul.f32 0.6931472, %v3908_v32 }
 0x13f   : > { %v1100_v24 = vsel %vm5173_vm4, %v1097_v53, %v1094_v61  ;;  %v1091_v2 = vsel %vm5177_vm5, %v5164_v11, %v1085_v9  ;;  %v1049_v36 = vmul.f32 0.6931472, %v3906_v6  ;;  %v1151_v42 = vmul.f32 %v5149_v3, %v1150_v17  ;;  %v8241_v53 = vld [vmem:[#allocation72_spill] sm:$0xff]  ;;  %v8242_v17 = vld [vmem:[#allocation69_spill] sm:$0xff] }
 0x140   : > { %v8226_v20 = vmax.f32 %v4952_v28, 0.0  ;;  %v8227_v51 = vmax.f32 %v4944_v26, 0.0  ;;  %3921 = vlog2.f32 %v5097_v7  ;;  %v1109_v61 = vsel %vm5185_vm6, %v1106_v21, %v1103_v43 }
 0x141   : > { %v3910_v50 = vpop.eup %3909  ;;  %v1052_v11 = vmul.f32 %v5077_v18, %v1051_v39  ;;  %v1042_v9 = vadd.f32 1.0, %v5124_v4  ;;  %3923 = vlog2.f32 %v5088_v55  ;;  %v8228_v28 = vmax.f32 %v4971_v19, 0.0  ;;  %v8245_v39 = vld [vmem:[#allocation71_spill] sm:$0xff] }
 0x142   : > { %v5240_v22 = vadd.f32 %v8226_v20, %v1082_v38  ;;  %v5244_v57 = vadd.f32 %v8227_v51, %v1073_v63  ;;  %v3912_v27 = vpop.eup %3911  ;;  %v8229_v26 = vmax.f32 %v4961_v1, 0.0  ;;  %v8230_v7 = vmax.f32 %v4930_v13, 0.0  ;;  %v8255_v20 = vld [vmem:[#allocation53_spill] sm:$0xff] }
 0x143   : > { %v5254_v3 = vadd.f32 %v8228_v28, %v1100_v24  ;;  %vm5264_vm12 = vcmp.lt.f32.partialorder %v1053_v29, 0.0004427343  ;;  %v3914_v18 = vpop.eup %3913  ;;  %v1130_v4 = vmul.f32 0.6931472, %v3910_v50  ;;  %v1118_v55 = vsel %vm5192_vm7, %v1115_v40, %v1112_v60  ;;  %v8247_v29 = vld [vmem:[#allocation58_spill] sm:$0xff] }
 0x144   : > { %v5258_v6 = vadd.f32 %v8229_v26, %v1091_v2  ;;  %v5262_v46 = vadd.f32 %v8230_v7, %v1064_v49  ;;  %v1055_v19 = vsel %vm5264_vm12, %v1052_v11, %v1049_v36  ;;  %v1032_v1 = vmul.f32 -0.5, %v5056_v35  ;;  %v8246_v49 = vld [vmem:[#allocation60_spill] sm:$0xff]  ;;  %v8252_v36 = vld [vmem:[#allocation67_spill] sm:$0xff]  ;;  %v8253_v50 = vld [vmem:[#allocation54_spill] sm:$0xff] }
 0x145   : > { %v3916_v41 = vpop.eup %3915  ;;  %v1139_v12 = vmul.f32 0.6931472, %v3914_v18  ;;  %v1121_v44 = vmul.f32 0.6931472, %v3912_v27  ;;  %v8233_v13 = vmax.f32 %v4976_v45, 0.0  ;;  %3925 = vlog2.f32 %v5082_v37  ;;  %v8237_v45 = vld [vmem:[#allocation48_spill] sm:$0xff] }
 0x146   : > { %v1148_v8 = vmul.f32 0.6931472, %v3916_v41  ;;  %v1043_v25 = vmul.f32 %v5084_v48, %v1042_v9  ;;  %v8234_v47 = vand.u32 2147483647, %v5084_v48  ;;  %v1035_v14 = vand.u32 2147483647, %v5056_v35 }
 0x147   : > { %v1213_v56 = vadd.f32 %v8233_v13, %v1109_v61  ;;  %3927 = vlog2.f32 %v5067_v34  ;;  %v1145_v0 = vsel %vm5206_vm8, %v1142_v59, %v1139_v12  ;;  %v8238_v58 = vmax.f32 %v8237_v45, 0.0  ;;  %v8239_v37 = vld [vmem:[#allocation37_spill] sm:$0xff]  ;;  %v3918_v40 = vpop.eup %3917  ;;  %v8257_v11 = vld [vmem:[#allocation52_spill] sm:$0xff]  ;;  %v8260_v18 = vld [vmem:[#allocation70_spill] sm:$0xff] }
 0x148   : > { %vm5279_vm13 = vcmp.lt.f32.partialorder %v8234_v47, 0.0004427343  ;;  %v8240_v30 = vmax.f32 %v8239_v37, 0.0  ;;  %v1024_v48 = vadd.f32 1.0, %v8241_v53  ;;  %v1154_v23 = vsel %vm5215_vm9, %v1151_v42, %v1148_v8  ;;  %v8256_v27 = vld [vmem:[#allocation65_spill] sm:$0xff]  ;;  %v8259_v26 = vld [vmem:[#allocation64_spill] sm:$0xff] }
 0x149   : > { %v1214_v31 = vadd.f32 %v8238_v58, %v1118_v55  ;;  %v1136_v32 = vsel %vm5220_vm10, %v5200_v54, %v1130_v4  ;;  %v1033_v34 = vadd.f32 1.0, %v1032_v1  ;;  %3929 = vlog2.f32 %v8242_v17  ;;  %v8266_v8 = vld [vmem:[#allocation57_spill] sm:$0xff]  ;;  %v8271_v53 = vld [vmem:[#allocation56_spill] sm:$0xff]  ;;  %v8294_v1 = vld [vmem:[#allocation59_spill] sm:$0xff] }
 0x14a   : > { %v5291_v52 = vadd.f32 %v8240_v30, %v1055_v19  ;;  %v8244_v43 = vmax.f32 %v8243_v16, 0.0  ;;  %v1127_v63 = vsel %vm5228_vm11, %v5203_v15, %v1121_v44  ;;  %v1015_v59 = vadd.f32 1.0, %v8245_v39  ;;  %v8276_v16 = vld [vmem:[#allocation55_spill] sm:$0xff] }
 0x14b   : > { %v1005_v10 = vmul.f32 -0.5, %v8246_v49  ;;  %v8248_v60 = vmax.f32 %v8247_v29, 0.0  ;;  %vm5309_vm14 = vcmp.lt.f32.partialorder %v1035_v14, 0.0004427343  ;;  %v1017_v2 = vand.u32 2147483647, %v8251_v62  ;;  %v3920_v61 = vpop.eup %3919 }
 0x14c   : > { %v1218_v38 = vadd.f32 %v8244_v43, %v1154_v23  ;;  %3931 = vlog2.f32 %v8252_v36  ;;  %v8254_v42 = vmax.f32 %v8253_v50, 0.0  ;;  %v1040_v15 = vmul.f32 0.6931472, %v3918_v40 }
 0x14d   : > { %v1217_v24 = vadd.f32 %v8248_v60, %v1145_v0  ;;  %v987_v51 = vmul.f32 -0.5, %v8255_v20  ;;  %3933 = vlog2.f32 %v8256_v27  ;;  %v8258_v9 = vmax.f32 %v8257_v11, 0.0  ;;  %v3922_v44 = vpop.eup %3921  ;;  %v8270_v0 = vld [vmem:[#allocation63_spill] sm:$0xff]  ;;  %v8288_v27 = vld [vmem:[#allocation42_spill] sm:$0xff] }
 0x14e   : > { %1331 = vmatprep.subr.mxu1 %v1218_v38  ;;  %v1216_v5 = vadd.f32 %v8254_v42, %v1136_v32  ;;  %v1025_v7 = vmul.f32 %v8259_v26, %v1024_v48  ;;  %v1008_v21 = vand.u32 2147483647, %v8246_v49  ;;  %v997_v4 = vadd.f32 1.0, %v8260_v18  ;;  %v3924_v45 = vpop.eup %3923 }
 0x14f   : > { %1332 = vmatpush1.msra.mxu1 %v1217_v24  ;;  %v1215_v28 = vadd.f32 %v8258_v9, %v1127_v63  ;;  %v1034_v55 = vmul.f32 %v5056_v35, %v1033_v34  ;;  %v8261_v19 = vand.u32 2147483647, %v8259_v26  ;;  %v1016_v41 = vmul.f32 %v8251_v62, %v1015_v59  ;;  %v8274_v34 = vld [vmem:[#allocation68_spill] sm:$0xff]  ;;  %v8281_v59 = vld [vmem:[#allocation51_spill] sm:$0xff] }
 0x150   : > { %1333 = vmatprep.subr.mxu1 %v1216_v5  ;;  %v1006_v12 = vadd.f32 1.0, %v1005_v10  ;;  %vm5332_vm1 = vcmp.lt.f32.partialorder %v1017_v2, 0.0004427343  ;;  %v8267_v47 = vand.u32 2147483647, %v8266_v8  ;;  %3935 = vlog2.f32 %v8270_v0  ;;  %v8286_v2 = vld [vmem:[#allocation46_spill] sm:$0xff] }
 0x151   : > { %vm5327_vm15 = vcmp.lt.f32.partialorder %v8261_v19, 0.0004427343  ;;  %1334 = vmatpush1.msra.mxu1 %v1215_v28  ;;  %v990_v35 = vand.u32 2147483647, %v8255_v20  ;;  %v1046_v58 = vsel %vm5279_vm13, %v1043_v25, %v1040_v15  ;;  %v1031_v37 = vmul.f32 0.6931472, %v3920_v61 }
 0x152   : > { %vm5338_vm2 = vcmp.lt.f32.partialorder %v8267_v47, 0.0004427343  ;;  %1335 = vmatprep.subr.mxu1 %v1214_v31  ;;  %v988_v30 = vadd.f32 1.0, %v987_v51  ;;  %3937 = vlog2.f32 %v8271_v53  ;;  %v1022_v48 = vmul.f32 0.6931472, %v3922_v44  ;;  %v8275_v25 = vld [vmem:[#allocation66_spill] sm:$0xff]  ;;  %v3926_v43 = vpop.eup %3925 }
 0x153   : > { %1336 = vmatpush1.msra.mxu1 %v1213_v56  ;;  %vm5347_vm3 = vcmp.lt.f32.partialorder %v1008_v21, 0.0004427343  ;;  %v998_v32 = vmul.f32 %v8266_v8, %v997_v4  ;;  %v979_v17 = vadd.f32 1.0, %v8274_v34  ;;  %v1013_v31 = vmul.f32 0.6931472, %v3924_v45  ;;  %v8277_v56 = vld [vmem:[#allocation35_spill] sm:$0xff] }
 0x154   : > { %1337 = vmatprep.subr.mxu1 %v5254_v3  ;;  %v1007_v33 = vmul.f32 %v8246_v49, %v1006_v12  ;;  %v970_v40 = vadd.f32 1.0, %v8275_v25  ;;  %3939 = vlog2.f32 %v8276_v16  ;;  %v8278_v38 = vmax.f32 %v8277_v56, 0.0  ;;  %v8285_v49 = vld [vmem:[#allocation47_spill] sm:$0xff]  ;;  %v3928_v60 = vpop.eup %3927  ;;  %v8287_v15 = vld [vmem:[#allocation49_spill] sm:$0xff]  ;;  %v8291_v26 = vld [vmem:[#allocation44_spill] sm:$0xff] }
 0x155   : > { %1338 = vmatpush1.msra.mxu1 %v5258_v6  ;;  %vm5360_vm4 = vcmp.lt.f32.partialorder %v990_v35, 0.0004427343  ;;  %v8282_v10 = vand.u32 2147483647, %v8281_v59  ;;  %v972_v29 = vand.u32 2147483647, %v8285_v49  ;;  %v1037_v6 = vsel %vm5309_vm14, %v1034_v55, %v1031_v37 }
 0x156   : > { %v1206_v63 = vadd.f32 %v8278_v38, %v1046_v58  ;;  %1339 = vmatprep.subr.mxu1 %v5240_v22  ;;  %v1004_v24 = vmul.f32 0.6931472, %v3926_v43  ;;  %v989_v62 = vmul.f32 %v8255_v20, %v988_v30  ;;  %v960_v36 = vmul.f32 -0.5, %v8286_v2  ;;  %v3930_v51 = vpop.eup %3929  ;;  %v8292_v21 = vld [vmem:[#allocation28_spill] sm:$0xff]  ;;  %v8295_v12 = vld [vmem:[#allocation25_spill] sm:$0xff]  ;;  %v8297_v35 = vld [vmem:[#allocation39_spill] sm:$0xff] }
 0x157   : > { %vm5366_vm5 = vcmp.lt.f32.partialorder %v8282_v10, 0.0004427343  ;;  %1340 = vmatpush1.msra.mxu1 %v5244_v57  ;;  %v1028_v50 = vsel %vm5327_vm15, %v1025_v7, %v1022_v48  ;;  %v995_v42 = vmul.f32 0.6931472, %v3928_v60  ;;  %v980_v5 = vmul.f32 %v8281_v59, %v979_v17  ;;  %v8289_v57 = vld [vmem:[#allocation31_spill] sm:$0xff]  ;;  %v8304_v53 = vld [vmem:[#allocation22_spill] sm:$0xff] }
 0x158   : > { %3941 = vlog2.f32 %v8287_v15  ;;  %1341 = vmatprep.subr.mxu1 %v5262_v46  ;;  %v1019_v22 = vsel %vm5332_vm1, %v1016_v41, %v1013_v31  ;;  %v971_v54 = vmul.f32 %v8285_v49, %v970_v40  ;;  %v963_v20 = vand.u32 2147483647, %v8286_v2  ;;  %v8298_v0 = vld [vmem:[#allocation23_spill] sm:$0xff]  ;;  %v8306_v17 = vld [vmem:[#allocation38_spill] sm:$0xff]  ;;  %v8309_v56 = vld [vmem:[#allocation45_spill] sm:$0xff] }
 0x159   : > { %3943 = vlog2.f32 %v8288_v27  ;;  %1342 = vmatpush1.msra.mxu1 %v5291_v52  ;;  %v8290_v61 = vmax.f32 %v8289_v57, 0.0  ;;  %v1010_v9 = vsel %vm5347_vm3, %v1007_v33, %v1004_v24  ;;  %v986_v28 = vmul.f32 0.6931472, %v3930_v51  ;;  %v3932_v7 = vpop.eup %3931  ;;  %v8307_v33 = vld [vmem:[#allocation20_spill] sm:$0xff]  ;;  %v8313_v59 = vld [vmem:[#allocation19_spill] sm:$0xff]  ;;  %v8321_v27 = vld [vmem:[#allocation17_spill] sm:$0xff] }
 0x15a   : > { %v942_v46 = vmul.f32 -0.5, %v8291_v26  ;;  %1343 = vmatprep.subr.mxu1 %v1206_v63  ;;  %v8293_v18 = vmax.f32 %v8292_v21, 0.0  ;;  %v1001_v55 = vsel %vm5338_vm2, %v998_v32, %v995_v42  ;;  %v961_v19 = vadd.f32 1.0, %v960_v36  ;;  %v3934_v41 = vpop.eup %3933  ;;  %v8317_v36 = vld [vmem:[#allocation50_spill] sm:$0xff]  ;;  %v8318_v42 = vld [vmem:[#allocation36_spill] sm:$0xff] }
 0x15b   : > { %v1205_v11 = vadd.f32 %v8290_v61, %v1037_v6  ;;  %v952_v52 = vadd.f32 1.0, %v8294_v1  ;;  %v8296_v44 = vmax.f32 %v8295_v12, 0.0  ;;  %v992_v8 = vsel %vm5360_vm4, %v989_v62, %v986_v28  ;;  %v8315_v6 = vld [vmem:[#allocation18_spill] sm:$0xff]  ;;  %v8323_v28 = vld [vmem:[#allocation43_spill] sm:$0xff] }
 0x15c   : > { %v1204_v4 = vadd.f32 %v8293_v18, %v1028_v50  ;;  %v977_v47 = vmul.f32 0.6931472, %v3932_v7  ;;  %3945 = vlog2.f32 %v8297_v35  ;;  %v8299_v45 = vmax.f32 %v8298_v0, 0.0  ;;  %v8324_v7 = vld [vmem:[#allocation16_spill] sm:$0xff]  ;;  %v8333_v35 = vld [vmem:[#allocation15_spill] sm:$0xff]  ;;  %v8335_v37 = vld [vmem:[#allocation26_spill] sm:$0xff] }
 0x15d   : > { %1344 = vmatpush1.msra.mxu1 %v1205_v11  ;;  %v1203_v13 = vadd.f32 %v8296_v44, %v1019_v22  ;;  %v968_v14 = vmul.f32 0.6931472, %v3934_v41  ;;  %vm5405_vm6 = vcmp.lt.f32.partialorder %v972_v29, 0.0004427343  ;;  %vm5409_vm7 = vcmp.lt.f32.partialorder %v963_v20, 0.0004427343  ;;  %v3936_v31 = vpop.eup %3935 }
 0x15e   : > { %1345 = vmatprep.subr.mxu1 %v1204_v4  ;;  %v1202_v58 = vadd.f32 %v8299_v45, %v1010_v9  ;;  %v8305_v48 = vmax.f32 %v8304_v53, 0.0  ;;  %v983_v32 = vsel %vm5366_vm5, %v980_v5, %v977_v47  ;;  %v943_v34 = vadd.f32 1.0, %v942_v46  ;;  %v8319_v22 = vld [vmem:[#allocation34_spill] sm:$0xff]  ;;  %v8320_v20 = vld [vmem:[#allocation32_spill] sm:$0xff]  ;;  %v8328_v41 = vld [vmem:[#allocation41_spill] sm:$0xff] }
 0x15f   : > { %1346 = vmatpush1.msra.mxu1 %v1203_v13  ;;  %3947 = vlog2.f32 %v8306_v17  ;;  %v8308_v25 = vmax.f32 %v8307_v33, 0.0  ;;  %v974_v16 = vsel %vm5405_vm6, %v971_v54, %v968_v14  ;;  %v962_v43 = vmul.f32 %v8286_v2, %v961_v19  ;;  %v3938_v39 = vpop.eup %3937  ;;  %v8326_v4 = vld [vmem:[#allocation40_spill] sm:$0xff] }
 0x160   : > { %v1201_v23 = vadd.f32 %v8305_v48, %v1001_v55  ;;  %1347 = vmatprep.subr.mxu1 %v1202_v58  ;;  %v8310_v38 = vand.u32 2147483647, %v8309_v56  ;;  %v8314_v10 = vmax.f32 %v8313_v59, 0.0  ;;  %v959_v49 = vmul.f32 0.6931472, %v3936_v31  ;;  %v8327_v55 = vld [vmem:[#allocation33_spill] sm:$0xff] }
 0x161   : > { %v1200_v40 = vadd.f32 %v8308_v25, %v992_v8  ;;  %v953_v29 = vmul.f32 %v8309_v56, %v952_v52  ;;  %v945_v60 = vand.u32 2147483647, %v8291_v26  ;;  %v8316_v24 = vmax.f32 %v8315_v6, 0.0  ;;  %v3940_v5 = vpop.eup %3939  ;;  %v8332_v8 = vld [vmem:[#allocation30_spill] sm:$0xff]  ;;  %v8337_v31 = vld [vmem:[#allocation27_spill] sm:$0xff]  ;;  %v8341_v59 = vld [vmem:[#allocation13_spill] sm:$0xff] }
 0x162   : > { %vm5425_vm8 = vcmp.lt.f32.partialorder %v8310_v38, 0.0004427343  ;;  %1348 = vmatpush1.msra.mxu1 %v1201_v23  ;;  %v1199_v3 = vadd.f32 %v8314_v10, %v983_v32  ;;  %v950_v2 = vmul.f32 0.6931472, %v3938_v39  ;;  %v934_v50 = vadd.f32 1.0, %v8317_v36  ;;  %v8336_v23 = vld [vmem:[#allocation29_spill] sm:$0xff] }
 0x163   : > { %1349 = vmatprep.subr.mxu1 %v1200_v40  ;;  %v1198_v62 = vadd.f32 %v8316_v24, %v974_v16  ;;  %3949 = vlog2.f32 %v8318_v42  ;;  %v965_v15 = vsel %vm5409_vm7, %v962_v43, %v959_v49  ;;  %v944_v51 = vmul.f32 %v8291_v26, %v943_v34  ;;  %v8338_v40 = vld [vmem:[#allocation12_spill] sm:$0xff]  ;;  %v8339_v43 = vld [vmem:[#allocation14_spill] sm:$0xff]  ;;  %v8344_v36 = vld [vmem:[#allocation21_spill] sm:$0xff] }
 0x164   : > { %1350 = vmatpush1.msra.mxu1 %v1199_v3  ;;  %v915_v54 = vmul.f32 -0.5, %v8319_v22  ;;  %3951 = vlog2.f32 %v8320_v20  ;;  %v8322_v57 = vmax.f32 %v8321_v27, 0.0  ;;  %v956_v11 = vsel %vm5425_vm8, %v953_v29, %v950_v2 }
 0x165   : > { %1351 = vmatprep.subr.mxu1 %v1198_v62  ;;  %v941_v9 = vmul.f32 0.6931472, %v3940_v5  ;;  %v925_v46 = vadd.f32 1.0, %v8323_v28  ;;  %v8325_v21 = vmax.f32 %v8324_v7, 0.0  ;;  %vm946_vm9 = vcmp.lt.f32.partialorder %v945_v60, 0.0004427343  ;;  %v3942_v1 = vpop.eup %3941 }
 0x166   : > { %v1197_v61 = vadd.f32 %v8322_v57, %v965_v15  ;;  %v927_v26 = vand.u32 2147483647, %v8326_v4  ;;  %v906_v19 = vmul.f32 -0.5, %v8327_v55  ;;  %v935_v12 = vmul.f32 %v8328_v41, %v934_v50  ;;  %v3944_v47 = vpop.eup %3943  ;;  %v8343_v62 = vld [vmem:[#allocation24_spill] sm:$0xff] }
 0x167   : > { %v1196_v18 = vadd.f32 %v8325_v21, %v956_v11  ;;  %v947_v52 = vsel %vm946_vm9, %v944_v51, %v941_v9  ;;  %v8329_v44 = vand.u32 2147483647, %v8328_v41  ;;  %3953 = vlog2.f32 %v8332_v8 }
 0x168   : > { %1352 = vmatpush1.msra.mxu1 %v1197_v61  ;;  %v8334_v0 = vmax.f32 %v8333_v35, 0.0  ;;  %v932_v58 = vmul.f32 0.6931472, %v3942_v1  ;;  %v916_v14 = vadd.f32 1.0, %v915_v54  ;;  %3955 = vlog2.f32 %v8335_v37  ;;  %v8345_v54 = vld [vmem:[#allocation11_spill] sm:$0xff]  ;;  %v8346_v61 = vld [vmem:[#allocation10_spill] sm:$0xff] }
 0x169   : > { %vm5454_vm10 = vcmp.lt.f32.partialorder %v8329_v44, 0.0004427343  ;;  %1353 = vmatprep.subr.mxu1 %v1196_v18  ;;  %v923_v30 = vmul.f32 0.6931472, %v3944_v47  ;;  %v926_v53 = vmul.f32 %v8326_v4, %v925_v46  ;;  %v918_v48 = vand.u32 2147483647, %v8319_v22  ;;  %v3946_v25 = vpop.eup %3945 }
 0x16a   : > { %v1195_v45 = vadd.f32 %v8334_v0, %v947_v52  ;;  %v897_v32 = vmul.f32 -0.5, %v8336_v23  ;;  %v938_v34 = vsel %vm5454_vm10, %v935_v12, %v932_v58  ;;  %vm928_vm11 = vcmp.lt.f32.partialorder %v927_v26, 0.0004427343  ;;  %v8349_v52 = vld [vmem:[#allocation9_spill] sm:$0xff] }
 0x16b   : > { %v907_v17 = vadd.f32 1.0, %v906_v19  ;;  %v888_v33 = vmul.f32 -0.5, %v8337_v31  ;;  %v1160_v16 = vmax.f32 %v8338_v40, 0.0  ;;  %v8340_v56 = vmax.f32 %v8339_v43, 0.0  ;;  %v1220_v40 = vld [vmem:[%s7959_s4 + $0x8] sm:$0xff]  ;;  %v1222_v43 = vld [vmem:[%s7959_s4 + $0x18] sm:$0xff] }
 0x16c   : > { %1354 = vmatpush1.msra.mxu1 %v1195_v45  ;;  %v929_v63 = vsel %vm928_vm11, %v926_v53, %v923_v30  ;;  %v909_v39 = vand.u32 2147483647, %v8327_v55  ;;  %v8342_v10 = vmax.f32 %v8341_v59, 0.0  ;;  %v914_v49 = vmul.f32 0.6931472, %v3946_v25  ;;  %v3948_v6 = vpop.eup %3947  ;;  %v1227_v59 = vld [vmem:[%s7959_s4 + $0x40] sm:$0xff] }
 0x16d   : > { %v1194_v38 = vadd.f32 %v8340_v56, %v938_v34  ;;  %v917_v29 = vmul.f32 %v8319_v22, %v916_v14  ;;  %v900_v60 = vand.u32 2147483647, %v8336_v23  ;;  %vm919_vm12 = vcmp.lt.f32.partialorder %v918_v48, 0.0004427343  ;;  %v8350_v14 = vld [vmem:[#allocation8_spill] sm:$0xff]  ;;  %v8351_v48 = vld [vmem:[#allocation7_spill] sm:$0xff] }
 0x16e   : > { %v1193_v3 = vadd.f32 %v8342_v10, %v929_v63  ;;  %v898_v24 = vadd.f32 1.0, %v897_v32  ;;  %v879_v2 = vmul.f32 -0.5, %v8343_v62  ;;  %v870_v50 = vmul.f32 -0.5, %v8344_v36  ;;  %v1223_v56 = vld [vmem:[%s7959_s4 + $0x20] sm:$0xff]  ;;  %v1225_v63 = vld [vmem:[%s7959_s4 + $0x30] sm:$0xff]  ;;  %v1228_v10 = vld [vmem:[%s7959_s4 + $0x48] sm:$0xff] }
 0x16f   : > { %1355 = vmatprep.subr.mxu1 %v1194_v38  ;;  %v920_v42 = vsel %vm919_vm12, %v917_v29, %v914_v49  ;;  %v905_v5 = vmul.f32 0.6931472, %v3948_v6  ;;  %v908_v15 = vmul.f32 %v8327_v55, %v907_v17  ;;  %v889_v51 = vadd.f32 1.0, %v888_v33  ;;  %v1219_v33 = vld [vmem:[%s7959_s4] sm:$0xff]  ;;  %v1224_v38 = vld [vmem:[%s7959_s4 + $0x28] sm:$0xff]  ;;  %v1230_v49 = vld [vmem:[%s7959_s4 + $0x58] sm:$0xff] }
 0x170   : > { %1356 = vmatpush1.msra.mxu1 %v1193_v3  ;;  %v1159_v20 = vmax.f32 %v8345_v54, 0.0  ;;  %v1192_v27 = vadd.f32 %v1160_v16, %v920_v42  ;;  %vm910_vm13 = vcmp.lt.f32.partialorder %v909_v39, 0.0004427343  ;;  %v891_v22 = vand.u32 2147483647, %v8337_v31  ;;  %v3950_v57 = vpop.eup %3949  ;;  %v1221_v16 = vld [vmem:[%s7959_s4 + $0x10] sm:$0xff] }
 0x171   : > { %v1158_v11 = vmax.f32 %v8346_v61, 0.0  ;;  %v911_v9 = vsel %vm910_vm13, %v908_v15, %v905_v5  ;;  %vm5482_vm14 = vcmp.lt.f32.partialorder %v900_v60, 0.0004427343  ;;  %v3952_v46 = vpop.eup %3951  ;;  %v896_v21 = vmul.f32 0.6931472, %v3950_v57  ;;  %v1226_v39 = vld [vmem:[%s7959_s4 + $0x38] sm:$0xff] }
 0x172   : > { %1357 = vmatprep.subr.mxu1 %v1192_v27  ;;  %v1191_v7 = vadd.f32 %v1159_v20, %v911_v9  ;;  %v899_v18 = vmul.f32 %v8336_v23, %v898_v24  ;;  %v880_v4 = vadd.f32 1.0, %v879_v2  ;;  %v887_v26 = vmul.f32 0.6931472, %v3952_v46  ;;  %v1229_v3 = vld [vmem:[%s7959_s4 + $0x50] sm:$0xff]  ;;  %v1231_v29 = vld [vmem:[%s7959_s4 + $0x60] sm:$0xff]  ;;  %v1232_v60 = vld [vmem:[%s7959_s4 + $0x68] sm:$0xff]  ;;  %v5563_v2 = vpop.permute.xlu0 %1328 }
 0x173   : > { %v890_v55 = vmul.f32 %v8337_v31, %v889_v51  ;;  %v882_v19 = vand.u32 2147483647, %v8343_v62  ;;  %v871_v1 = vadd.f32 1.0, %v870_v50  ;;  %v1157_v41 = vmax.f32 %v8349_v52, 0.0  ;;  %v1233_v6 = vld [vmem:[%s7959_s4 + $0x70] sm:$0xff]  ;;  %v1234_v24 = vld [vmem:[%s7959_s4 + $0x78] sm:$0xff] }
 0x174   : > { %1358 = vmatpush1.msra.mxu1 %v1191_v7  ;;  %v902_v12 = vsel %vm5482_vm14, %v899_v18, %v896_v21  ;;  %vm892_vm15 = vcmp.lt.f32.partialorder %v891_v22, 0.0004427343  ;;  %v873_v44 = vand.u32 2147483647, %v8344_v36  ;;  %v3954_v13 = vpop.eup %3953  ;;  %v881_v58 = vmul.f32 %v8343_v62, %v880_v4  ;;  %v5561_v62 = vpop.permute.xlu1 %1323 }
 0x175   : > { %v1190_v8 = vadd.f32 %v1158_v11, %v902_v12  ;;  %v893_v47 = vsel %vm892_vm15, %v890_v55, %v887_v26  ;;  %v3956_v35 = vpop.eup %3955  ;;  %v878_v45 = vmul.f32 0.6931472, %v3954_v13  ;;  %v1156_v37 = vmax.f32 %v8350_v14, 0.0 }
 0x176   : > { %v1189_v0 = vadd.f32 %v1157_v41, %v893_v47  ;;  %vm883_vm1 = vcmp.lt.f32.partialorder %v882_v19, 0.0004427343  ;;  %v869_v30 = vmul.f32 0.6931472, %v3956_v35  ;;  %v872_v53 = vmul.f32 %v8344_v36, %v871_v1  ;;  %v5567_v50 = vpop.permute.xlu0 %1318 }
 0x177   : > { %1359 = vmatprep.subr.mxu1 %v1190_v8  ;;  %v1155_v23 = vmax.f32 %v8351_v48, 0.0  ;;  %v884_v32 = vsel %vm883_vm1, %v881_v58, %v878_v45  ;;  %vm874_vm2 = vcmp.lt.f32.partialorder %v873_v44, 0.0004427343  ;;  %v8352_v25 = vmov 0.0  }
 0x178   : > { %1360 = vmatpush1.msra.mxu1 %v1189_v0  ;;  %v1188_v34 = vadd.f32 %v1156_v37, %v884_v32  ;;  %v875_v17 = vsel %vm874_vm2, %v872_v53, %v869_v30  ;;  %v5565_v36 = vpop.permute.xlu1 %1313 }
 0x179   : > { %v1187_v31 = vadd.f32 %v1155_v23, %v875_v17 }
 0x17a   : > { %1361 = vmatprep.subr.mxu1 %v1188_v34  ;;  %v5571_v5 = vpop.permute.xlu0 %1308 }
 0x17b   : > { %1362 = vmatpush1.msra.mxu1 %v1187_v31 }
 0x17c   : > { %1396 = vmatmul.mubr.f32.vlgmr.msra.gmra.mxu1 %v1219_v33  ;;  %v5569_v42 = vpop.permute.xlu1 %1303 }
 0x17d   : > { %1401 = vmatprep.mubr.f32.mxu1 %v8352_v25 }
 0x17e   : > { %v5575_v51 = vpop.permute.xlu0 %1298 }
 0x180   : > { %1402 = vmatmul.mubr.f32.gmra.mxu1 %v1220_v40  ;;  %v5573_v15 = vpop.permute.xlu1 %1293 }
 0x181   : > { %1407 = vmatprep.mubr.f32.mxu1 %v8352_v25 }
 0x182   : > { %v5579_v20 = vpop.permute.xlu0 %1288 }
 0x184   : > { %1408 = vmatmul.mubr.f32.gmra.mxu1 %v1221_v16  ;;  %v5577_v54 = vpop.permute.xlu1 %1283 }
 0x185   : > { %1413 = vmatprep.mubr.f32.mxu1 %v8352_v25 }
 0x186   : > { %v5581_v57 = vpop.permute.xlu0 %1278 }
 0x188   : > { %1414 = vmatmul.mubr.f32.gmra.mxu1 %v1222_v43  ;;  %v1274_v27 = vpop.permute.xlu1 %1273 }
 0x189   : > { %1419 = vmatprep.mubr.f32.mxu1 %v8352_v25 }
 0x18a   : > { %v1269_v46 = vpop.permute.xlu0 %1268 }
 0x18c   : > { %1420 = vmatmul.mubr.f32.gmra.mxu1 %v1223_v56  ;;  %v1264_v9 = vpop.permute.xlu1 %1263 }
 0x18d   : > { %1425 = vmatprep.mubr.f32.mxu1 %v8352_v25 }
 0x18e   : > { %v1259_v55 = vpop.permute.xlu0 %1258 }
 0x190   : > { %1426 = vmatmul.mubr.f32.gmra.mxu1 %v1224_v38  ;;  %v1254_v18 = vpop.permute.xlu1 %1253 }
 0x191   : > { %1431 = vmatprep.mubr.f32.mxu1 %v8352_v25 }
 0x194   : > { %1432 = vmatmul.mubr.f32.gmra.mxu1 %v1225_v63 }
 0x195   : > { %1437 = vmatprep.mubr.f32.mxu1 %v8352_v25 }
 0x198   : > { %1438 = vmatmul.mubr.f32.gmra.mxu1 %v1226_v39 }
 0x199   : > { %1443 = vmatprep.mubr.f32.mxu1 %v8352_v25 }
 0x19c   : > { %1444 = vmatmul.mubr.f32.gmra.mxu1 %v1227_v59 }
 0x19d   : > { %1449 = vmatprep.mubr.f32.mxu1 %v8352_v25 }
 0x1a0   : > { %1450 = vmatmul.mubr.f32.gmra.mxu1 %v1228_v10 }
 0x1a1   : > { %1455 = vmatprep.mubr.f32.mxu1 %v8352_v25 }
 0x1a4   : > { %1456 = vmatmul.mubr.f32.gmra.mxu1 %v1229_v3 }
 0x1a5   : > { %1461 = vmatprep.mubr.f32.mxu1 %v8352_v25 }
 0x1a8   : > { %1462 = vmatmul.mubr.f32.gmra.mxu1 %v1230_v49 }
 0x1a9   : > { %1467 = vmatprep.mubr.f32.mxu1 %v8352_v25 }
 0x1ac   : > { %1468 = vmatmul.mubr.f32.gmra.mxu1 %v1231_v29 }
 0x1ad   : > { %1473 = vmatprep.mubr.f32.mxu1 %v8352_v25 }
 0x1b0   : > { %1474 = vmatmul.mubr.f32.gmra.mxu1 %v1232_v60 }
 0x1b1   : > { %1479 = vmatprep.mubr.f32.mxu1 %v8352_v25 }
 0x1b4   : > { %1480 = vmatmul.mubr.f32.gmra.mxu1 %v1233_v6 }
 0x1b5   : > { %1485 = vmatprep.mubr.f32.mxu1 %v8352_v25 }
 0x1b8   : > { %1486 = vmatmul.mubr.f32.gmra.mxu1 %v1234_v24 }
 0x1b9   : > { %2901 = vmatprep.mubr.f32.mxu1 %v8352_v25 }
 0x23c   : > { %v1397_v22 = vpop.f32.mrf.mxu1 }
 0x23d   : > { %v5583_v26 = vadd.f32 %v1397_v22, %v1254_v18 }
 0x23e   : > { %v1399_v61 = vpop.f32.mrf.mxu1 }
 0x23f   : > { %8353 = vst [vmem:[#allocation48_spill] sm:$0xff] %v5583_v26  ;;  %v1492_v41 = vand.u32 2147483647, %v5583_v26  ;;  %v5594_v30 = vadd.f32 %v1399_v61, %v1254_v18 }
 0x240   : > { %v1403_v11 = vpop.f32.mrf.mxu1 }
 0x241   : > { %v5585_v1 = vadd.f32 %v1403_v11, %v1259_v55  ;;  %v1524_v47 = vsub.f32 0.0, %v1492_v41  ;;  %8357 = vst [vmem:[#allocation61_spill] sm:$0xff] %v5594_v30  ;;  %v1493_v40 = vand.u32 2147483647, %v5594_v30 }
 0x242   : > { %v1405_v28 = vpop.f32.mrf.mxu1 }
 0x243   : > { %8354 = vst [vmem:[#allocation37_spill] sm:$0xff] %v5585_v1  ;;  %v1494_v44 = vand.u32 2147483647, %v5585_v1  ;;  %v1556_v37 = vmul.f32 1.442695, %v1524_v47  ;;  %v5601_v34 = vadd.f32 %v1405_v28, %v1259_v55  ;;  %v1525_v3 = vsub.f32 0.0, %v1493_v40 }
 0x244   : > { %v1409_v7 = vpop.f32.mrf.mxu1 }
 0x245   : > { %v5589_v13 = vadd.f32 %v1409_v7, %v1264_v9  ;;  %v1526_v0 = vsub.f32 0.0, %v1494_v44  ;;  %8359 = vst [vmem:[#allocation60_spill] sm:$0xff] %v5601_v34  ;;  %3957 = vpow2.f32 %v1556_v37  ;;  %v1495_v38 = vand.u32 2147483647, %v5601_v34 }
 0x246   : > { %v1411_v21 = vpop.f32.mrf.mxu1  ;;  %v1558_v28 = vmul.f32 1.442695, %v1525_v3 }
 0x247   : > { %8355 = vst [vmem:[#allocation72_spill] sm:$0xff] %v5589_v13  ;;  %v1496_v58 = vand.u32 2147483647, %v5589_v13  ;;  %v1560_v48 = vmul.f32 1.442695, %v1526_v0  ;;  %v5603_v33 = vadd.f32 %v1411_v21, %v1264_v9  ;;  %v1527_v24 = vsub.f32 0.0, %v1495_v38 }
 0x248   : > { %v1415_v4 = vpop.f32.mrf.mxu1 }
 0x249   : > { %v5591_v45 = vadd.f32 %v1415_v4, %v1269_v46  ;;  %v1528_v17 = vsub.f32 0.0, %v1496_v58  ;;  %8360 = vst [vmem:[#allocation58_spill] sm:$0xff] %v5603_v33  ;;  %3959 = vpow2.f32 %v1560_v48  ;;  %v1497_v10 = vand.u32 2147483647, %v5603_v33 }
 0x24a   : > { %v1417_v19 = vpop.f32.mrf.mxu1  ;;  %v1562_v55 = vmul.f32 1.442695, %v1527_v24 }
 0x24b   : > { %8356 = vst [vmem:[#allocation69_spill] sm:$0xff] %v5591_v45  ;;  %v1498_v23 = vand.u32 2147483647, %v5591_v45  ;;  %v1564_v63 = vmul.f32 1.442695, %v1528_v17  ;;  %v5610_v39 = vadd.f32 %v1417_v19, %v1269_v46  ;;  %v1529_v11 = vsub.f32 0.0, %v1497_v10 }
 0x24c   : > { %v1421_v52 = vpop.f32.mrf.mxu1 }
 0x24d   : > { %v5599_v32 = vadd.f32 %v1421_v52, %v1274_v27  ;;  %v1530_v43 = vsub.f32 0.0, %v1498_v23  ;;  %8361 = vst [vmem:[#allocation62_spill] sm:$0xff] %v5610_v39  ;;  %3961 = vpow2.f32 %v1564_v63  ;;  %v1499_v22 = vand.u32 2147483647, %v5610_v39 }
 0x24e   : > { %v1423_v12 = vpop.f32.mrf.mxu1 }
 0x24f   : > { %8358 = vst [vmem:[#allocation71_spill] sm:$0xff] %v5599_v32  ;;  %v1500_v56 = vand.u32 2147483647, %v5599_v32  ;;  %v1568_v60 = vmul.f32 1.442695, %v1530_v43  ;;  %v5619_v9 = vadd.f32 %v1423_v12, %v1274_v27  ;;  %v1531_v19 = vsub.f32 0.0, %v1499_v22 }
 0x250   : > { %v1427_v8 = vpop.f32.mrf.mxu1  ;;  %v1566_v27 = vmul.f32 1.442695, %v1529_v11 }
 0x251   : > { %v5614_v49 = vadd.f32 %v1427_v8, %v5581_v57  ;;  %v1532_v6 = vsub.f32 0.0, %v1500_v56  ;;  %8363 = vst [vmem:[#allocation54_spill] sm:$0xff] %v5619_v9  ;;  %3963 = vpow2.f32 %v1568_v60  ;;  %v1501_v12 = vand.u32 2147483647, %v5619_v9 }
 0x252   : > { %v1429_v35 = vpop.f32.mrf.mxu1  ;;  %v5635_v8 = vpop.eup %3957  ;;  %3965 = vpow2.f32 %v1558_v28  ;;  %v1570_v40 = vmul.f32 1.442695, %v1531_v19 }
 0x253   : > { %8362 = vst [vmem:[#allocation67_spill] sm:$0xff] %v5614_v49  ;;  %v1502_v46 = vand.u32 2147483647, %v5614_v49  ;;  %v1572_v18 = vmul.f32 1.442695, %v1532_v6  ;;  %8365 = vst [vmem:[#allocation65_spill] sm:$0xff] %v5635_v8  ;;  %v5643_v48 = vadd.f32 %v1429_v35, %v5581_v57 }
 0x254   : > { %v1433_v14 = vpop.f32.mrf.mxu1  ;;  %v1620_v38 = vadd.f32 1.0, %v5635_v8  ;;  %v1533_v63 = vsub.f32 0.0, %v1501_v12  ;;  %v1623_v6 = vmul.f32 -0.5, %v5635_v8 }
 0x255   : > { %v5623_v7 = vadd.f32 %v1433_v14, %v5577_v54  ;;  %v1534_v0 = vsub.f32 0.0, %v1502_v46  ;;  %3967 = vpow2.f32 %v1572_v18  ;;  %8366 = vst [vmem:[#allocation52_spill] sm:$0xff] %v5643_v48  ;;  %v1503_v22 = vand.u32 2147483647, %v5643_v48 }
 0x256   : > { %v5596_v53 = vpop.f32.mrf.mxu1  ;;  %v5646_v17 = vpop.eup %3959  ;;  %3969 = vpow2.f32 %v1562_v55 }
 0x257   : > { %8364 = vst [vmem:[#allocation53_spill] sm:$0xff] %v5623_v7  ;;  %v1504_v58 = vand.u32 2147483647, %v5623_v7  ;;  %8367 = vst [vmem:[#allocation64_spill] sm:$0xff] %v5646_v17  ;;  %3971 = vpow2.f32 %v1566_v27  ;;  %v1576_v35 = vmul.f32 1.442695, %v1534_v0  ;;  %v5655_v3 = vadd.f32 %v5596_v53, %v5577_v54 }
 0x258   : > { %v1439_v31 = vpop.f32.mrf.mxu1  ;;  %v1638_v24 = vadd.f32 1.0, %v5646_v17  ;;  %3973 = vpow2.f32 %v1570_v40  ;;  %v1641_v54 = vmul.f32 -0.5, %v5646_v17  ;;  %v1574_v53 = vmul.f32 1.442695, %v1533_v63 }
 0x259   : > { %v5628_v4 = vadd.f32 %v1439_v31, %v5579_v20  ;;  %v1536_v10 = vsub.f32 0.0, %v1504_v58  ;;  %8368 = vst [vmem:[#allocation70_spill] sm:$0xff] %v5655_v3  ;;  %3975 = vlog2.f32 %v1620_v38  ;;  %v1505_v0 = vand.u32 2147483647, %v5655_v3 }
 0x25a   : > { %v5606_v16 = vpop.f32.mrf.mxu1  ;;  %v5665_v55 = vpop.eup %3961  ;;  %3977 = vpow2.f32 %v1576_v35  ;;  %v1535_v40 = vsub.f32 0.0, %v1503_v22 }
 0x25b   : > { %v1506_v23 = vand.u32 2147483647, %v5628_v4  ;;  %8369 = vst [vmem:[#allocation57_spill] sm:$0xff] %v5665_v55  ;;  %v1580_v12 = vmul.f32 1.442695, %v1536_v10  ;;  %3979 = vlog2.f32 %v1638_v24  ;;  %v1656_v38 = vadd.f32 1.0, %v5665_v55 }
 0x25c   : > { %v1445_v59 = vpop.f32.mrf.mxu1  ;;  %v1659_v63 = vmul.f32 -0.5, %v5665_v55  ;;  %3981 = vpow2.f32 %v1574_v53 }
 0x25d   : > { %v5633_v44 = vadd.f32 %v1445_v59, %v5573_v15  ;;  %v1538_v11 = vsub.f32 0.0, %v1506_v23  ;;  %v5674_v23 = vadd.f32 1.0, %v1623_v6  ;;  %3983 = vpow2.f32 %v1580_v12 }
 0x25e   : > { %v5616_v29 = vpop.f32.mrf.mxu1  ;;  %v5676_v47 = vpop.eup %3963  ;;  %v1660_v53 = vadd.f32 1.0, %v1659_v63 }
 0x25f   : > { %v1508_v59 = vand.u32 2147483647, %v5633_v44  ;;  %8370 = vst [vmem:[#allocation63_spill] sm:$0xff] %v5674_v23  ;;  %v1584_v41 = vmul.f32 1.442695, %v1538_v11  ;;  %8371 = vst [vmem:[#allocation56_spill] sm:$0xff] %v5676_v47  ;;  %v5692_v37 = vpop.eup %3965 }
 0x260   : > { %v1451_v61 = vpop.f32.mrf.mxu1  ;;  %v1537_v11 = vsub.f32 0.0, %v1505_v0  ;;  %v1674_v10 = vadd.f32 1.0, %v5676_v47  ;;  %v5716_v18 = vmul.f32 %v5665_v55, %v1660_v53 }
 0x261   : > { %v1540_v19 = vsub.f32 0.0, %v1508_v59  ;;  %v5672_v58 = vadd.f32 %v1451_v61, %v5575_v51  ;;  %v5682_v59 = vadd.f32 %v5606_v16, %v5579_v20  ;;  %v1642_v61 = vadd.f32 1.0, %v1641_v54 }
 0x262   : > { %v5625_v21 = vpop.f32.mrf.mxu1  ;;  %v1677_v20 = vmul.f32 -0.5, %v5676_v47  ;;  %v1578_v16 = vmul.f32 1.442695, %v1535_v40  ;;  %3985 = vpow2.f32 %v1584_v41  ;;  %v5698_v54 = vpop.eup %3967  ;;  %v1582_v63 = vmul.f32 1.442695, %v1537_v11  ;;  %8374 = vst [vmem:[#allocation55_spill] sm:$0xff] %v5716_v18 }
 0x263   : > { %8372 = vst [vmem:[#allocation68_spill] sm:$0xff] %v5682_v59  ;;  %v1588_v6 = vmul.f32 1.442695, %v1540_v19  ;;  %v1510_v28 = vand.u32 2147483647, %v5672_v58  ;;  %3987 = vlog2.f32 %v1656_v38  ;;  %v5702_v0 = vpop.eup %3969  ;;  %v5705_v31 = vmul.f32 %v5646_v17, %v1642_v61 }
 0x264   : > { %v1457_v52 = vpop.f32.mrf.mxu1  ;;  %v1507_v19 = vand.u32 2147483647, %v5682_v59  ;;  %v5709_v40 = vpop.eup %3971  ;;  %v1678_v46 = vadd.f32 1.0, %v1677_v20  ;;  %v1695_v22 = vmul.f32 -0.5, %v5698_v54  ;;  %v1692_v11 = vadd.f32 1.0, %v5698_v54 }
 0x265   : > { %v5685_v35 = vadd.f32 %v1457_v52, %v5569_v42  ;;  %8373 = vst [vmem:[#allocation66_spill] sm:$0xff] %v5705_v31  ;;  %3989 = vpow2.f32 %v1588_v6  ;;  %v1542_v57 = vsub.f32 0.0, %v1510_v28  ;;  %v5722_v38 = vpop.eup %3973  ;;  %v5728_v20 = vadd.f32 %v5616_v29, %v5573_v15 }
 0x266   : > { %v5639_v14 = vpop.f32.mrf.mxu1  ;;  %3991 = vpow2.f32 %v1578_v16  ;;  %v1539_v41 = vsub.f32 0.0, %v1507_v19  ;;  %v5730_v53 = vpop.eup %3975  ;;  %v1696_v43 = vadd.f32 1.0, %v1695_v22 }
 0x267   : > { %v1512_v12 = vand.u32 2147483647, %v5685_v35  ;;  %3993 = vlog2.f32 %v1674_v10  ;;  %8375 = vst [vmem:[#allocation35_spill] sm:$0xff] %v5728_v20  ;;  %8376 = vst [vmem:[#allocation51_spill] sm:$0xff] %v5730_v53  ;;  %v5737_v10 = vmul.f32 %v5676_v47, %v1678_v46 }
 0x268   : > { %v1463_v56 = vpop.f32.mrf.mxu1  ;;  %3995 = vpow2.f32 %v1582_v63  ;;  %v1586_v29 = vmul.f32 1.442695, %v1539_v41  ;;  %v5742_v63 = vadd.f32 %v5639_v14, %v5569_v42 }
 0x269   : > { %v5696_v52 = vadd.f32 %v1463_v56, %v5571_v5  ;;  %v1544_v6 = vsub.f32 0.0, %v1512_v12  ;;  %v5734_v12 = vpop.eup %3977  ;;  %8377 = vst [vmem:[#allocation47_spill] sm:$0xff] %v5737_v10  ;;  %3997 = vlog2.f32 %v1692_v11 }
 0x26a   : > { %v5657_v60 = vpop.f32.mrf.mxu1  ;;  %v3980_v15 = vpop.eup %3979  ;;  %8378 = vst [vmem:[#allocation46_spill] sm:$0xff] %v5742_v63  ;;  %v1710_v41 = vadd.f32 1.0, %v5734_v12  ;;  %v1513_v13 = vand.u32 2147483647, %v5742_v63 }
 0x26b   : > { %v1514_v61 = vand.u32 2147483647, %v5696_v52  ;;  %v5720_v25 = vadd.f32 %v5657_v60, %v5571_v5  ;;  %v1592_v60 = vmul.f32 1.442695, %v1542_v57  ;;  %v1596_v34 = vmul.f32 1.442695, %v1544_v6 }
 0x26c   : > { %v5668_v27 = vpop.f32.mrf.mxu1  ;;  %v1509_v5 = vand.u32 2147483647, %v5728_v20  ;;  %v1713_v6 = vmul.f32 -0.5, %v5734_v12  ;;  %v5760_v11 = vmul.f32 0.6931472, %v3980_v15  ;;  %v5763_v57 = vmul.f32 %v5698_v54, %v1696_v43 }
 0x26d   : > { %v1546_v26 = vsub.f32 0.0, %v1514_v61  ;;  %v1515_v19 = vand.u32 2147483647, %v5720_v25  ;;  %v5749_v46 = vadd.f32 %v5668_v27, %v5565_v36  ;;  %v5751_v61 = vpop.eup %3981  ;;  %3999 = vpow2.f32 %v1592_v60 }
 0x26e   : > { %v5688_v24 = vpop.f32.mrf.mxu1  ;;  %v5758_v14 = vpop.eup %3983  ;;  %8379 = vst [vmem:[#allocation49_spill] sm:$0xff] %v5760_v11  ;;  %8380 = vst [vmem:[#allocation42_spill] sm:$0xff] %v5763_v57  ;;  %4001 = vpow2.f32 %v1596_v34  ;;  %v1541_v33 = vsub.f32 0.0, %v1509_v5 }
 0x26f   : > { %v1600_v27 = vmul.f32 1.442695, %v1546_v26  ;;  %v5768_v30 = vpop.eup %3985  ;;  %v1547_v60 = vsub.f32 0.0, %v1515_v19  ;;  %4003 = vpow2.f32 %v1586_v29  ;;  %v1516_v43 = vand.u32 2147483647, %v5749_v46 }
 0x270   : > { %v1475_v56 = vpop.f32.mrf.mxu1  ;;  %v3988_v1 = vpop.eup %3987  ;;  %4005 = vlog2.f32 %v1710_v41  ;;  %v1746_v19 = vadd.f32 1.0, %v5768_v30  ;;  %v5790_v41 = vadd.f32 %v5625_v21, %v5575_v51  ;;  %v1590_v23 = vmul.f32 1.442695, %v1541_v33 }
 0x271   : > { %v5756_v42 = vadd.f32 %v1475_v56, %v5567_v50  ;;  %4007 = vpow2.f32 %v1600_v27  ;;  %v1602_v15 = vmul.f32 1.442695, %v1547_v60  ;;  %v5793_v8 = vmul.f32 0.6931472, %v3988_v1 }
 0x272   : > { %v1477_v16 = vpop.f32.mrf.mxu1  ;;  %v5776_v26 = vpop.eup %3989  ;;  %8381 = vst [vmem:[#allocation31_spill] sm:$0xff] %v5790_v41  ;;  %v1548_v45 = vsub.f32 0.0, %v1516_v43  ;;  %v1511_v33 = vand.u32 2147483647, %v5790_v41 }
 0x273   : > { %v5766_v28 = vadd.f32 %v1477_v16, %v5567_v50  ;;  %v1714_v50 = vadd.f32 1.0, %v1713_v6  ;;  %v1728_v16 = vadd.f32 1.0, %v5758_v14  ;;  %v1518_v34 = vand.u32 2147483647, %v5756_v42  ;;  %v5786_v29 = vpop.eup %3991  ;;  %8382 = vst [vmem:[#allocation44_spill] sm:$0xff] %v5793_v8 }
 0x274   : > { %v1481_v22 = vpop.f32.mrf.mxu1  ;;  %v1545_v6 = vsub.f32 0.0, %v1513_v13  ;;  %v1764_v27 = vadd.f32 1.0, %v5776_v26  ;;  %v1731_v13 = vmul.f32 -0.5, %v5758_v14 }
 0x275   : > { %v5772_v56 = vadd.f32 %v1481_v22, %v5561_v62  ;;  %v5783_v22 = vadd.f32 %v5688_v24, %v5565_v36  ;;  %v1519_v5 = vand.u32 2147483647, %v5766_v28  ;;  %v3994_v36 = vpop.eup %3993  ;;  %v5797_v24 = vmul.f32 %v5734_v12, %v1714_v50 }
 0x276   : > { %v1483_v31 = vpop.f32.mrf.mxu1  ;;  %4009 = vlog2.f32 %v1728_v16  ;;  %v1550_v39 = vsub.f32 0.0, %v1518_v34  ;;  %v5800_v21 = vpop.eup %3995  ;;  %v1598_v43 = vmul.f32 1.442695, %v1545_v6  ;;  %v1734_v50 = vand.u32 2147483647, %v5758_v14 }
 0x277   : > { %v1520_v11 = vand.u32 2147483647, %v5772_v56  ;;  %8383 = vst [vmem:[#allocation28_spill] sm:$0xff] %v5797_v24  ;;  %4011 = vlog2.f32 %v1746_v19  ;;  %v1517_v1 = vand.u32 2147483647, %v5783_v22  ;;  %v1551_v60 = vsub.f32 0.0, %v1519_v5  ;;  %v3998_v17 = vpop.eup %3997 }
 0x278   : > { %v1487_v51 = vpop.f32.mrf.mxu1  ;;  %4013 = vpow2.f32 %v1602_v15  ;;  %v1604_v16 = vmul.f32 1.442695, %v1548_v45  ;;  %v5807_v34 = vadd.f32 %v1483_v31, %v5561_v62  ;;  %v5809_v8 = vmul.f32 0.6931472, %v3994_v36 }
 0x279   : > { %v1552_v18 = vsub.f32 0.0, %v1520_v11  ;;  %4015 = vlog2.f32 %v1764_v27  ;;  %v1608_v53 = vmul.f32 1.442695, %v1550_v39  ;;  %v1549_v11 = vsub.f32 0.0, %v1517_v1 }
 0x27a   : > { %8384 = vst [vmem:[#allocation59_spill] sm:$0xff] %v5809_v8  ;;  %4017 = vpow2.f32 %v1590_v23  ;;  %v1489_v5 = vpop.f32.mrf.mxu1  ;;  %v5812_v32 = vpop.eup %3999  ;;  %v1610_v6 = vmul.f32 1.442695, %v1551_v60  ;;  %v1521_v27 = vand.u32 2147483647, %v5807_v34  ;;  %v8386_v62 = vmov 0 }
 0x27b   : > { %v8385_v45 = vand.u32 2147483647, %v5698_v54  ;;  %v1732_v31 = vadd.f32 1.0, %v1731_v13  ;;  %v1543_v23 = vsub.f32 0.0, %v1511_v33  ;;  %4019 = vpow2.f32 %v1598_v43  ;;  %v5822_v39 = vpop.eup %4001 }
 0x27c   : > { %v1612_v36 = vmul.f32 1.442695, %v1552_v18  ;;  %4021 = vpow2.f32 %v1604_v16  ;;  %v1553_v19 = vsub.f32 0.0, %v1521_v27  ;;  %v5825_v15 = vadd.f32 %v1487_v51, %v5563_v2  ;;  %v5830_v60 = vpop.eup %4003 }
 0x27d   : > { %vm5818_vm3 = vcmp.lt.f32.partialorder %v8385_v45, 0.0004427343  ;;  %v5828_v1 = vadd.f32 %v1489_v5, %v5563_v2  ;;  %v1749_v54 = vmul.f32 -0.5, %v5768_v30  ;;  %v1782_v45 = vadd.f32 1.0, %v5812_v32  ;;  %v4006_v18 = vpop.eup %4005 }
 0x27e   : > { %v8387_v62 = vsel %vm5818_vm3, 4294967295, %v8386_v62  ;;  %4023 = vpow2.f32 %v1608_v53  ;;  %v8389_v33 = vand.u32 2147483647, %v5734_v12  ;;  %v8390_v43 = vmov 0  ;;  %v5842_v5 = vpop.eup %4007 }
 0x27f   : > { %8388 = vst [vmem:[#allocation25_spill] sm:$0xff] %v8387_v62  ;;  %v1606_v51 = vmul.f32 1.442695, %v1549_v11  ;;  %4025 = vpow2.f32 %v1610_v6  ;;  %v1614_v2 = vmul.f32 1.442695, %v1553_v19  ;;  %v5845_v27 = vmul.f32 %v5758_v14, %v1732_v31 }
 0x280   : > { %vm5837_vm4 = vcmp.lt.f32.partialorder %v8389_v33, 0.0004427343  ;;  %v1522_v16 = vand.u32 2147483647, %v5825_v15  ;;  %v1800_v13 = vadd.f32 1.0, %v5822_v39  ;;  %4027 = vpow2.f32 %v1612_v36 }
 0x281   : > { %v8391_v43 = vsel %vm5837_vm4, 4294967295, %v8390_v43  ;;  %8393 = vst [vmem:[#allocation23_spill] sm:$0xff] %v5845_v27  ;;  %v1523_v53 = vand.u32 2147483647, %v5828_v1  ;;  %v5849_v12 = vmul.f32 0.6931472, %v3998_v17  ;;  %4029 = vpow2.f32 %v1614_v2 }
 0x282   : > { %8392 = vst [vmem:[#allocation39_spill] sm:$0xff] %v8391_v43  ;;  %v1594_v33 = vmul.f32 1.442695, %v1543_v23  ;;  %v1554_v9 = vsub.f32 0.0, %v1522_v16  ;;  %v1752_v11 = vand.u32 2147483647, %v5768_v30  ;;  %4031 = vlog2.f32 %v1782_v45 }
 0x283   : > { %8394 = vst [vmem:[#allocation22_spill] sm:$0xff] %v5849_v12  ;;  %v1767_v19 = vmul.f32 -0.5, %v5776_v26  ;;  %v1555_v6 = vsub.f32 0.0, %v1523_v53  ;;  %v4010_v10 = vpop.eup %4009  ;;  %vm5853_vm5 = vcmp.lt.f32.partialorder %v1734_v50, 0.0004427343  ;;  %v8395_v14 = vmov 0 }
 0x284   : > { %v8396_v14 = vsel %vm5853_vm5, 4294967295, %v8395_v14  ;;  %v1750_v31 = vadd.f32 1.0, %v1749_v54  ;;  %v1818_v36 = vadd.f32 1.0, %v5842_v5  ;;  %4033 = vpow2.f32 %v1606_v51  ;;  %v4012_v8 = vpop.eup %4011 }
 0x285   : > { %8397 = vst [vmem:[#allocation38_spill] sm:$0xff] %v8396_v14  ;;  %v1616_v17 = vmul.f32 1.442695, %v1554_v9  ;;  %v5858_v23 = vmul.f32 0.6931472, %v4006_v18  ;;  %4035 = vlog2.f32 %v1800_v13  ;;  %v5861_v48 = vpop.eup %4013  ;;  %v1768_v13 = vadd.f32 1.0, %v1767_v19 }
 0x286   : > { %v1618_v16 = vmul.f32 1.442695, %v1555_v6  ;;  %v1770_v54 = vand.u32 2147483647, %v5776_v26  ;;  %4037 = vpow2.f32 %v1594_v33  ;;  %v4016_v9 = vpop.eup %4015  ;;  %vm5869_vm6 = vcmp.lt.f32.partialorder %v1752_v11, 0.0004427343 }
 0x287   : > { %8398 = vst [vmem:[#allocation20_spill] sm:$0xff] %v5858_v23  ;;  %v1785_v51 = vmul.f32 -0.5, %v5812_v32  ;;  %4039 = vpow2.f32 %v1616_v17  ;;  %v5874_v53 = vpop.eup %4017  ;;  %v1748_v6 = vmul.f32 0.6931472, %v4012_v8  ;;  %v1751_v2 = vmul.f32 %v5768_v30, %v1750_v31 }
 0x288   : > { %v1803_v50 = vmul.f32 -0.5, %v5822_v39  ;;  %4041 = vlog2.f32 %v1818_v36  ;;  %v5882_v11 = vmul.f32 0.6931472, %v4010_v10  ;;  %v1827_v19 = vadd.f32 1.0, %v5861_v48  ;;  %v5885_v45 = vpop.eup %4019 }
 0x289   : > { %4043 = vpow2.f32 %v1618_v16  ;;  %v1766_v17 = vmul.f32 0.6931472, %v4016_v9  ;;  %vm5887_vm7 = vcmp.lt.f32.partialorder %v1770_v54, 0.0004427343  ;;  %v1821_v30 = vmul.f32 -0.5, %v5842_v5  ;;  %v5893_v36 = vpop.eup %4021 }
 0x28a   : > { %8401 = vst [vmem:[#allocation45_spill] sm:$0xff] %v5882_v11  ;;  %v1769_v33 = vmul.f32 %v5776_v26, %v1768_v13  ;;  %v1786_v10 = vadd.f32 1.0, %v1785_v51  ;;  %v1788_v16 = vand.u32 2147483647, %v5812_v32  ;;  %v1754_v54 = vsel %vm5869_vm6, %v1751_v2, %v1748_v6 }
 0x28b   : > { %v5898_v57 = vpop.eup %4023  ;;  %v1804_v9 = vadd.f32 1.0, %v1803_v50  ;;  %v1806_v62 = vand.u32 2147483647, %v5822_v39  ;;  %4045 = vlog2.f32 %v1827_v19  ;;  %v1822_v50 = vadd.f32 1.0, %v1821_v30 }
 0x28c   : > { %v5904_v31 = vpop.eup %4025  ;;  %v1772_v2 = vsel %vm5887_vm7, %v1769_v33, %v1766_v17  ;;  %v1836_v18 = vadd.f32 1.0, %v5893_v36  ;;  %v8404_v23 = vmax.f32 %v5628_v4, 0.0  ;;  %v1787_v13 = vmul.f32 %v5812_v32, %v1786_v10 }
 0x28d   : > { %v5912_v12 = vpop.eup %4027  ;;  %vm5925_vm8 = vcmp.lt.f32.partialorder %v1788_v16, 0.0004427343  ;;  %v1854_v8 = vadd.f32 1.0, %v5898_v57  ;;  %v1805_v17 = vmul.f32 %v5822_v39, %v1804_v9  ;;  %vm5931_vm9 = vcmp.lt.f32.partialorder %v1806_v62, 0.0004427343 }
 0x28e   : > { %v5918_v49 = vpop.eup %4029  ;;  %v5922_v26 = vadd.f32 %v8404_v23, %v1754_v54  ;;  %v1824_v51 = vand.u32 2147483647, %v5842_v5  ;;  %v1863_v4 = vadd.f32 1.0, %v5904_v31  ;;  %v1830_v23 = vmul.f32 -0.5, %v5861_v48 }
 0x28f   : > { %v4032_v33 = vpop.eup %4031  ;;  %v8410_v10 = vmax.f32 %v5633_v44, 0.0  ;;  %v1881_v39 = vadd.f32 1.0, %v5918_v49  ;;  %v1809_v62 = vadd.f32 1.0, %v5885_v45  ;;  %v5948_v6 = vmul.f32 %v5842_v5, %v1822_v50 }
 0x290   : > { %8405 = vst [vmem:[#allocation19_spill] sm:$0xff] %v5922_v26  ;;  %4047 = vlog2.f32 %v1836_v18  ;;  %v1839_v24 = vmul.f32 -0.5, %v5893_v36  ;;  %v1872_v43 = vadd.f32 1.0, %v5912_v12  ;;  %v1784_v44 = vmul.f32 0.6931472, %v4032_v33 }
 0x291   : > { %v5938_v32 = vpop.eup %4033  ;;  %v5942_v16 = vadd.f32 %v8410_v10, %v1772_v2  ;;  %4049 = vlog2.f32 %v1854_v8  ;;  %v1833_v10 = vand.u32 2147483647, %v5861_v48  ;;  %vm5958_vm10 = vcmp.lt.f32.partialorder %v1824_v51, 0.0004427343 }
 0x292   : > { %v4036_v9 = vpop.eup %4035  ;;  %4051 = vlog2.f32 %v1863_v4  ;;  %v1845_v50 = vadd.f32 1.0, %v5938_v32  ;;  %v1831_v18 = vadd.f32 1.0, %v1830_v23  ;;  %v1812_v33 = vmul.f32 -0.5, %v5885_v45 }
 0x293   : > { %8411 = vst [vmem:[#allocation18_spill] sm:$0xff] %v5942_v16  ;;  %v5952_v26 = vpop.eup %4037  ;;  %v1802_v11 = vmul.f32 0.6931472, %v4036_v9  ;;  %4053 = vlog2.f32 %v1881_v39  ;;  %v1840_v27 = vadd.f32 1.0, %v1839_v24  ;;  %v1857_v51 = vmul.f32 -0.5, %v5898_v57 }
 0x294   : > { %v5956_v54 = vpop.eup %4039  ;;  %4055 = vlog2.f32 %v1872_v43  ;;  %v1790_v4 = vsel %vm5925_vm8, %v1787_v13, %v1784_v44  ;;  %v1866_v9 = vmul.f32 -0.5, %v5904_v31  ;;  %v1842_v39 = vand.u32 2147483647, %v5893_v36 }
 0x295   : > { %v4042_v7 = vpop.eup %4041  ;;  %v1890_v8 = vadd.f32 1.0, %v5956_v54  ;;  %v1875_v5 = vmul.f32 -0.5, %v5912_v12  ;;  %v5977_v24 = vmul.f32 %v5861_v48, %v1831_v18  ;;  %vm5979_vm11 = vcmp.lt.f32.partialorder %v1833_v10, 0.0004427343 }
 0x296   : > { %v5966_v2 = vpop.eup %4043  ;;  %v1808_v13 = vsel %vm5931_vm9, %v1805_v17, %v1802_v11  ;;  %v1820_v19 = vmul.f32 0.6931472, %v4042_v7  ;;  %v1848_v44 = vmul.f32 -0.5, %v5938_v32  ;;  %v8416_v14 = vmax.f32 %v5672_v58, 0.0 }
 0x297   : > { %4057 = vlog2.f32 %v1890_v8  ;;  %v1899_v23 = vadd.f32 1.0, %v5966_v2  ;;  %v1860_v48 = vand.u32 2147483647, %v5898_v57  ;;  %v5992_v10 = vmul.f32 %v5893_v36, %v1840_v27 }
 0x298   : > { %4059 = vlog2.f32 %v1845_v50  ;;  %v4046_v8 = vpop.eup %4045  ;;  %v5988_v16 = vadd.f32 %v8416_v14, %v1790_v4  ;;  %v1858_v50 = vadd.f32 1.0, %v1857_v51  ;;  %v1867_v18 = vadd.f32 1.0, %v1866_v9 }
 0x299   : > { %4061 = vlog2.f32 %v1899_v23  ;;  %v1869_v30 = vand.u32 2147483647, %v5904_v31  ;;  %v1791_v7 = vadd.f32 1.0, %v5952_v26  ;;  %v8418_v11 = vmax.f32 %v5685_v35, 0.0 }
 0x29a   : > { %8417 = vst [vmem:[#allocation50_spill] sm:$0xff] %v5988_v16  ;;  %4063 = vlog2.f32 %v1809_v62  ;;  %v1876_v23 = vadd.f32 1.0, %v1875_v5  ;;  %v1878_v58 = vand.u32 2147483647, %v5912_v12  ;;  %v1884_v14 = vmul.f32 -0.5, %v5918_v49 }
 0x29b   : > { %v5998_v17 = vadd.f32 %v8418_v11, %v1808_v13  ;;  %v1826_v62 = vsel %vm5958_vm10, %v5948_v6, %v1820_v19  ;;  %v1849_v27 = vadd.f32 1.0, %v1848_v44  ;;  %v6005_v36 = vmul.f32 0.6931472, %v4046_v8 }
 0x29c   : > { %v1773_v51 = vadd.f32 1.0, %v5874_v53  ;;  %v6009_v4 = vmul.f32 %v5898_v57, %v1858_v50  ;;  %v1893_v35 = vmul.f32 -0.5, %v5956_v54  ;;  %v1887_v5 = vand.u32 2147483647, %v5918_v49 }
 0x29d   : > { %8419 = vst [vmem:[#allocation36_spill] sm:$0xff] %v5998_v17  ;;  %v1813_v9 = vadd.f32 1.0, %v1812_v33  ;;  %v4048_v13 = vpop.eup %4047  ;;  %vm6013_vm12 = vcmp.lt.f32.partialorder %v1842_v39, 0.0004427343  ;;  %v1902_v3 = vmul.f32 -0.5, %v5966_v2  ;;  %v6019_v6 = vmul.f32 %v5904_v31, %v1867_v18 }
 0x29e   : > { %4065 = vlog2.f32 %v1791_v7  ;;  %v1755_v19 = vadd.f32 1.0, %v5830_v60  ;;  %v4050_v57 = vpop.eup %4049  ;;  %v8422_v44 = vmax.f32 %v5696_v52, 0.0  ;;  %v6027_v33 = vmul.f32 %v5912_v12, %v1876_v23 }
 0x29f   : > { %v1885_v39 = vadd.f32 1.0, %v1884_v14  ;;  %v1851_v50 = vand.u32 2147483647, %v5938_v32  ;;  %v4052_v59 = vpop.eup %4051  ;;  %vm6030_vm13 = vcmp.lt.f32.partialorder %v1860_v48, 0.0004427343  ;;  %v6039_v18 = vmul.f32 %v5938_v32, %v1849_v27 }
 0x2a0   : > { %v6024_v8 = vadd.f32 %v8422_v44, %v1826_v62  ;;  %vm6034_vm14 = vcmp.lt.f32.partialorder %v1878_v58, 0.0004427343  ;;  %4067 = vlog2.f32 %v1773_v51  ;;  %v1737_v12 = vadd.f32 1.0, %v5800_v21  ;;  %v4054_v7 = vpop.eup %4053 }
 0x2a1   : > { %v1894_v48 = vadd.f32 1.0, %v1893_v35  ;;  %v1896_v23 = vand.u32 2147483647, %v5956_v54  ;;  %vm6047_vm15 = vcmp.lt.f32.partialorder %v1887_v5, 0.0004427343  ;;  %v6056_v32 = vmul.f32 %v5885_v45, %v1813_v9  ;;  %v4056_v62 = vpop.eup %4055 }
 0x2a2   : > { %8423 = vst [vmem:[#allocation34_spill] sm:$0xff] %v6024_v8  ;;  %vm6051_vm1 = vcmp.lt.f32.partialorder %v1869_v30, 0.0004427343  ;;  %v1838_v27 = vmul.f32 0.6931472, %v4048_v13  ;;  %v1903_v51 = vadd.f32 1.0, %v1902_v3  ;;  %4069 = vlog2.f32 %v1755_v19 }
 0x2a3   : > { %v1719_v44 = vadd.f32 1.0, %v5786_v29  ;;  %v1856_v52 = vmul.f32 0.6931472, %v4050_v57  ;;  %v1905_v5 = vand.u32 2147483647, %v5966_v2  ;;  %v1886_v55 = vmul.f32 %v5918_v49, %v1885_v39 }
 0x2a4   : > { %v4058_v35 = vpop.eup %4057  ;;  %vm6061_vm2 = vcmp.lt.f32.partialorder %v1851_v50, 0.0004427343  ;;  %v1794_v20 = vmul.f32 -0.5, %v5952_v26  ;;  %v1883_v47 = vmul.f32 0.6931472, %v4054_v7  ;;  %4071 = vlog2.f32 %v1737_v12 }
 0x2a5   : > { %v4060_v9 = vpop.eup %4059  ;;  %v1892_v17 = vmul.f32 0.6931472, %v4058_v35  ;;  %v1701_v13 = vadd.f32 1.0, %v5751_v61  ;;  %v1874_v19 = vmul.f32 0.6931472, %v4056_v62  ;;  %v1895_v57 = vmul.f32 %v5956_v54, %v1894_v48 }
 0x2a6   : > { %v4062_v3 = vpop.eup %4061  ;;  %vm6068_vm6 = vcmp.lt.f32.partialorder %v1896_v23, 0.0004427343  ;;  %v1865_v49 = vmul.f32 0.6931472, %v4052_v59  ;;  %v1904_v8 = vmul.f32 %v5966_v2, %v1903_v51  ;;  %v8436_v63 = vand.u32 2147483647, %v5885_v45 }
 0x2a7   : > { %v4064_v39 = vpop.eup %4063  ;;  %v1901_v50 = vmul.f32 0.6931472, %v4062_v3  ;;  %4073 = vlog2.f32 %v1719_v44  ;;  %v1683_v12 = vadd.f32 1.0, %v5722_v38  ;;  %v1844_v54 = vsel %vm6013_vm12, %v5992_v10, %v1838_v27 }
 0x2a8   : > { %vm6075_vm7 = vcmp.lt.f32.partialorder %v8436_v63, 0.0004427343  ;;  %v1898_v59 = vsel %vm6068_vm6, %v1895_v57, %v1892_v17  ;;  %vm1906_vm8 = vcmp.lt.f32.partialorder %v1905_v5, 0.0004427343  ;;  %v1776_v48 = vmul.f32 -0.5, %v5874_v53 }
 0x2a9   : > { %v1907_v2 = vsel %vm1906_vm8, %v1904_v8, %v1901_v50  ;;  %v1889_v63 = vsel %vm6047_vm15, %v1886_v55, %v1883_v47  ;;  %v1847_v45 = vmul.f32 0.6931472, %v4060_v9  ;;  %4075 = vlog2.f32 %v1701_v13 }
 0x2aa   : > { %v1862_v23 = vsel %vm6030_vm13, %v6009_v4, %v1856_v52  ;;  %v1880_v10 = vsel %vm6034_vm14, %v6027_v33, %v1874_v19  ;;  %v8439_v41 = vmax.f32 %v5828_v1, 0.0  ;;  %v1665_v11 = vadd.f32 1.0, %v5709_v40 }
 0x2ab   : > { %v8440_v8 = vmax.f32 %v5825_v15, 0.0  ;;  %v1871_v47 = vsel %vm6051_vm1, %v6019_v6, %v1865_v49  ;;  %4077 = vlog2.f32 %v1683_v12  ;;  %v1647_v55 = vadd.f32 1.0, %v5702_v0  ;;  %v4066_v16 = vpop.eup %4065 }
 0x2ac   : > { %v1971_v17 = vadd.f32 %v8439_v41, %v1907_v2  ;;  %v8441_v4 = vmax.f32 %v5807_v34, 0.0  ;;  %v1811_v31 = vmul.f32 0.6931472, %v4064_v39  ;;  %v1795_v1 = vadd.f32 1.0, %v1794_v20  ;;  %v8455_v41 = vld [vmem:[#allocation34_spill] sm:$0xff] }
 0x2ad   : > { %v1970_v62 = vadd.f32 %v8440_v8, %v1898_v59  ;;  %v1797_v52 = vand.u32 2147483647, %v5952_v26  ;;  %v8442_v58 = vmax.f32 %v5772_v56, 0.0  ;;  %v1853_v6 = vsel %vm6061_vm2, %v6039_v18, %v1847_v45  ;;  %v4068_v27 = vpop.eup %4067 }
 0x2ae   : > { %2084 = vmatprep.subr.mxu0 %v1971_v17  ;;  %v1969_v33 = vadd.f32 %v8441_v4, %v1889_v63  ;;  %v1758_v14 = vmul.f32 -0.5, %v5830_v60  ;;  %4079 = vlog2.f32 %v1665_v11  ;;  %v8443_v51 = vmax.f32 %v5749_v46, 0.0 }
 0x2af   : > { %v1968_v15 = vadd.f32 %v8442_v58, %v1880_v10  ;;  %2085 = vmatpush1.msra.mxu0 %v1970_v62  ;;  %v8444_v44 = vmax.f32 %v5756_v42, 0.0  ;;  %v8445_v35 = vmax.f32 %v5766_v28, 0.0  ;;  %v1629_v5 = vadd.f32 1.0, %v5692_v37  ;;  %v4070_v13 = vpop.eup %4069 }
 0x2b0   : > { %v1964_v34 = vadd.f32 %v8443_v51, %v1844_v54  ;;  %2086 = vmatprep.subr.mxu0 %v1969_v33  ;;  %v1793_v9 = vmul.f32 0.6931472, %v4066_v16  ;;  %v1777_v30 = vadd.f32 1.0, %v1776_v48  ;;  %v1740_v18 = vmul.f32 -0.5, %v5800_v21 }
 0x2b1   : > { %v1966_v20 = vadd.f32 %v8444_v44, %v1862_v23  ;;  %v1967_v56 = vadd.f32 %v8445_v35, %v1871_v47  ;;  %2087 = vmatpush1.msra.mxu0 %v1968_v15  ;;  %4081 = vlog2.f32 %v1647_v55  ;;  %v8446_v46 = vmax.f32 %v5783_v22, 0.0  ;;  %v4072_v50 = vpop.eup %4071  ;;  %v8456_v47 = vld [vmem:[#allocation31_spill] sm:$0xff] }
 0x2b2   : > { %v1817_v42 = vsel %vm6075_vm7, %v6056_v32, %v1811_v31  ;;  %v1779_v28 = vand.u32 2147483647, %v5874_v53  ;;  %v1722_v19 = vmul.f32 -0.5, %v5786_v29  ;;  %v1796_v57 = vmul.f32 %v5952_v26, %v1795_v1  ;;  %v8460_v1 = vld [vmem:[#allocation56_spill] sm:$0xff] }
 0x2b3   : > { %2088 = vmatprep.subr.mxu0 %v1967_v56  ;;  %v1965_v3 = vadd.f32 %v8446_v46, %v1853_v6  ;;  %v1775_v49 = vmul.f32 0.6931472, %v4068_v27  ;;  %v1759_v39 = vadd.f32 1.0, %v1758_v14  ;;  %4083 = vlog2.f32 %v1629_v5 }
 0x2b4   : > { %2089 = vmatpush1.msra.mxu0 %v1966_v20  ;;  %v8447_v22 = vsel %vm5979_vm11, %v5977_v24, %v6005_v36  ;;  %v8448_v7 = vmax.f32 %v5720_v25, 0.0  ;;  %vm6135_vm9 = vcmp.lt.f32.partialorder %v1797_v52, 0.0004427343  ;;  %v1761_v54 = vand.u32 2147483647, %v5830_v60  ;;  %v4074_v24 = vpop.eup %4073  ;;  %v8451_v25 = vld [vmem:[#allocation46_spill] sm:$0xff] }
 0x2b5   : > { %2090 = vmatprep.subr.mxu0 %v1965_v3  ;;  %v1704_v26 = vmul.f32 -0.5, %v5751_v61  ;;  %v1799_v59 = vsel %vm6135_vm9, %v1796_v57, %v1793_v9  ;;  %v1778_v43 = vmul.f32 %v5874_v53, %v1777_v30  ;;  %v1757_v48 = vmul.f32 0.6931472, %v4070_v13  ;;  %v8469_v9 = vld [vmem:[#allocation57_spill] sm:$0xff] }
 0x2b6   : > { %v1963_v32 = vadd.f32 %v8448_v7, %v8447_v22  ;;  %2091 = vmatpush1.msra.mxu0 %v1964_v34  ;;  %v1741_v2 = vadd.f32 1.0, %v1740_v18  ;;  %v8452_v36 = vmax.f32 %v8451_v25, 0.0  ;;  %vm6146_vm10 = vcmp.lt.f32.partialorder %v1779_v28, 0.0004427343  ;;  %v4076_v62 = vpop.eup %4075  ;;  %v8465_v34 = vld [vmem:[#allocation35_spill] sm:$0xff]  ;;  %v8473_v18 = vld [vmem:[#allocation50_spill] sm:$0xff] }
 0x2b7   : > { %v1743_v23 = vand.u32 2147483647, %v5800_v21  ;;  %v1723_v10 = vadd.f32 1.0, %v1722_v19  ;;  %v1781_v17 = vsel %vm6146_vm10, %v1778_v43, %v1775_v49  ;;  %v1760_v53 = vmul.f32 %v5830_v60, %v1759_v39  ;;  %v8464_v60 = vld [vmem:[#allocation36_spill] sm:$0xff]  ;;  %v8478_v22 = vld [vmem:[#allocation18_spill] sm:$0xff]  ;;  %v8480_v43 = vld [vmem:[#allocation23_spill] sm:$0xff] }
 0x2b8   : > { %2092 = vmatprep.subr.mxu0 %v1963_v32  ;;  %v1961_v63 = vadd.f32 %v8452_v36, %v1817_v42  ;;  %v1739_v11 = vmul.f32 0.6931472, %v4072_v50  ;;  %v1686_v8 = vmul.f32 -0.5, %v5722_v38  ;;  %v8457_v55 = vmax.f32 %v8456_v47, 0.0  ;;  %v4078_v51 = vpop.eup %4077  ;;  %v8485_v36 = vld [vmem:[#allocation70_spill] sm:$0xff]  ;;  %v8512_v49 = vld [vmem:[#allocation51_spill] sm:$0xff] }
 0x2b9   : > { %2093 = vmatpush1.msra.mxu0 %v8455_v41  ;;  %vm6158_vm11 = vcmp.lt.f32.partialorder %v1761_v54, 0.0004427343  ;;  %v1725_v33 = vand.u32 2147483647, %v5786_v29  ;;  %v1705_v31 = vadd.f32 1.0, %v1704_v26  ;;  %v1742_v6 = vmul.f32 %v5800_v21, %v1741_v2  ;;  %v8489_v41 = vld [vmem:[#allocation19_spill] sm:$0xff] }
 0x2ba   : > { %2094 = vmatprep.subr.mxu0 %v1961_v63  ;;  %v1959_v16 = vadd.f32 %v8457_v55, %v1799_v59  ;;  %v8461_v52 = vand.u32 2147483647, %v8460_v1  ;;  %v1763_v15 = vsel %vm6158_vm11, %v1760_v53, %v1757_v48  ;;  %v1721_v14 = vmul.f32 0.6931472, %v4074_v24  ;;  %v8481_v48 = vld [vmem:[#allocation45_spill] sm:$0xff]  ;;  %v8491_v55 = vld [vmem:[#allocation28_spill] sm:$0xff] }
 0x2bb   : > { %2095 = vmatpush1.msra.mxu0 %v8464_v60  ;;  %v1668_v27 = vmul.f32 -0.5, %v5709_v40  ;;  %v8466_v44 = vmax.f32 %v8465_v34, 0.0  ;;  %vm6176_vm13 = vcmp.lt.f32.partialorder %v1743_v23, 0.0004427343  ;;  %v1724_v56 = vmul.f32 %v5786_v29, %v1723_v10  ;;  %v4080_v28 = vpop.eup %4079  ;;  %v8474_v29 = vld [vmem:[#allocation68_spill] sm:$0xff]  ;;  %v8483_v24 = vld [vmem:[#allocation53_spill] sm:$0xff] }
 0x2bc   : > { %vm6165_vm12 = vcmp.lt.f32.partialorder %v8461_v52, 0.0004427343  ;;  %2096 = vmatprep.subr.mxu0 %v1959_v16  ;;  %v1707_v5 = vand.u32 2147483647, %v5751_v61  ;;  %v8470_v30 = vand.u32 2147483647, %v8469_v9  ;;  %v1745_v13 = vsel %vm6176_vm13, %v1742_v6, %v1739_v11 }
 0x2bd   : > { %v1957_v20 = vadd.f32 %v8466_v44, %v1781_v17  ;;  %2097 = vmatpush1.msra.mxu0 %v8473_v18  ;;  %v1703_v46 = vmul.f32 0.6931472, %v4076_v62  ;;  %v1687_v3 = vadd.f32 1.0, %v1686_v8  ;;  %v1650_v42 = vmul.f32 -0.5, %v5702_v0  ;;  %v8492_v16 = vld [vmem:[#allocation20_spill] sm:$0xff]  ;;  %v8500_v44 = vld [vmem:[#allocation59_spill] sm:$0xff] }
 0x2be   : > { %vm6184_vm14 = vcmp.lt.f32.partialorder %v8470_v30, 0.0004427343  ;;  %v8475_v19 = vmax.f32 %v8474_v29, 0.0  ;;  %vm6194_vm15 = vcmp.lt.f32.partialorder %v1725_v33, 0.0004427343  ;;  %v1706_v39 = vmul.f32 %v5751_v61, %v1705_v31  ;;  %v4082_v26 = vpop.eup %4081  ;;  %v8494_v33 = vld [vmem:[#allocation67_spill] sm:$0xff] }
 0x2bf   : > { %2098 = vmatprep.subr.mxu0 %v1957_v20  ;;  %v1689_v50 = vand.u32 2147483647, %v5722_v38  ;;  %v1727_v7 = vsel %vm6194_vm15, %v1724_v56, %v1721_v14  ;;  %v1685_v32 = vmul.f32 0.6931472, %v4078_v51  ;;  %v1669_v12 = vadd.f32 1.0, %v1668_v27  ;;  %v8496_v52 = vld [vmem:[#allocation52_spill] sm:$0xff] }
 0x2c0   : > { %v1955_v57 = vadd.f32 %v8475_v19, %v1763_v15  ;;  %2099 = vmatpush1.msra.mxu0 %v8478_v22  ;;  %v1632_v54 = vmul.f32 -0.5, %v5692_v37  ;;  %v8482_v2 = vsel %vm5853_vm5, %v8480_v43, %v8481_v48  ;;  %v8484_v25 = vmax.f32 %v8483_v24, 0.0  ;;  %v4084_v62 = vpop.eup %4083  ;;  %v8501_v20 = vld [vmem:[#allocation47_spill] sm:$0xff]  ;;  %v8502_v56 = vld [vmem:[#allocation54_spill] sm:$0xff]  ;;  %v8519_v59 = vld [vmem:[#allocation64_spill] sm:$0xff] }
 0x2c1   : > { %v8486_v63 = vmax.f32 %v8485_v36, 0.0  ;;  %vm6213_vm1 = vcmp.lt.f32.partialorder %v1707_v5, 0.0004427343  ;;  %v1671_v10 = vand.u32 2147483647, %v5709_v40  ;;  %v1688_v53 = vmul.f32 %v5722_v38, %v1687_v3  ;;  %v8514_v22 = vld [vmem:[#allocation55_spill] sm:$0xff] }
 0x2c2   : > { %v1952_v61 = vadd.f32 %v8484_v25, %v8482_v2  ;;  %2100 = vmatprep.subr.mxu0 %v1955_v57  ;;  %v1709_v17 = vsel %vm6213_vm1, %v1706_v39, %v1703_v46  ;;  %v1667_v11 = vmul.f32 0.6931472, %v4080_v28  ;;  %v1651_v8 = vadd.f32 1.0, %v1650_v42  ;;  %v8508_v46 = vld [vmem:[#allocation22_spill] sm:$0xff]  ;;  %v8510_v42 = vld [vmem:[#allocation71_spill] sm:$0xff]  ;;  %v8523_v48 = vld [vmem:[#allocation69_spill] sm:$0xff] }
 0x2c3   : > { %v1953_v45 = vadd.f32 %v8486_v63, %v1745_v13  ;;  %2101 = vmatpush1.msra.mxu0 %v8489_v41  ;;  %v8493_v4 = vsel %vm5837_vm4, %v8491_v55, %v8492_v16  ;;  %v8495_v31 = vmax.f32 %v8494_v33, 0.0  ;;  %v8497_v60 = vmax.f32 %v8496_v52, 0.0  ;;  %v8526_v36 = vld [vmem:[#allocation65_spill] sm:$0xff]  ;;  %v8528_v23 = vld [vmem:[#allocation66_spill] sm:$0xff]  ;;  %v8533_v47 = vld [vmem:[#allocation72_spill] sm:$0xff] }
 0x2c4   : > { %vm6231_vm5 = vcmp.lt.f32.partialorder %v1689_v50, 0.0004427343  ;;  %v1653_v38 = vand.u32 2147483647, %v5702_v0  ;;  %v1670_v27 = vmul.f32 %v5709_v40, %v1669_v12  ;;  %v1649_v51 = vmul.f32 0.6931472, %v4082_v26 }
 0x2c5   : > { %v1950_v1 = vadd.f32 %v8495_v31, %v8493_v4  ;;  %2102 = vmatprep.subr.mxu0 %v1953_v45  ;;  %v1951_v15 = vadd.f32 %v8497_v60, %v1727_v7  ;;  %v1691_v14 = vsel %vm6231_vm5, %v1688_v53, %v1685_v32  ;;  %v1633_v34 = vadd.f32 1.0, %v1632_v54  ;;  %v8507_v40 = vld [vmem:[#allocation42_spill] sm:$0xff]  ;;  %v8513_v50 = vld [vmem:[#allocation44_spill] sm:$0xff]  ;;  %v8527_v45 = vld [vmem:[#allocation49_spill] sm:$0xff] }
 0x2c6   : > { %2103 = vmatpush1.msra.mxu0 %v1952_v61  ;;  %v1682_v35 = vsel %vm6165_vm12, %v8501_v20, %v8500_v44  ;;  %v8503_v5 = vmax.f32 %v8502_v56, 0.0  ;;  %vm6245_vm4 = vcmp.lt.f32.partialorder %v1671_v10, 0.0004427343  ;;  %v1635_v18 = vand.u32 2147483647, %v5692_v37  ;;  %v8515_v32 = vld [vmem:[#allocation62_spill] sm:$0xff] }
 0x2c7   : > { %2104 = vmatprep.subr.mxu0 %v1951_v15  ;;  %v8509_v3 = vsel %vm5818_vm3, %v8507_v40, %v8508_v46  ;;  %v8511_v28 = vmax.f32 %v8510_v42, 0.0  ;;  %v1673_v58 = vsel %vm6245_vm4, %v1670_v27, %v1667_v11  ;;  %v1652_v19 = vmul.f32 %v5702_v0, %v1651_v8  ;;  %v8525_v61 = vld [vmem:[#allocation63_spill] sm:$0xff]  ;;  %v8529_v41 = vld [vmem:[#allocation58_spill] sm:$0xff]  ;;  %v8532_v8 = vld [vmem:[#allocation37_spill] sm:$0xff] }
 0x2c8   : > { %v1949_v9 = vadd.f32 %v8503_v5, %v1709_v17  ;;  %2105 = vmatpush1.msra.mxu0 %v1950_v1  ;;  %v1631_v57 = vmul.f32 0.6931472, %v4084_v62  ;;  %v1622_v39 = vmul.f32 0.6931472, %v8512_v49  ;;  %v1664_v7 = vsel %vm6184_vm14, %v8514_v22, %v8513_v50  ;;  %v8535_v33 = vld [vmem:[#allocation61_spill] sm:$0xff]  ;;  %v8536_v1 = vld [vmem:[#allocation60_spill] sm:$0xff] }
 0x2c9   : > { %v1948_v29 = vadd.f32 %v8511_v28, %v8509_v3  ;;  %v8516_v12 = vmax.f32 %v8515_v32, 0.0  ;;  %vm6267_vm3 = vcmp.lt.f32.partialorder %v1653_v38, 0.0004427343  ;;  %v8520_v43 = vand.u32 2147483647, %v8519_v59  ;;  %v8538_v15 = vld [vmem:[#allocation48_spill] sm:$0xff] }
 0x2ca   : > { %2106 = vmatprep.subr.mxu0 %v1949_v9  ;;  %v8524_v2 = vmax.f32 %v8523_v48, 0.0  ;;  %v1655_v21 = vsel %vm6267_vm3, %v1652_v19, %v1649_v51  ;;  %v1634_v25 = vmul.f32 %v5692_v37, %v1633_v34  ;;  %v1625_v63 = vmul.f32 %v8526_v36, %v8525_v61  ;;  %v1972_v51 = vld [vmem:[%s7961_s6] sm:$0xff]  ;;  %v1973_v44 = vld [vmem:[%s7961_s6 + $0x8] sm:$0xff]  ;;  %v1974_v20 = vld [vmem:[%s7961_s6 + $0x10] sm:$0xff]  ;;  %v6365_v19 = vpop.permute.xlu0 %2081 }
 0x2cb   : > { %v1947_v54 = vadd.f32 %v8516_v12, %v1691_v14  ;;  %vm6273_vm2 = vcmp.lt.f32.partialorder %v8520_v43, 0.0004427343  ;;  %2107 = vmatpush1.msra.mxu0 %v1948_v29  ;;  %v8530_v17 = vmax.f32 %v8529_v41, 0.0  ;;  %vm1636_vm6 = vcmp.lt.f32.partialorder %v1635_v18, 0.0004427343  ;;  %v1976_v56 = vld [vmem:[%s7961_s6 + $0x20] sm:$0xff] }
 0x2cc   : > { %v1946_v24 = vadd.f32 %v8524_v2, %v1682_v35  ;;  %v1646_v10 = vsel %vm6273_vm2, %v8528_v23, %v8527_v45  ;;  %v8531_v11 = vand.u32 2147483647, %v8526_v36  ;;  %v1910_v62 = vmax.f32 %v8532_v8, 0.0  ;;  %v1975_v35 = vld [vmem:[%s7961_s6 + $0x18] sm:$0xff]  ;;  %v1977_v5 = vld [vmem:[%s7961_s6 + $0x28] sm:$0xff]  ;;  %v1978_v9 = vld [vmem:[%s7961_s6 + $0x30] sm:$0xff] }
 0x2cd   : > { %2108 = vmatprep.subr.mxu0 %v1947_v54  ;;  %v1945_v53 = vadd.f32 %v8530_v17, %v1673_v58  ;;  %v8534_v37 = vmax.f32 %v8533_v47, 0.0  ;;  %v1637_v16 = vsel %vm1636_vm6, %v1634_v25, %v1631_v57  ;;  %v1909_v31 = vmax.f32 %v8535_v33, 0.0  ;;  %v1979_v30 = vld [vmem:[%s7961_s6 + $0x38] sm:$0xff]  ;;  %v1980_v18 = vld [vmem:[%s7961_s6 + $0x40] sm:$0xff]  ;;  %v1981_v13 = vld [vmem:[%s7961_s6 + $0x48] sm:$0xff]  ;;  %v6363_v58 = vpop.permute.xlu1 %2076 }
 0x2ce   : > { %vm1627_vm7 = vcmp.lt.f32.partialorder %v8531_v11, 0.0004427343  ;;  %2109 = vmatpush1.msra.mxu0 %v1946_v24  ;;  %v8537_v52 = vmax.f32 %v8536_v1, 0.0  ;;  %v1908_v6 = vmax.f32 %v8538_v15, 0.0  ;;  %v1942_v38 = vadd.f32 %v1910_v62, %v1646_v10  ;;  %v1982_v40 = vld [vmem:[%s7961_s6 + $0x50] sm:$0xff]  ;;  %v1983_v46 = vld [vmem:[%s7961_s6 + $0x58] sm:$0xff]  ;;  %v6369_v49 = vpop.permute.xlu0 %2071 }
 0x2cf   : > { %v1944_v55 = vadd.f32 %v8534_v37, %v1664_v7  ;;  %v1628_v4 = vsel %vm1627_vm7, %v1625_v63, %v1622_v39  ;;  %2110 = vmatprep.subr.mxu0 %v1945_v53  ;;  %v1941_v14 = vadd.f32 %v1909_v31, %v1637_v16  ;;  %v8539_v34 = vmov 0.0   ;;  %v1984_v3 = vld [vmem:[%s7961_s6 + $0x60] sm:$0xff]  ;;  %v1985_v42 = vld [vmem:[%s7961_s6 + $0x68] sm:$0xff]  ;;  %v1986_v28 = vld [vmem:[%s7961_s6 + $0x70] sm:$0xff] }
 0x2d0   : > { %v1943_v60 = vadd.f32 %v8537_v52, %v1655_v21  ;;  %v1940_v27 = vadd.f32 %v1908_v6, %v1628_v4  ;;  %v1987_v29 = vld [vmem:[%s7961_s6 + $0x78] sm:$0xff] }
 0x2d1   : > { %2111 = vmatpush1.msra.mxu0 %v1944_v55  ;;  %v6367_v57 = vpop.permute.xlu1 %2066 }
 0x2d2   : > { %2112 = vmatprep.subr.mxu0 %v1943_v60  ;;  %v6373_v50 = vpop.permute.xlu0 %2061 }
 0x2d3   : > { %2113 = vmatpush1.msra.mxu0 %v1942_v38 }
 0x2d4   : > { %2114 = vmatprep.subr.mxu0 %v1941_v14 }
 0x2d5   : > { %2115 = vmatpush1.msra.mxu0 %v1940_v27  ;;  %v6371_v39 = vpop.permute.xlu1 %2056 }
 0x2d6   : > { %2149 = vmatmul.mubr.f32.vlgmr.msra.gmra.mxu0 %v1972_v51  ;;  %v6377_v7 = vpop.permute.xlu0 %2051 }
 0x2d7   : > { %2154 = vmatprep.mubr.f32.mxu0 %v8539_v34 }
 0x2d9   : > { %v6375_v22 = vpop.permute.xlu1 %2046 }
 0x2da   : > { %2155 = vmatmul.mubr.f32.gmra.mxu0 %v1973_v44  ;;  %v6381_v12 = vpop.permute.xlu0 %2041 }
 0x2db   : > { %2160 = vmatprep.mubr.f32.mxu0 %v8539_v34 }
 0x2dd   : > { %v6379_v32 = vpop.permute.xlu1 %2036 }
 0x2de   : > { %2161 = vmatmul.mubr.f32.gmra.mxu0 %v1974_v20  ;;  %v6383_v59 = vpop.permute.xlu0 %2031 }
 0x2df   : > { %2166 = vmatprep.mubr.f32.mxu0 %v8539_v34 }
 0x2e1   : > { %v2027_v54 = vpop.permute.xlu1 %2026 }
 0x2e2   : > { %2167 = vmatmul.mubr.f32.gmra.mxu0 %v1975_v35  ;;  %v2022_v24 = vpop.permute.xlu0 %2021 }
 0x2e3   : > { %2172 = vmatprep.mubr.f32.mxu0 %v8539_v34 }
 0x2e5   : > { %v2017_v48 = vpop.permute.xlu1 %2016 }
 0x2e6   : > { %2173 = vmatmul.mubr.f32.gmra.mxu0 %v1976_v56  ;;  %v2012_v45 = vpop.permute.xlu0 %2011 }
 0x2e7   : > { %2178 = vmatprep.mubr.f32.mxu0 %v8539_v34 }
 0x2e9   : > { %v2007_v61 = vpop.permute.xlu1 %2006 }
 0x2ea   : > { %2179 = vmatmul.mubr.f32.gmra.mxu0 %v1977_v5 }
 0x2eb   : > { %2184 = vmatprep.mubr.f32.mxu0 %v8539_v34 }
 0x2ee   : > { %2185 = vmatmul.mubr.f32.gmra.mxu0 %v1978_v9 }
 0x2ef   : > { %2190 = vmatprep.mubr.f32.mxu0 %v8539_v34 }
 0x2f2   : > { %2191 = vmatmul.mubr.f32.gmra.mxu0 %v1979_v30 }
 0x2f3   : > { %2196 = vmatprep.mubr.f32.mxu0 %v8539_v34 }
 0x2f6   : > { %2197 = vmatmul.mubr.f32.gmra.mxu0 %v1980_v18 }
 0x2f7   : > { %2202 = vmatprep.mubr.f32.mxu0 %v8539_v34 }
 0x2fa   : > { %2203 = vmatmul.mubr.f32.gmra.mxu0 %v1981_v13 }
 0x2fb   : > { %2208 = vmatprep.mubr.f32.mxu0 %v8539_v34 }
 0x2fe   : > { %2209 = vmatmul.mubr.f32.gmra.mxu0 %v1982_v40 }
 0x2ff   : > { %2214 = vmatprep.mubr.f32.mxu0 %v8539_v34 }
 0x302   : > { %2215 = vmatmul.mubr.f32.gmra.mxu0 %v1983_v46 }
 0x303   : > { %2220 = vmatprep.mubr.f32.mxu0 %v8539_v34 }
 0x306   : > { %2221 = vmatmul.mubr.f32.gmra.mxu0 %v1984_v3 }
 0x307   : > { %2226 = vmatprep.mubr.f32.mxu0 %v8539_v34 }
 0x30a   : > { %2227 = vmatmul.mubr.f32.gmra.mxu0 %v1985_v42 }
 0x30b   : > { %2232 = vmatprep.mubr.f32.mxu0 %v8539_v34 }
 0x30e   : > { %2233 = vmatmul.mubr.f32.gmra.mxu0 %v1986_v28 }
 0x30f   : > { %2238 = vmatprep.mubr.f32.mxu0 %v8539_v34 }
 0x312   : > { %2239 = vmatmul.mubr.f32.gmra.mxu0 %v1987_v29 }
 0x313   : > { %3549 = vmatprep.mubr.f32.mxu0 %v8539_v34 }
 0x396   : > { %v2150_v26 = vpop.f32.mrf.mxu0 }
 0x397   : > { %v6385_v63 = vadd.f32 %v2150_v26, %v2007_v61 }
 0x398   : > { %v2152_v43 = vpop.f32.mrf.mxu0 }
 0x399   : > { %8540 = vst [vmem:[#allocation32_spill] sm:$0xff] %v6385_v63  ;;  %v2245_v17 = vand.u32 2147483647, %v6385_v63  ;;  %v6396_v1 = vadd.f32 %v2152_v43, %v2007_v61 }
 0x39a   : > { %v2156_v0 = vpop.f32.mrf.mxu0 }
 0x39b   : > { %v6387_v10 = vadd.f32 %v2156_v0, %v2012_v45  ;;  %v2277_v47 = vsub.f32 0.0, %v2245_v17  ;;  %8544 = vst [vmem:[#allocation40_spill] sm:$0xff] %v6396_v1  ;;  %v2246_v44 = vand.u32 2147483647, %v6396_v1 }
 0x39c   : > { %v2158_v2 = vpop.f32.mrf.mxu0 }
 0x39d   : > { %8541 = vst [vmem:[#allocation17_spill] sm:$0xff] %v6387_v10  ;;  %v2247_v11 = vand.u32 2147483647, %v6387_v10  ;;  %v2309_v31 = vmul.f32 1.442695, %v2277_v47  ;;  %v6403_v38 = vadd.f32 %v2158_v2, %v2012_v45  ;;  %v2278_v40 = vsub.f32 0.0, %v2246_v44 }
 0x39e   : > { %v2162_v21 = vpop.f32.mrf.mxu0 }
 0x39f   : > { %v6391_v8 = vadd.f32 %v2162_v21, %v2017_v48  ;;  %v2279_v55 = vsub.f32 0.0, %v2247_v11  ;;  %8546 = vst [vmem:[#allocation41_spill] sm:$0xff] %v6403_v38  ;;  %4085 = vpow2.f32 %v2309_v31  ;;  %v2248_v5 = vand.u32 2147483647, %v6403_v38 }
 0x3a0   : > { %v2164_v25 = vpop.f32.mrf.mxu0  ;;  %v2311_v2 = vmul.f32 1.442695, %v2278_v40 }
 0x3a1   : > { %8542 = vst [vmem:[#allocation43_spill] sm:$0xff] %v6391_v8  ;;  %v2249_v4 = vand.u32 2147483647, %v6391_v8  ;;  %v2313_v60 = vmul.f32 1.442695, %v2279_v55  ;;  %v6405_v51 = vadd.f32 %v2164_v25, %v2017_v48  ;;  %v2280_v29 = vsub.f32 0.0, %v2248_v5 }
 0x3a2   : > { %v2168_v36 = vpop.f32.mrf.mxu0 }
 0x3a3   : > { %v6393_v16 = vadd.f32 %v2168_v36, %v2022_v24  ;;  %v2281_v14 = vsub.f32 0.0, %v2249_v4  ;;  %8547 = vst [vmem:[#allocation30_spill] sm:$0xff] %v6405_v51  ;;  %4087 = vpow2.f32 %v2313_v60  ;;  %v2250_v13 = vand.u32 2147483647, %v6405_v51 }
 0x3a4   : > { %v2170_v23 = vpop.f32.mrf.mxu0  ;;  %v2315_v45 = vmul.f32 1.442695, %v2280_v29 }
 0x3a5   : > { %8543 = vst [vmem:[#allocation16_spill] sm:$0xff] %v6393_v16  ;;  %v2251_v15 = vand.u32 2147483647, %v6393_v16  ;;  %v2317_v9 = vmul.f32 1.442695, %v2281_v14  ;;  %v6412_v30 = vadd.f32 %v2170_v23, %v2022_v24  ;;  %v2282_v0 = vsub.f32 0.0, %v2250_v13 }
 0x3a6   : > { %v2174_v41 = vpop.f32.mrf.mxu0 }
 0x3a7   : > { %v6401_v6 = vadd.f32 %v2174_v41, %v2027_v54  ;;  %v2283_v35 = vsub.f32 0.0, %v2251_v15  ;;  %8548 = vst [vmem:[#allocation15_spill] sm:$0xff] %v6412_v30  ;;  %4089 = vpow2.f32 %v2317_v9  ;;  %v2252_v26 = vand.u32 2147483647, %v6412_v30 }
 0x3a8   : > { %v2176_v53 = vpop.f32.mrf.mxu0 }
 0x3a9   : > { %8545 = vst [vmem:[#allocation33_spill] sm:$0xff] %v6401_v6  ;;  %v2253_v56 = vand.u32 2147483647, %v6401_v6  ;;  %v2321_v42 = vmul.f32 1.442695, %v2283_v35  ;;  %v6421_v48 = vadd.f32 %v2176_v53, %v2027_v54  ;;  %v2284_v23 = vsub.f32 0.0, %v2252_v26 }
 0x3aa   : > { %v2180_v62 = vpop.f32.mrf.mxu0  ;;  %v2319_v54 = vmul.f32 1.442695, %v2282_v0 }
 0x3ab   : > { %v6416_v46 = vadd.f32 %v2180_v62, %v6383_v59  ;;  %v2285_v28 = vsub.f32 0.0, %v2253_v56  ;;  %8550 = vst [vmem:[#allocation29_spill] sm:$0xff] %v6421_v48  ;;  %4091 = vpow2.f32 %v2321_v42  ;;  %v2254_v53 = vand.u32 2147483647, %v6421_v48 }
 0x3ac   : > { %v2182_v37 = vpop.f32.mrf.mxu0  ;;  %v6437_v62 = vpop.eup %4085  ;;  %4093 = vpow2.f32 %v2311_v2  ;;  %v2323_v44 = vmul.f32 1.442695, %v2284_v23 }
 0x3ad   : > { %8549 = vst [vmem:[#allocation26_spill] sm:$0xff] %v6416_v46  ;;  %v2255_v24 = vand.u32 2147483647, %v6416_v46  ;;  %v2325_v61 = vmul.f32 1.442695, %v2285_v28  ;;  %8552 = vst [vmem:[#allocation12_spill] sm:$0xff] %v6437_v62  ;;  %v6445_v60 = vadd.f32 %v2182_v37, %v6383_v59 }
 0x3ae   : > { %v2186_v33 = vpop.f32.mrf.mxu0  ;;  %v2373_v5 = vadd.f32 1.0, %v6437_v62  ;;  %v2286_v9 = vsub.f32 0.0, %v2254_v53  ;;  %v2376_v28 = vmul.f32 -0.5, %v6437_v62 }
 0x3af   : > { %v6425_v21 = vadd.f32 %v2186_v33, %v6379_v32  ;;  %v2287_v55 = vsub.f32 0.0, %v2255_v24  ;;  %4095 = vpow2.f32 %v2325_v61  ;;  %8553 = vst [vmem:[#allocation14_spill] sm:$0xff] %v6445_v60  ;;  %v2256_v26 = vand.u32 2147483647, %v6445_v60 }
 0x3b0   : > { %v6398_v52 = vpop.f32.mrf.mxu0  ;;  %v6448_v14 = vpop.eup %4087  ;;  %4097 = vpow2.f32 %v2315_v45 }
 0x3b1   : > { %8551 = vst [vmem:[#allocation27_spill] sm:$0xff] %v6425_v21  ;;  %v2257_v4 = vand.u32 2147483647, %v6425_v21  ;;  %8554 = vst [vmem:[#allocation13_spill] sm:$0xff] %v6448_v14  ;;  %4099 = vpow2.f32 %v2319_v54  ;;  %v2329_v37 = vmul.f32 1.442695, %v2287_v55  ;;  %v6457_v40 = vadd.f32 %v6398_v52, %v6379_v32 }
 0x3b2   : > { %v2192_v27 = vpop.f32.mrf.mxu0  ;;  %v2391_v29 = vadd.f32 1.0, %v6448_v14  ;;  %4101 = vpow2.f32 %v2323_v44  ;;  %v2394_v32 = vmul.f32 -0.5, %v6448_v14  ;;  %v2327_v52 = vmul.f32 1.442695, %v2286_v9 }
 0x3b3   : > { %v6430_v36 = vadd.f32 %v2192_v27, %v6381_v12  ;;  %v2289_v13 = vsub.f32 0.0, %v2257_v4  ;;  %8555 = vst [vmem:[#allocation24_spill] sm:$0xff] %v6457_v40  ;;  %4103 = vlog2.f32 %v2373_v5  ;;  %v2258_v55 = vand.u32 2147483647, %v6457_v40 }
 0x3b4   : > { %v6408_v20 = vpop.f32.mrf.mxu0  ;;  %v6467_v45 = vpop.eup %4089  ;;  %4105 = vpow2.f32 %v2329_v37  ;;  %v2288_v44 = vsub.f32 0.0, %v2256_v26 }
 0x3b5   : > { %v2259_v15 = vand.u32 2147483647, %v6430_v36  ;;  %8556 = vst [vmem:[#allocation21_spill] sm:$0xff] %v6467_v45  ;;  %v2333_v53 = vmul.f32 1.442695, %v2289_v13  ;;  %4107 = vlog2.f32 %v2391_v29  ;;  %v2409_v5 = vadd.f32 1.0, %v6467_v45 }
 0x3b6   : > { %v2198_v18 = vpop.f32.mrf.mxu0  ;;  %v2412_v9 = vmul.f32 -0.5, %v6467_v45  ;;  %4109 = vpow2.f32 %v2327_v52 }
 0x3b7   : > { %v6435_v11 = vadd.f32 %v2198_v18, %v6375_v22  ;;  %v2291_v0 = vsub.f32 0.0, %v2259_v15  ;;  %v6476_v15 = vadd.f32 1.0, %v2376_v28  ;;  %4111 = vpow2.f32 %v2333_v53 }
 0x3b8   : > { %v6418_v3 = vpop.f32.mrf.mxu0  ;;  %v6478_v47 = vpop.eup %4091  ;;  %v2413_v52 = vadd.f32 1.0, %v2412_v9 }
 0x3b9   : > { %v2261_v18 = vand.u32 2147483647, %v6435_v11  ;;  %8557 = vst [vmem:[#allocation11_spill] sm:$0xff] %v6476_v15  ;;  %v2337_v17 = vmul.f32 1.442695, %v2291_v0  ;;  %8558 = vst [vmem:[#allocation10_spill] sm:$0xff] %v6478_v47  ;;  %v6494_v31 = vpop.eup %4093 }
 0x3ba   : > { %v2204_v43 = vpop.f32.mrf.mxu0  ;;  %v2290_v0 = vsub.f32 0.0, %v2258_v55  ;;  %v2427_v13 = vadd.f32 1.0, %v6478_v47  ;;  %v6518_v61 = vmul.f32 %v6467_v45, %v2413_v52 }
 0x3bb   : > { %v2293_v23 = vsub.f32 0.0, %v2261_v18  ;;  %v6474_v4 = vadd.f32 %v2204_v43, %v6377_v7  ;;  %v6484_v18 = vadd.f32 %v6408_v20, %v6381_v12  ;;  %v2395_v43 = vadd.f32 1.0, %v2394_v32 }
 0x3bc   : > { %v6427_v25 = vpop.f32.mrf.mxu0  ;;  %v2430_v12 = vmul.f32 -0.5, %v6478_v47  ;;  %v2331_v20 = vmul.f32 1.442695, %v2288_v44  ;;  %4113 = vpow2.f32 %v2337_v17  ;;  %v6500_v32 = vpop.eup %4095  ;;  %v2335_v9 = vmul.f32 1.442695, %v2290_v0  ;;  %8561 = vst [vmem:[#allocation7_spill] sm:$0xff] %v6518_v61 }
 0x3bd   : > { %8559 = vst [vmem:[#allocation9_spill] sm:$0xff] %v6484_v18  ;;  %v2341_v28 = vmul.f32 1.442695, %v2293_v23  ;;  %v2263_v2 = vand.u32 2147483647, %v6474_v4  ;;  %4115 = vlog2.f32 %v2409_v5  ;;  %v6504_v55 = vpop.eup %4097  ;;  %v6507_v27 = vmul.f32 %v6448_v14, %v2395_v43 }
 0x3be   : > { %v2210_v41 = vpop.f32.mrf.mxu0  ;;  %v2260_v23 = vand.u32 2147483647, %v6484_v18  ;;  %v6511_v44 = vpop.eup %4099  ;;  %v2431_v24 = vadd.f32 1.0, %v2430_v12  ;;  %v2448_v26 = vmul.f32 -0.5, %v6500_v32  ;;  %v2445_v0 = vadd.f32 1.0, %v6500_v32 }
 0x3bf   : > { %v6487_v37 = vadd.f32 %v2210_v41, %v6371_v39  ;;  %8560 = vst [vmem:[#allocation8_spill] sm:$0xff] %v6507_v27  ;;  %4117 = vpow2.f32 %v2341_v28  ;;  %v2295_v59 = vsub.f32 0.0, %v2263_v2  ;;  %v6524_v5 = vpop.eup %4101  ;;  %v6530_v12 = vadd.f32 %v6418_v3, %v6375_v22 }
 0x3c0   : > { %v6441_v33 = vpop.f32.mrf.mxu0  ;;  %4119 = vpow2.f32 %v2331_v20  ;;  %v2292_v17 = vsub.f32 0.0, %v2260_v23  ;;  %v6532_v52 = vpop.eup %4103  ;;  %v2449_v35 = vadd.f32 1.0, %v2448_v26 }
 0x3c1   : > { %v2265_v53 = vand.u32 2147483647, %v6487_v37  ;;  %4121 = vlog2.f32 %v2427_v13  ;;  %8562 = vst [vmem:[#allocation46_spill] sm:$0xff] %v6530_v12  ;;  %8563 = vst [vmem:[#allocation34_spill] sm:$0xff] %v6532_v52  ;;  %v6539_v13 = vmul.f32 %v6478_v47, %v2431_v24 }
 0x3c2   : > { %v2216_v56 = vpop.f32.mrf.mxu0  ;;  %4123 = vpow2.f32 %v2335_v9  ;;  %v2339_v3 = vmul.f32 1.442695, %v2292_v17  ;;  %v6544_v9 = vadd.f32 %v6441_v33, %v6371_v39 }
 0x3c3   : > { %v6498_v41 = vadd.f32 %v2216_v56, %v6373_v50  ;;  %v2297_v28 = vsub.f32 0.0, %v2265_v53  ;;  %v6536_v53 = vpop.eup %4105  ;;  %8564 = vst [vmem:[#allocation31_spill] sm:$0xff] %v6539_v13  ;;  %4125 = vlog2.f32 %v2445_v0 }
 0x3c4   : > { %v6459_v42 = vpop.f32.mrf.mxu0  ;;  %v4108_v22 = vpop.eup %4107  ;;  %8565 = vst [vmem:[#allocation56_spill] sm:$0xff] %v6544_v9  ;;  %v2463_v17 = vadd.f32 1.0, %v6536_v53  ;;  %v2266_v8 = vand.u32 2147483647, %v6544_v9 }
 0x3c5   : > { %v2267_v43 = vand.u32 2147483647, %v6498_v41  ;;  %v6522_v34 = vadd.f32 %v6459_v42, %v6373_v50  ;;  %v2345_v42 = vmul.f32 1.442695, %v2295_v59  ;;  %v2349_v38 = vmul.f32 1.442695, %v2297_v28 }
 0x3c6   : > { %v6470_v54 = vpop.f32.mrf.mxu0  ;;  %v2262_v50 = vand.u32 2147483647, %v6530_v12  ;;  %v2466_v28 = vmul.f32 -0.5, %v6536_v53  ;;  %v6562_v0 = vmul.f32 0.6931472, %v4108_v22  ;;  %v6565_v59 = vmul.f32 %v6500_v32, %v2449_v35 }
 0x3c7   : > { %v2299_v63 = vsub.f32 0.0, %v2267_v43  ;;  %v2268_v23 = vand.u32 2147483647, %v6522_v34  ;;  %v6551_v24 = vadd.f32 %v6470_v54, %v6367_v57  ;;  %v6553_v43 = vpop.eup %4109  ;;  %4127 = vpow2.f32 %v2345_v42 }
 0x3c8   : > { %v6490_v29 = vpop.f32.mrf.mxu0  ;;  %v6560_v33 = vpop.eup %4111  ;;  %8566 = vst [vmem:[#allocation36_spill] sm:$0xff] %v6562_v0  ;;  %8567 = vst [vmem:[#allocation35_spill] sm:$0xff] %v6565_v59  ;;  %4129 = vpow2.f32 %v2349_v38  ;;  %v2294_v51 = vsub.f32 0.0, %v2262_v50 }
 0x3c9   : > { %v2353_v54 = vmul.f32 1.442695, %v2299_v63  ;;  %v6570_v1 = vpop.eup %4113  ;;  %v2300_v42 = vsub.f32 0.0, %v2268_v23  ;;  %4131 = vpow2.f32 %v2339_v3  ;;  %v2269_v35 = vand.u32 2147483647, %v6551_v24 }
 0x3ca   : > { %v2228_v56 = vpop.f32.mrf.mxu0  ;;  %v4116_v10 = vpop.eup %4115  ;;  %4133 = vlog2.f32 %v2463_v17  ;;  %v2499_v23 = vadd.f32 1.0, %v6570_v1  ;;  %v6592_v17 = vadd.f32 %v6427_v25, %v6377_v7  ;;  %v2343_v15 = vmul.f32 1.442695, %v2294_v51 }
 0x3cb   : > { %v6558_v39 = vadd.f32 %v2228_v56, %v6369_v49  ;;  %4135 = vpow2.f32 %v2353_v54  ;;  %v2355_v22 = vmul.f32 1.442695, %v2300_v42  ;;  %v6595_v62 = vmul.f32 0.6931472, %v4116_v10 }
 0x3cc   : > { %v2230_v20 = vpop.f32.mrf.mxu0  ;;  %v6578_v63 = vpop.eup %4117  ;;  %8568 = vst [vmem:[#allocation57_spill] sm:$0xff] %v6592_v17  ;;  %v2301_v16 = vsub.f32 0.0, %v2269_v35  ;;  %v2264_v51 = vand.u32 2147483647, %v6592_v17 }
 0x3cd   : > { %v6568_v2 = vadd.f32 %v2230_v20, %v6369_v49  ;;  %v2467_v49 = vadd.f32 1.0, %v2466_v28  ;;  %v2481_v20 = vadd.f32 1.0, %v6560_v33  ;;  %v2271_v38 = vand.u32 2147483647, %v6558_v39  ;;  %v6588_v3 = vpop.eup %4119  ;;  %8569 = vst [vmem:[#allocation50_spill] sm:$0xff] %v6595_v62 }
 0x3ce   : > { %v2234_v26 = vpop.f32.mrf.mxu0  ;;  %v2298_v28 = vsub.f32 0.0, %v2266_v8  ;;  %v2517_v54 = vadd.f32 1.0, %v6578_v63  ;;  %v2484_v8 = vmul.f32 -0.5, %v6560_v33 }
 0x3cf   : > { %v6574_v56 = vadd.f32 %v2234_v26, %v6363_v58  ;;  %v6585_v26 = vadd.f32 %v6490_v29, %v6367_v57  ;;  %v2272_v50 = vand.u32 2147483647, %v6568_v2  ;;  %v4122_v57 = vpop.eup %4121  ;;  %v6599_v29 = vmul.f32 %v6536_v53, %v2467_v49 }
 0x3d0   : > { %v2236_v27 = vpop.f32.mrf.mxu0  ;;  %4137 = vlog2.f32 %v2481_v20  ;;  %v2303_v30 = vsub.f32 0.0, %v2271_v38  ;;  %v6602_v25 = vpop.eup %4123  ;;  %v2351_v35 = vmul.f32 1.442695, %v2298_v28  ;;  %v2487_v49 = vand.u32 2147483647, %v6560_v33 }
 0x3d1   : > { %v2273_v0 = vand.u32 2147483647, %v6574_v56  ;;  %8570 = vst [vmem:[#allocation68_spill] sm:$0xff] %v6599_v29  ;;  %4139 = vlog2.f32 %v2499_v23  ;;  %v2270_v10 = vand.u32 2147483647, %v6585_v26  ;;  %v2304_v42 = vsub.f32 0.0, %v2272_v50  ;;  %v4126_v14 = vpop.eup %4125 }
 0x3d2   : > { %v2240_v7 = vpop.f32.mrf.mxu0  ;;  %4141 = vpow2.f32 %v2355_v22  ;;  %v2357_v20 = vmul.f32 1.442695, %v2301_v16  ;;  %v6609_v38 = vadd.f32 %v2236_v27, %v6363_v58  ;;  %v6611_v62 = vmul.f32 0.6931472, %v4122_v57 }
 0x3d3   : > { %v2305_v61 = vsub.f32 0.0, %v2273_v0  ;;  %4143 = vlog2.f32 %v2517_v54  ;;  %v2361_v52 = vmul.f32 1.442695, %v2303_v30  ;;  %v2302_v0 = vsub.f32 0.0, %v2270_v10 }
 0x3d4   : > { %8571 = vst [vmem:[#allocation18_spill] sm:$0xff] %v6611_v62  ;;  %4145 = vpow2.f32 %v2343_v15  ;;  %v2242_v50 = vpop.f32.mrf.mxu0  ;;  %v6614_v6 = vpop.eup %4127  ;;  %v2363_v28 = vmul.f32 1.442695, %v2304_v42  ;;  %v2274_v54 = vand.u32 2147483647, %v6609_v38  ;;  %v8573_v58 = vmov 0 }
 0x3d5   : > { %v8572_v16 = vand.u32 2147483647, %v6500_v32  ;;  %v2485_v27 = vadd.f32 1.0, %v2484_v8  ;;  %v2296_v15 = vsub.f32 0.0, %v2264_v51  ;;  %4147 = vpow2.f32 %v2351_v35  ;;  %v6624_v30 = vpop.eup %4129 }
 0x3d6   : > { %v2365_v57 = vmul.f32 1.442695, %v2305_v61  ;;  %4149 = vpow2.f32 %v2357_v20  ;;  %v2306_v23 = vsub.f32 0.0, %v2274_v54  ;;  %v6627_v22 = vadd.f32 %v2240_v7, %v6365_v19  ;;  %v6632_v42 = vpop.eup %4131 }
 0x3d7   : > { %vm6620_vm8 = vcmp.lt.f32.partialorder %v8572_v16, 0.0004427343  ;;  %v6630_v10 = vadd.f32 %v2242_v50, %v6365_v19  ;;  %v2502_v32 = vmul.f32 -0.5, %v6570_v1  ;;  %v2535_v16 = vadd.f32 1.0, %v6614_v6  ;;  %v4134_v61 = vpop.eup %4133 }
 0x3d8   : > { %v8574_v58 = vsel %vm6620_vm8, 4294967295, %v8573_v58  ;;  %4151 = vpow2.f32 %v2361_v52  ;;  %v8576_v51 = vand.u32 2147483647, %v6536_v53  ;;  %v8577_v35 = vmov 0  ;;  %v6644_v50 = vpop.eup %4135 }
 0x3d9   : > { %8575 = vst [vmem:[#allocation38_spill] sm:$0xff] %v8574_v58  ;;  %v2359_v7 = vmul.f32 1.442695, %v2302_v0  ;;  %4153 = vpow2.f32 %v2363_v28  ;;  %v2367_v19 = vmul.f32 1.442695, %v2306_v23  ;;  %v6647_v54 = vmul.f32 %v6560_v33, %v2485_v27 }
 0x3da   : > { %vm6639_vm9 = vcmp.lt.f32.partialorder %v8576_v51, 0.0004427343  ;;  %v2275_v20 = vand.u32 2147483647, %v6627_v22  ;;  %v2553_v8 = vadd.f32 1.0, %v6624_v30  ;;  %4155 = vpow2.f32 %v2365_v57 }
 0x3db   : > { %v8578_v35 = vsel %vm6639_vm9, 4294967295, %v8577_v35  ;;  %8580 = vst [vmem:[#allocation45_spill] sm:$0xff] %v6647_v54  ;;  %v2276_v52 = vand.u32 2147483647, %v6630_v10  ;;  %v6651_v53 = vmul.f32 0.6931472, %v4126_v14  ;;  %4157 = vpow2.f32 %v2367_v19 }
 0x3dc   : > { %8579 = vst [vmem:[#allocation23_spill] sm:$0xff] %v8578_v35  ;;  %v2347_v51 = vmul.f32 1.442695, %v2296_v15  ;;  %v2307_v48 = vsub.f32 0.0, %v2275_v20  ;;  %v2505_v0 = vand.u32 2147483647, %v6570_v1  ;;  %4159 = vlog2.f32 %v2535_v16 }
 0x3dd   : > { %8581 = vst [vmem:[#allocation53_spill] sm:$0xff] %v6651_v53  ;;  %v2520_v23 = vmul.f32 -0.5, %v6578_v63  ;;  %v2308_v28 = vsub.f32 0.0, %v2276_v52  ;;  %v4138_v13 = vpop.eup %4137  ;;  %vm6655_vm10 = vcmp.lt.f32.partialorder %v2487_v49, 0.0004427343  ;;  %v8582_v33 = vmov 0 }
 0x3de   : > { %v8583_v33 = vsel %vm6655_vm10, 4294967295, %v8582_v33  ;;  %v2503_v27 = vadd.f32 1.0, %v2502_v32  ;;  %v2571_v57 = vadd.f32 1.0, %v6644_v50  ;;  %4161 = vpow2.f32 %v2359_v7  ;;  %v4140_v62 = vpop.eup %4139 }
 0x3df   : > { %8584 = vst [vmem:[#allocation70_spill] sm:$0xff] %v8583_v33  ;;  %v2369_v14 = vmul.f32 1.442695, %v2307_v48  ;;  %v6660_v15 = vmul.f32 0.6931472, %v4134_v61  ;;  %4163 = vlog2.f32 %v2553_v8  ;;  %v6663_v60 = vpop.eup %4141  ;;  %v2521_v8 = vadd.f32 1.0, %v2520_v23 }
 0x3e0   : > { %v2371_v20 = vmul.f32 1.442695, %v2308_v28  ;;  %v2523_v32 = vand.u32 2147483647, %v6578_v63  ;;  %4165 = vpow2.f32 %v2347_v51  ;;  %v4144_v48 = vpop.eup %4143  ;;  %vm6671_vm11 = vcmp.lt.f32.partialorder %v2505_v0, 0.0004427343 }
 0x3e1   : > { %8585 = vst [vmem:[#allocation19_spill] sm:$0xff] %v6660_v15  ;;  %v2538_v7 = vmul.f32 -0.5, %v6614_v6  ;;  %4167 = vpow2.f32 %v2369_v14  ;;  %v6676_v52 = vpop.eup %4145  ;;  %v2501_v28 = vmul.f32 0.6931472, %v4140_v62  ;;  %v2504_v19 = vmul.f32 %v6570_v1, %v2503_v27 }
 0x3e2   : > { %v2556_v49 = vmul.f32 -0.5, %v6624_v30  ;;  %4169 = vlog2.f32 %v2571_v57  ;;  %v6684_v0 = vmul.f32 0.6931472, %v4138_v13  ;;  %v2580_v23 = vadd.f32 1.0, %v6663_v60  ;;  %v6687_v16 = vpop.eup %4147 }
 0x3e3   : > { %4171 = vpow2.f32 %v2371_v20  ;;  %v2519_v14 = vmul.f32 0.6931472, %v4144_v48  ;;  %vm6689_vm12 = vcmp.lt.f32.partialorder %v2523_v32, 0.0004427343  ;;  %v2574_v1 = vmul.f32 -0.5, %v6644_v50  ;;  %v6695_v57 = vpop.eup %4149 }
 0x3e4   : > { %8588 = vst [vmem:[#allocation39_spill] sm:$0xff] %v6684_v0  ;;  %v2522_v51 = vmul.f32 %v6578_v63, %v2521_v8  ;;  %v2539_v13 = vadd.f32 1.0, %v2538_v7  ;;  %v2541_v20 = vand.u32 2147483647, %v6614_v6  ;;  %v2507_v32 = vsel %vm6671_vm11, %v2504_v19, %v2501_v28 }
 0x3e5   : > { %v6700_v59 = vpop.eup %4151  ;;  %v2557_v48 = vadd.f32 1.0, %v2556_v49  ;;  %v2559_v58 = vand.u32 2147483647, %v6624_v30  ;;  %4173 = vlog2.f32 %v2580_v23  ;;  %v2575_v49 = vadd.f32 1.0, %v2574_v1 }
 0x3e6   : > { %v6706_v27 = vpop.eup %4153  ;;  %v2525_v19 = vsel %vm6689_vm12, %v2522_v51, %v2519_v14  ;;  %v2589_v61 = vadd.f32 1.0, %v6695_v57  ;;  %v8591_v15 = vmax.f32 %v6430_v36, 0.0  ;;  %v2540_v8 = vmul.f32 %v6614_v6, %v2539_v13 }
 0x3e7   : > { %v6714_v53 = vpop.eup %4155  ;;  %vm6727_vm13 = vcmp.lt.f32.partialorder %v2541_v20, 0.0004427343  ;;  %v2607_v62 = vadd.f32 1.0, %v6700_v59  ;;  %v2558_v14 = vmul.f32 %v6624_v30, %v2557_v48  ;;  %vm6733_vm14 = vcmp.lt.f32.partialorder %v2559_v58, 0.0004427343 }
 0x3e8   : > { %v6720_v46 = vpop.eup %4157  ;;  %v6724_v63 = vadd.f32 %v8591_v15, %v2507_v32  ;;  %v2577_v7 = vand.u32 2147483647, %v6644_v50  ;;  %v2616_v36 = vadd.f32 1.0, %v6706_v27  ;;  %v2583_v15 = vmul.f32 -0.5, %v6663_v60 }
 0x3e9   : > { %v4160_v51 = vpop.eup %4159  ;;  %v8597_v13 = vmax.f32 %v6435_v11, 0.0  ;;  %v2634_v30 = vadd.f32 1.0, %v6720_v46  ;;  %v2562_v58 = vadd.f32 1.0, %v6687_v16  ;;  %v6750_v28 = vmul.f32 %v6644_v50, %v2575_v49 }
 0x3ea   : > { %8592 = vst [vmem:[#allocation28_spill] sm:$0xff] %v6724_v63  ;;  %4175 = vlog2.f32 %v2589_v61  ;;  %v2592_v29 = vmul.f32 -0.5, %v6695_v57  ;;  %v2625_v35 = vadd.f32 1.0, %v6714_v53  ;;  %v2537_v11 = vmul.f32 0.6931472, %v4160_v51 }
 0x3eb   : > { %v6740_v6 = vpop.eup %4161  ;;  %v6744_v20 = vadd.f32 %v8597_v13, %v2525_v19  ;;  %4177 = vlog2.f32 %v2607_v62  ;;  %v2586_v13 = vand.u32 2147483647, %v6663_v60  ;;  %vm6760_vm15 = vcmp.lt.f32.partialorder %v2577_v7, 0.0004427343 }
 0x3ec   : > { %v4164_v48 = vpop.eup %4163  ;;  %4179 = vlog2.f32 %v2616_v36  ;;  %v2598_v49 = vadd.f32 1.0, %v6740_v6  ;;  %v2584_v61 = vadd.f32 1.0, %v2583_v15  ;;  %v2565_v51 = vmul.f32 -0.5, %v6687_v16 }
 0x3ed   : > { %8598 = vst [vmem:[#allocation20_spill] sm:$0xff] %v6744_v20  ;;  %v6754_v63 = vpop.eup %4165  ;;  %v2555_v0 = vmul.f32 0.6931472, %v4164_v48  ;;  %4181 = vlog2.f32 %v2634_v30  ;;  %v2593_v54 = vadd.f32 1.0, %v2592_v29  ;;  %v2610_v7 = vmul.f32 -0.5, %v6700_v59 }
 0x3ee   : > { %v6758_v32 = vpop.eup %4167  ;;  %4183 = vlog2.f32 %v2625_v35  ;;  %v2543_v36 = vsel %vm6727_vm13, %v2540_v8, %v2537_v11  ;;  %v2619_v48 = vmul.f32 -0.5, %v6706_v27  ;;  %v2595_v30 = vand.u32 2147483647, %v6695_v57 }
 0x3ef   : > { %v4170_v21 = vpop.eup %4169  ;;  %v2643_v62 = vadd.f32 1.0, %v6758_v32  ;;  %v2628_v50 = vmul.f32 -0.5, %v6714_v53  ;;  %v6779_v29 = vmul.f32 %v6663_v60, %v2584_v61  ;;  %vm6781_vm1 = vcmp.lt.f32.partialorder %v2586_v13, 0.0004427343 }
 0x3f0   : > { %v6768_v19 = vpop.eup %4171  ;;  %v2561_v8 = vsel %vm6733_vm14, %v2558_v14, %v2555_v0  ;;  %v2573_v23 = vmul.f32 0.6931472, %v4170_v21  ;;  %v2601_v11 = vmul.f32 -0.5, %v6740_v6  ;;  %v8603_v33 = vmax.f32 %v6474_v4, 0.0 }
 0x3f1   : > { %4185 = vlog2.f32 %v2643_v62  ;;  %v2652_v15 = vadd.f32 1.0, %v6768_v19  ;;  %v2613_v60 = vand.u32 2147483647, %v6700_v59  ;;  %v6794_v13 = vmul.f32 %v6695_v57, %v2593_v54 }
 0x3f2   : > { %4187 = vlog2.f32 %v2598_v49  ;;  %v4174_v62 = vpop.eup %4173  ;;  %v6790_v20 = vadd.f32 %v8603_v33, %v2543_v36  ;;  %v2611_v49 = vadd.f32 1.0, %v2610_v7  ;;  %v2620_v61 = vadd.f32 1.0, %v2619_v48 }
 0x3f3   : > { %4189 = vlog2.f32 %v2652_v15  ;;  %v2622_v1 = vand.u32 2147483647, %v6706_v27  ;;  %v2544_v21 = vadd.f32 1.0, %v6754_v63  ;;  %v8605_v0 = vmax.f32 %v6487_v37, 0.0 }
 0x3f4   : > { %8604 = vst [vmem:[#allocation67_spill] sm:$0xff] %v6790_v20  ;;  %4191 = vlog2.f32 %v2562_v58  ;;  %v2629_v15 = vadd.f32 1.0, %v2628_v50  ;;  %v2631_v4 = vand.u32 2147483647, %v6714_v53  ;;  %v2637_v33 = vmul.f32 -0.5, %v6720_v46 }
 0x3f5   : > { %v6800_v14 = vadd.f32 %v8605_v0, %v2561_v8  ;;  %v2579_v58 = vsel %vm6760_vm15, %v6750_v28, %v2573_v23  ;;  %v2602_v54 = vadd.f32 1.0, %v2601_v11  ;;  %v6807_v57 = vmul.f32 0.6931472, %v4174_v62 }
 0x3f6   : > { %v2526_v7 = vadd.f32 1.0, %v6676_v52  ;;  %v6811_v36 = vmul.f32 %v6700_v59, %v2611_v49  ;;  %v2646_v37 = vmul.f32 -0.5, %v6758_v32  ;;  %v2640_v50 = vand.u32 2147483647, %v6720_v46 }
 0x3f7   : > { %8606 = vst [vmem:[#allocation52_spill] sm:$0xff] %v6800_v14  ;;  %v2566_v48 = vadd.f32 1.0, %v2565_v51  ;;  %v4176_v8 = vpop.eup %4175  ;;  %vm6815_vm5 = vcmp.lt.f32.partialorder %v2595_v30, 0.0004427343  ;;  %v2655_v40 = vmul.f32 -0.5, %v6768_v19  ;;  %v6821_v28 = vmul.f32 %v6706_v27, %v2620_v61 }
 0x3f8   : > { %4193 = vlog2.f32 %v2544_v21  ;;  %v2508_v23 = vadd.f32 1.0, %v6632_v42  ;;  %v4178_v59 = vpop.eup %4177  ;;  %v8609_v11 = vmax.f32 %v6498_v41, 0.0  ;;  %v6829_v51 = vmul.f32 %v6714_v53, %v2629_v15 }
 0x3f9   : > { %v2638_v30 = vadd.f32 1.0, %v2637_v33  ;;  %v2604_v49 = vand.u32 2147483647, %v6740_v6  ;;  %v4180_v18 = vpop.eup %4179  ;;  %vm6832_vm4 = vcmp.lt.f32.partialorder %v2613_v60, 0.0004427343  ;;  %v6841_v61 = vmul.f32 %v6740_v6, %v2602_v54 }
 0x3fa   : > { %v6826_v62 = vadd.f32 %v8609_v11, %v2579_v58  ;;  %vm6836_vm3 = vcmp.lt.f32.partialorder %v2631_v4, 0.0004427343  ;;  %4195 = vlog2.f32 %v2526_v7  ;;  %v2490_v53 = vadd.f32 1.0, %v6602_v25  ;;  %v4182_v21 = vpop.eup %4181 }
 0x3fb   : > { %v2647_v60 = vadd.f32 1.0, %v2646_v37  ;;  %v2649_v15 = vand.u32 2147483647, %v6758_v32  ;;  %vm6849_vm2 = vcmp.lt.f32.partialorder %v2640_v50, 0.0004427343  ;;  %v6858_v6 = vmul.f32 %v6687_v16, %v2566_v48  ;;  %v4184_v58 = vpop.eup %4183 }
 0x3fc   : > { %8610 = vst [vmem:[#allocation59_spill] sm:$0xff] %v6826_v62  ;;  %vm6853_vm6 = vcmp.lt.f32.partialorder %v2622_v1, 0.0004427343  ;;  %v2591_v54 = vmul.f32 0.6931472, %v4176_v8  ;;  %v2656_v7 = vadd.f32 1.0, %v2655_v40  ;;  %4197 = vlog2.f32 %v2508_v23 }
 0x3fd   : > { %v2472_v11 = vadd.f32 1.0, %v6588_v3  ;;  %v2609_v41 = vmul.f32 0.6931472, %v4178_v59  ;;  %v2658_v50 = vand.u32 2147483647, %v6768_v19  ;;  %v2639_v45 = vmul.f32 %v6720_v46, %v2638_v30 }
 0x3fe   : > { %v4186_v37 = vpop.eup %4185  ;;  %vm6863_vm7 = vcmp.lt.f32.partialorder %v2604_v49, 0.0004427343  ;;  %v2547_v12 = vmul.f32 -0.5, %v6754_v63  ;;  %v2636_v47 = vmul.f32 0.6931472, %v4182_v21  ;;  %4199 = vlog2.f32 %v2490_v53 }
 0x3ff   : > { %v4188_v48 = vpop.eup %4187  ;;  %v2645_v14 = vmul.f32 0.6931472, %v4186_v37  ;;  %v2454_v8 = vadd.f32 1.0, %v6553_v43  ;;  %v2627_v23 = vmul.f32 0.6931472, %v4184_v58  ;;  %v2648_v59 = vmul.f32 %v6758_v32, %v2647_v60 }
 0x400   : > { %v4190_v40 = vpop.eup %4189  ;;  %vm6870_vm11 = vcmp.lt.f32.partialorder %v2649_v15, 0.0004427343  ;;  %v2618_v46 = vmul.f32 0.6931472, %v4180_v18  ;;  %v2657_v62 = vmul.f32 %v6768_v19, %v2656_v7  ;;  %v8623_v9 = vand.u32 2147483647, %v6687_v16 }
 0x401   : > { %v4192_v30 = vpop.eup %4191  ;;  %v2654_v49 = vmul.f32 0.6931472, %v4190_v40  ;;  %4201 = vlog2.f32 %v2472_v11  ;;  %v2436_v53 = vadd.f32 1.0, %v6524_v5  ;;  %v2597_v32 = vsel %vm6815_vm5, %v6794_v13, %v2591_v54 }
 0x402   : > { %vm6877_vm12 = vcmp.lt.f32.partialorder %v8623_v9, 0.0004427343  ;;  %v2651_v18 = vsel %vm6870_vm11, %v2648_v59, %v2645_v14  ;;  %vm2659_vm13 = vcmp.lt.f32.partialorder %v2658_v50, 0.0004427343  ;;  %v2529_v60 = vmul.f32 -0.5, %v6676_v52 }
 0x403   : > { %v2660_v19 = vsel %vm2659_vm13, %v2657_v62, %v2654_v49  ;;  %v2642_v9 = vsel %vm6849_vm2, %v2639_v45, %v2636_v47  ;;  %v2600_v16 = vmul.f32 0.6931472, %v4188_v48  ;;  %4203 = vlog2.f32 %v2454_v8 }
 0x404   : > { %v2615_v15 = vsel %vm6832_vm4, %v6811_v36, %v2609_v41  ;;  %v2633_v13 = vsel %vm6836_vm3, %v6829_v51, %v2627_v23  ;;  %v8626_v17 = vmax.f32 %v6630_v10, 0.0  ;;  %v2418_v0 = vadd.f32 1.0, %v6511_v44 }
 0x405   : > { %v8627_v62 = vmax.f32 %v6627_v22, 0.0  ;;  %v2624_v47 = vsel %vm6853_vm6, %v6821_v28, %v2618_v46  ;;  %4205 = vlog2.f32 %v2436_v53  ;;  %v2400_v45 = vadd.f32 1.0, %v6504_v55  ;;  %v4194_v20 = vpop.eup %4193 }
 0x406   : > { %v2724_v14 = vadd.f32 %v8626_v17, %v2660_v19  ;;  %v8628_v36 = vmax.f32 %v6609_v38, 0.0  ;;  %v2564_v27 = vmul.f32 0.6931472, %v4192_v30  ;;  %v2548_v10 = vadd.f32 1.0, %v2547_v12  ;;  %v8642_v17 = vld [vmem:[#allocation59_spill] sm:$0xff] }
 0x407   : > { %v2723_v58 = vadd.f32 %v8627_v62, %v2651_v18  ;;  %v2550_v41 = vand.u32 2147483647, %v6754_v63  ;;  %v8629_v4 = vmax.f32 %v6574_v56, 0.0  ;;  %v2606_v28 = vsel %vm6863_vm7, %v6841_v61, %v2600_v16  ;;  %v4196_v54 = vpop.eup %4195 }
 0x408   : > { %2837 = vmatprep.subr.mxu1 %v2724_v14  ;;  %v2722_v51 = vadd.f32 %v8628_v36, %v2642_v9  ;;  %v2511_v33 = vmul.f32 -0.5, %v6632_v42  ;;  %4207 = vlog2.f32 %v2418_v0  ;;  %v8630_v7 = vmax.f32 %v6551_v24, 0.0 }
 0x409   : > { %v2721_v22 = vadd.f32 %v8629_v4, %v2633_v13  ;;  %2838 = vmatpush1.msra.mxu1 %v2723_v58  ;;  %v8631_v11 = vmax.f32 %v6558_v39, 0.0  ;;  %v8632_v37 = vmax.f32 %v6568_v2, 0.0  ;;  %v2382_v50 = vadd.f32 1.0, %v6494_v31  ;;  %v4198_v8 = vpop.eup %4197 }
 0x40a   : > { %v2717_v38 = vadd.f32 %v8630_v7, %v2597_v32  ;;  %2839 = vmatprep.subr.mxu1 %v2722_v51  ;;  %v2546_v48 = vmul.f32 0.6931472, %v4194_v20  ;;  %v2530_v1 = vadd.f32 1.0, %v2529_v60  ;;  %v2493_v61 = vmul.f32 -0.5, %v6602_v25 }
 0x40b   : > { %v2719_v12 = vadd.f32 %v8631_v11, %v2615_v15  ;;  %v2720_v56 = vadd.f32 %v8632_v37, %v2624_v47  ;;  %2840 = vmatpush1.msra.mxu1 %v2721_v22  ;;  %4209 = vlog2.f32 %v2400_v45  ;;  %v8633_v24 = vmax.f32 %v6585_v26, 0.0  ;;  %v4200_v49 = vpop.eup %4199  ;;  %v8643_v47 = vld [vmem:[#allocation57_spill] sm:$0xff] }
 0x40c   : > { %v2570_v39 = vsel %vm6877_vm12, %v6858_v6, %v2564_v27  ;;  %v2532_v2 = vand.u32 2147483647, %v6676_v52  ;;  %v2475_v23 = vmul.f32 -0.5, %v6588_v3  ;;  %v2549_v59 = vmul.f32 %v6754_v63, %v2548_v10  ;;  %v8647_v10 = vld [vmem:[#allocation10_spill] sm:$0xff] }
 0x40d   : > { %2841 = vmatprep.subr.mxu1 %v2720_v56  ;;  %v2718_v40 = vadd.f32 %v8633_v24, %v2606_v28  ;;  %v2528_v46 = vmul.f32 0.6931472, %v4196_v54  ;;  %v2512_v30 = vadd.f32 1.0, %v2511_v33  ;;  %4211 = vlog2.f32 %v2382_v50 }
 0x40e   : > { %2842 = vmatpush1.msra.mxu1 %v2719_v12  ;;  %v8634_v26 = vsel %vm6781_vm1, %v6779_v29, %v6807_v57  ;;  %v8635_v21 = vmax.f32 %v6522_v34, 0.0  ;;  %vm6937_vm14 = vcmp.lt.f32.partialorder %v2550_v41, 0.0004427343  ;;  %v2514_v32 = vand.u32 2147483647, %v6632_v42  ;;  %v4202_v29 = vpop.eup %4201  ;;  %v8638_v34 = vld [vmem:[#allocation56_spill] sm:$0xff] }
 0x40f   : > { %2843 = vmatprep.subr.mxu1 %v2718_v40  ;;  %v2457_v63 = vmul.f32 -0.5, %v6553_v43  ;;  %v2552_v18 = vsel %vm6937_vm14, %v2549_v59, %v2546_v48  ;;  %v2531_v35 = vmul.f32 %v6676_v52, %v2530_v1  ;;  %v2510_v60 = vmul.f32 0.6931472, %v4198_v8  ;;  %v8656_v48 = vld [vmem:[#allocation21_spill] sm:$0xff] }
 0x410   : > { %v2716_v6 = vadd.f32 %v8635_v21, %v8634_v26  ;;  %2844 = vmatpush1.msra.mxu1 %v2717_v38  ;;  %v2494_v19 = vadd.f32 1.0, %v2493_v61  ;;  %v8639_v57 = vmax.f32 %v8638_v34, 0.0  ;;  %vm6948_vm15 = vcmp.lt.f32.partialorder %v2532_v2, 0.0004427343  ;;  %v4204_v58 = vpop.eup %4203  ;;  %v8652_v38 = vld [vmem:[#allocation46_spill] sm:$0xff]  ;;  %v8660_v61 = vld [vmem:[#allocation67_spill] sm:$0xff] }
 0x411   : > { %v2496_v15 = vand.u32 2147483647, %v6602_v25  ;;  %v2476_v13 = vadd.f32 1.0, %v2475_v23  ;;  %v2534_v14 = vsel %vm6948_vm15, %v2531_v35, %v2528_v46  ;;  %v2513_v52 = vmul.f32 %v6632_v42, %v2512_v30  ;;  %v8651_v42 = vld [vmem:[#allocation52_spill] sm:$0xff]  ;;  %v8667_v35 = vld [vmem:[#allocation45_spill] sm:$0xff]  ;;  %v8699_v46 = vld [vmem:[#allocation34_spill] sm:$0xff] }
 0x412   : > { %2845 = vmatprep.subr.mxu1 %v2716_v6  ;;  %v2714_v9 = vadd.f32 %v8639_v57, %v2570_v39  ;;  %v2492_v0 = vmul.f32 0.6931472, %v4200_v49  ;;  %v2439_v62 = vmul.f32 -0.5, %v6524_v5  ;;  %v8644_v45 = vmax.f32 %v8643_v47, 0.0  ;;  %v4206_v7 = vpop.eup %4205  ;;  %v8665_v26 = vld [vmem:[#allocation20_spill] sm:$0xff]  ;;  %v8720_v47 = vld [vmem:[#allocation43_spill] sm:$0xff] }
 0x413   : > { %2846 = vmatpush1.msra.mxu1 %v8642_v17  ;;  %vm6960_vm1 = vcmp.lt.f32.partialorder %v2514_v32, 0.0004427343  ;;  %v2478_v51 = vand.u32 2147483647, %v6588_v3  ;;  %v2458_v27 = vadd.f32 1.0, %v2457_v63  ;;  %v2495_v28 = vmul.f32 %v6602_v25, %v2494_v19  ;;  %v8672_v57 = vld [vmem:[#allocation24_spill] sm:$0xff] }
 0x414   : > { %2847 = vmatprep.subr.mxu1 %v2714_v9  ;;  %v2712_v20 = vadd.f32 %v8644_v45, %v2552_v18  ;;  %v8648_v41 = vand.u32 2147483647, %v8647_v10  ;;  %v2516_v22 = vsel %vm6960_vm1, %v2513_v52, %v2510_v60  ;;  %v2474_v33 = vmul.f32 0.6931472, %v4202_v29  ;;  %v8668_v60 = vld [vmem:[#allocation39_spill] sm:$0xff]  ;;  %v8676_v17 = vld [vmem:[#allocation28_spill] sm:$0xff] }
 0x415   : > { %2848 = vmatpush1.msra.mxu1 %v8651_v42  ;;  %v2421_v54 = vmul.f32 -0.5, %v6511_v44  ;;  %v8653_v11 = vmax.f32 %v8652_v38, 0.0  ;;  %vm6978_vm4 = vcmp.lt.f32.partialorder %v2496_v15, 0.0004427343  ;;  %v2477_v56 = vmul.f32 %v6588_v3, %v2476_v13  ;;  %v4208_v2 = vpop.eup %4207  ;;  %v8661_v3 = vld [vmem:[#allocation9_spill] sm:$0xff]  ;;  %v8670_v29 = vld [vmem:[#allocation27_spill] sm:$0xff] }
 0x416   : > { %vm6967_vm5 = vcmp.lt.f32.partialorder %v8648_v41, 0.0004427343  ;;  %2849 = vmatprep.subr.mxu1 %v2712_v20  ;;  %v2460_v50 = vand.u32 2147483647, %v6553_v43  ;;  %v8657_v1 = vand.u32 2147483647, %v8656_v48  ;;  %v2498_v8 = vsel %vm6978_vm4, %v2495_v28, %v2492_v0 }
 0x417   : > { %v2710_v12 = vadd.f32 %v8653_v11, %v2534_v14  ;;  %2850 = vmatpush1.msra.mxu1 %v8660_v61  ;;  %v2456_v24 = vmul.f32 0.6931472, %v4204_v58  ;;  %v2440_v40 = vadd.f32 1.0, %v2439_v62  ;;  %v2403_v39 = vmul.f32 -0.5, %v6504_v55  ;;  %v8678_v45 = vld [vmem:[#allocation68_spill] sm:$0xff]  ;;  %v8679_v20 = vld [vmem:[#allocation19_spill] sm:$0xff] }
 0x418   : > { %vm6986_vm3 = vcmp.lt.f32.partialorder %v8657_v1, 0.0004427343  ;;  %v8662_v23 = vmax.f32 %v8661_v3, 0.0  ;;  %vm6996_vm2 = vcmp.lt.f32.partialorder %v2478_v51, 0.0004427343  ;;  %v2459_v30 = vmul.f32 %v6553_v43, %v2458_v27  ;;  %v4210_v63 = vpop.eup %4209  ;;  %v8681_v51 = vld [vmem:[#allocation26_spill] sm:$0xff] }
 0x419   : > { %2851 = vmatprep.subr.mxu1 %v2710_v12  ;;  %v2442_v49 = vand.u32 2147483647, %v6524_v5  ;;  %v2480_v21 = vsel %vm6996_vm2, %v2477_v56, %v2474_v33  ;;  %v2438_v6 = vmul.f32 0.6931472, %v4206_v7  ;;  %v2422_v53 = vadd.f32 1.0, %v2421_v54  ;;  %v8683_v41 = vld [vmem:[#allocation14_spill] sm:$0xff] }
 0x41a   : > { %v2708_v59 = vadd.f32 %v8662_v23, %v2516_v22  ;;  %2852 = vmatpush1.msra.mxu1 %v8665_v26  ;;  %v2385_v32 = vmul.f32 -0.5, %v6494_v31  ;;  %v8669_v19 = vsel %vm6655_vm10, %v8667_v35, %v8668_v60  ;;  %v8671_v34 = vmax.f32 %v8670_v29, 0.0  ;;  %v4212_v58 = vpop.eup %4211  ;;  %v8687_v11 = vld [vmem:[#allocation18_spill] sm:$0xff]  ;;  %v8688_v12 = vld [vmem:[#allocation31_spill] sm:$0xff]  ;;  %v8689_v56 = vld [vmem:[#allocation29_spill] sm:$0xff] }
 0x41b   : > { %v8673_v9 = vmax.f32 %v8672_v57, 0.0  ;;  %vm7015_vm6 = vcmp.lt.f32.partialorder %v2460_v50, 0.0004427343  ;;  %v2424_v13 = vand.u32 2147483647, %v6511_v44  ;;  %v2441_v52 = vmul.f32 %v6524_v5, %v2440_v40  ;;  %v8701_v26 = vld [vmem:[#allocation7_spill] sm:$0xff] }
 0x41c   : > { %v2705_v43 = vadd.f32 %v8671_v34, %v8669_v19  ;;  %2853 = vmatprep.subr.mxu1 %v2708_v59  ;;  %v2462_v14 = vsel %vm7015_vm6, %v2459_v30, %v2456_v24  ;;  %v2420_v0 = vmul.f32 0.6931472, %v4208_v2  ;;  %v2404_v62 = vadd.f32 1.0, %v2403_v39  ;;  %v8695_v24 = vld [vmem:[#allocation53_spill] sm:$0xff]  ;;  %v8710_v60 = vld [vmem:[#allocation16_spill] sm:$0xff]  ;;  %v2732_v1 = vld [vmem:[%s7963_s8 + $0x38] sm:$0xff] }
 0x41d   : > { %v2706_v16 = vadd.f32 %v8673_v9, %v2498_v8  ;;  %2854 = vmatpush1.msra.mxu1 %v8676_v17  ;;  %v8680_v36 = vsel %vm6639_vm9, %v8678_v45, %v8679_v20  ;;  %v8682_v27 = vmax.f32 %v8681_v51, 0.0  ;;  %v8684_v42 = vmax.f32 %v8683_v41, 0.0  ;;  %v8697_v39 = vld [vmem:[#allocation33_spill] sm:$0xff]  ;;  %v8713_v57 = vld [vmem:[#allocation12_spill] sm:$0xff]  ;;  %v8716_v17 = vld [vmem:[#allocation30_spill] sm:$0xff] }
 0x41e   : > { %vm7033_vm10 = vcmp.lt.f32.partialorder %v2442_v49, 0.0004427343  ;;  %v2406_v5 = vand.u32 2147483647, %v6504_v55  ;;  %v2423_v54 = vmul.f32 %v6511_v44, %v2422_v53  ;;  %v2402_v7 = vmul.f32 0.6931472, %v4210_v63 }
 0x41f   : > { %v2703_v10 = vadd.f32 %v8682_v27, %v8680_v36  ;;  %2855 = vmatprep.subr.mxu1 %v2706_v16  ;;  %v2704_v22 = vadd.f32 %v8684_v42, %v2480_v21  ;;  %v2444_v33 = vsel %vm7033_vm10, %v2441_v52, %v2438_v6  ;;  %v2386_v38 = vadd.f32 1.0, %v2385_v32  ;;  %v8694_v44 = vld [vmem:[#allocation35_spill] sm:$0xff]  ;;  %v8700_v49 = vld [vmem:[#allocation50_spill] sm:$0xff]  ;;  %v8706_v18 = vld [vmem:[#allocation13_spill] sm:$0xff] }
 0x420   : > { %2856 = vmatpush1.msra.mxu1 %v2705_v43  ;;  %v2435_v37 = vsel %vm6967_vm5, %v8688_v12, %v8687_v11  ;;  %v8690_v50 = vmax.f32 %v8689_v56, 0.0  ;;  %vm7047_vm9 = vcmp.lt.f32.partialorder %v2424_v13, 0.0004427343  ;;  %v2388_v61 = vand.u32 2147483647, %v6494_v31  ;;  %v8702_v6 = vld [vmem:[#allocation15_spill] sm:$0xff] }
 0x421   : > { %2857 = vmatprep.subr.mxu1 %v2704_v22  ;;  %v8696_v40 = vsel %vm6620_vm8, %v8694_v44, %v8695_v24  ;;  %v8698_v2 = vmax.f32 %v8697_v39, 0.0  ;;  %v2426_v4 = vsel %vm7047_vm9, %v2423_v54, %v2420_v0  ;;  %v2405_v23 = vmul.f32 %v6504_v55, %v2404_v62  ;;  %v8712_v43 = vld [vmem:[#allocation11_spill] sm:$0xff]  ;;  %v8714_v16 = vld [vmem:[#allocation36_spill] sm:$0xff]  ;;  %v8719_v62 = vld [vmem:[#allocation17_spill] sm:$0xff] }
 0x422   : > { %v2702_v48 = vadd.f32 %v8690_v50, %v2462_v14  ;;  %2858 = vmatpush1.msra.mxu1 %v2703_v10  ;;  %v2384_v59 = vmul.f32 0.6931472, %v4212_v58  ;;  %v2375_v30 = vmul.f32 0.6931472, %v8699_v46  ;;  %v2417_v21 = vsel %vm6986_vm3, %v8701_v26, %v8700_v49  ;;  %v8715_v15 = vld [vmem:[#allocation8_spill] sm:$0xff]  ;;  %v8723_v10 = vld [vmem:[#allocation41_spill] sm:$0xff] }
 0x423   : > { %v2701_v3 = vadd.f32 %v8698_v2, %v8696_v40  ;;  %v8703_v53 = vmax.f32 %v8702_v6, 0.0  ;;  %vm7069_vm8 = vcmp.lt.f32.partialorder %v2406_v5, 0.0004427343  ;;  %v8707_v35 = vand.u32 2147483647, %v8706_v18  ;;  %v8722_v51 = vld [vmem:[#allocation40_spill] sm:$0xff] }
 0x424   : > { %2859 = vmatprep.subr.mxu1 %v2702_v48  ;;  %v8711_v19 = vmax.f32 %v8710_v60, 0.0  ;;  %v2408_v25 = vsel %vm7069_vm8, %v2405_v23, %v2402_v7  ;;  %v2387_v34 = vmul.f32 %v6494_v31, %v2386_v38  ;;  %v2378_v9 = vmul.f32 %v8713_v57, %v8712_v43  ;;  %v8725_v22 = vld [vmem:[#allocation32_spill] sm:$0xff]  ;;  %v2725_v7 = vld [vmem:[%s7963_s8] sm:$0xff]  ;;  %v2727_v12 = vld [vmem:[%s7963_s8 + $0x10] sm:$0xff]  ;;  %v7166_v23 = vpop.permute.xlu0 %2834 }
 0x425   : > { %v2700_v32 = vadd.f32 %v8703_v53, %v2444_v33  ;;  %vm7075_vm7 = vcmp.lt.f32.partialorder %v8707_v35, 0.0004427343  ;;  %2860 = vmatpush1.msra.mxu1 %v2701_v3  ;;  %v8717_v14 = vmax.f32 %v8716_v17, 0.0  ;;  %vm2389_vm11 = vcmp.lt.f32.partialorder %v2388_v61, 0.0004427343  ;;  %v2726_v11 = vld [vmem:[%s7963_s8 + $0x8] sm:$0xff] }
 0x426   : > { %v2699_v29 = vadd.f32 %v8711_v19, %v2435_v37  ;;  %v2399_v13 = vsel %vm7075_vm7, %v8715_v15, %v8714_v16  ;;  %v8718_v0 = vand.u32 2147483647, %v8713_v57  ;;  %v2663_v58 = vmax.f32 %v8719_v62, 0.0  ;;  %v2728_v37 = vld [vmem:[%s7963_s8 + $0x18] sm:$0xff]  ;;  %v2729_v56 = vld [vmem:[%s7963_s8 + $0x20] sm:$0xff]  ;;  %v2730_v50 = vld [vmem:[%s7963_s8 + $0x28] sm:$0xff] }
 0x427   : > { %2861 = vmatprep.subr.mxu1 %v2700_v32  ;;  %v2698_v52 = vadd.f32 %v8717_v14, %v2426_v4  ;;  %v8721_v31 = vmax.f32 %v8720_v47, 0.0  ;;  %v2390_v20 = vsel %vm2389_vm11, %v2387_v34, %v2384_v59  ;;  %v2662_v27 = vmax.f32 %v8722_v51, 0.0  ;;  %v2731_v48 = vld [vmem:[%s7963_s8 + $0x30] sm:$0xff]  ;;  %v2733_v61 = vld [vmem:[%s7963_s8 + $0x40] sm:$0xff]  ;;  %v2734_v8 = vld [vmem:[%s7963_s8 + $0x48] sm:$0xff]  ;;  %v7164_v4 = vpop.permute.xlu1 %2829 }
 0x428   : > { %vm2380_vm12 = vcmp.lt.f32.partialorder %v8718_v0, 0.0004427343  ;;  %2862 = vmatpush1.msra.mxu1 %v2699_v29  ;;  %v8724_v41 = vmax.f32 %v8723_v10, 0.0  ;;  %v2661_v28 = vmax.f32 %v8725_v22, 0.0  ;;  %v2695_v5 = vadd.f32 %v2663_v58, %v2399_v13  ;;  %v2735_v44 = vld [vmem:[%s7963_s8 + $0x50] sm:$0xff]  ;;  %v2736_v24 = vld [vmem:[%s7963_s8 + $0x58] sm:$0xff]  ;;  %v7170_v46 = vpop.permute.xlu0 %2824 }
 0x429   : > { %v2697_v45 = vadd.f32 %v8721_v31, %v2417_v21  ;;  %v2381_v36 = vsel %vm2380_vm12, %v2378_v9, %v2375_v30  ;;  %2863 = vmatprep.subr.mxu1 %v2698_v52  ;;  %v2694_v33 = vadd.f32 %v2662_v27, %v2390_v20  ;;  %v8726_v38 = vmov 0.0   ;;  %v2737_v40 = vld [vmem:[%s7963_s8 + $0x60] sm:$0xff]  ;;  %v2738_v39 = vld [vmem:[%s7963_s8 + $0x68] sm:$0xff]  ;;  %v2739_v2 = vld [vmem:[%s7963_s8 + $0x70] sm:$0xff] }
 0x42a   : > { %v2696_v42 = vadd.f32 %v8724_v41, %v2408_v25  ;;  %v2693_v54 = vadd.f32 %v2661_v28, %v2381_v36  ;;  %v2740_v3 = vld [vmem:[%s7963_s8 + $0x78] sm:$0xff] }
 0x42b   : > { %2864 = vmatpush1.msra.mxu1 %v2697_v45  ;;  %v7168_v59 = vpop.permute.xlu1 %2819 }
 0x42c   : > { %2865 = vmatprep.subr.mxu1 %v2696_v42  ;;  %v7174_v49 = vpop.permute.xlu0 %2814 }
 0x42d   : > { %2866 = vmatpush1.msra.mxu1 %v2695_v5 }
 0x42e   : > { %2867 = vmatprep.subr.mxu1 %v2694_v33 }
 0x42f   : > { %2868 = vmatpush1.msra.mxu1 %v2693_v54  ;;  %v7172_v30 = vpop.permute.xlu1 %2809 }
 0x430   : > { %2902 = vmatmul.mubr.f32.vlgmr.msra.gmra.mxu1 %v2725_v7  ;;  %v7178_v21 = vpop.permute.xlu0 %2804 }
 0x431   : > { %2907 = vmatprep.mubr.f32.mxu1 %v8726_v38 }
 0x433   : > { %v7176_v26 = vpop.permute.xlu1 %2799 }
 0x434   : > { %2908 = vmatmul.mubr.f32.gmra.mxu1 %v2726_v11  ;;  %v7182_v53 = vpop.permute.xlu0 %2794 }
 0x435   : > { %2913 = vmatprep.mubr.f32.mxu1 %v8726_v38 }
 0x437   : > { %v7180_v6 = vpop.permute.xlu1 %2789 }
 0x438   : > { %2914 = vmatmul.mubr.f32.gmra.mxu1 %v2727_v12  ;;  %v7184_v18 = vpop.permute.xlu0 %2784 }
 0x439   : > { %2919 = vmatprep.mubr.f32.mxu1 %v8726_v38 }
 0x43b   : > { %v2780_v32 = vpop.permute.xlu1 %2779 }
 0x43c   : > { %2920 = vmatmul.mubr.f32.gmra.mxu1 %v2728_v37  ;;  %v2775_v29 = vpop.permute.xlu0 %2774 }
 0x43d   : > { %2925 = vmatprep.mubr.f32.mxu1 %v8726_v38 }
 0x43f   : > { %v2770_v60 = vpop.permute.xlu1 %2769 }
 0x440   : > { %2926 = vmatmul.mubr.f32.gmra.mxu1 %v2729_v56  ;;  %v2765_v16 = vpop.permute.xlu0 %2764 }
 0x441   : > { %2931 = vmatprep.mubr.f32.mxu1 %v8726_v38 }
 0x443   : > { %v2760_v43 = vpop.permute.xlu1 %2759 }
 0x444   : > { %2932 = vmatmul.mubr.f32.gmra.mxu1 %v2730_v50 }
 0x445   : > { %2937 = vmatprep.mubr.f32.mxu1 %v8726_v38 }
 0x448   : > { %2938 = vmatmul.mubr.f32.gmra.mxu1 %v2731_v48 }
 0x449   : > { %2943 = vmatprep.mubr.f32.mxu1 %v8726_v38 }
 0x44c   : > { %2944 = vmatmul.mubr.f32.gmra.mxu1 %v2732_v1 }
 0x44d   : > { %2949 = vmatprep.mubr.f32.mxu1 %v8726_v38 }
 0x450   : > { %2950 = vmatmul.mubr.f32.gmra.mxu1 %v2733_v61 }
 0x451   : > { %2955 = vmatprep.mubr.f32.mxu1 %v8726_v38 }
 0x454   : > { %2956 = vmatmul.mubr.f32.gmra.mxu1 %v2734_v8 }
 0x455   : > { %2961 = vmatprep.mubr.f32.mxu1 %v8726_v38 }
 0x458   : > { %2962 = vmatmul.mubr.f32.gmra.mxu1 %v2735_v44 }
 0x459   : > { %2967 = vmatprep.mubr.f32.mxu1 %v8726_v38 }
 0x45c   : > { %2968 = vmatmul.mubr.f32.gmra.mxu1 %v2736_v24 }
 0x45d   : > { %2973 = vmatprep.mubr.f32.mxu1 %v8726_v38 }
 0x460   : > { %2974 = vmatmul.mubr.f32.gmra.mxu1 %v2737_v40 }
 0x461   : > { %2979 = vmatprep.mubr.f32.mxu1 %v8726_v38 }
 0x464   : > { %2980 = vmatmul.mubr.f32.gmra.mxu1 %v2738_v39 }
 0x465   : > { %2985 = vmatprep.mubr.f32.mxu1 %v8726_v38 }
 0x468   : > { %2986 = vmatmul.mubr.f32.gmra.mxu1 %v2739_v2 }
 0x469   : > { %2991 = vmatprep.mubr.f32.mxu1 %v8726_v38 }
 0x46c   : > { %2992 = vmatmul.mubr.f32.gmra.mxu1 %v2740_v3 }
 0x4f0   : > { %v2903_v63 = vpop.f32.mrf.mxu1 }
 0x4f1   : > { %v7186_v9 = vadd.f32 %v2903_v63, %v2760_v43 }
 0x4f2   : > { %v2905_v35 = vpop.f32.mrf.mxu1 }
 0x4f3   : > { %8727 = vst [vmem:[#allocation47_spill] sm:$0xff] %v7186_v9  ;;  %v2998_v14 = vand.u32 2147483647, %v7186_v9  ;;  %v7197_v10 = vadd.f32 %v2905_v35, %v2760_v43 }
 0x4f4   : > { %v2909_v55 = vpop.f32.mrf.mxu1 }
 0x4f5   : > { %v7188_v13 = vadd.f32 %v2909_v55, %v2765_v16  ;;  %v3030_v47 = vsub.f32 0.0, %v2998_v14  ;;  %8731 = vst [vmem:[#allocation22_spill] sm:$0xff] %v7197_v10  ;;  %v2999_v11 = vand.u32 2147483647, %v7197_v10 }
 0x4f6   : > { %v2911_v19 = vpop.f32.mrf.mxu1 }
 0x4f7   : > { %8728 = vst [vmem:[#allocation54_spill] sm:$0xff] %v7188_v13  ;;  %v3000_v0 = vand.u32 2147483647, %v7188_v13  ;;  %v3062_v27 = vmul.f32 1.442695, %v3030_v47  ;;  %v7204_v5 = vadd.f32 %v2911_v19, %v2765_v16  ;;  %v3031_v44 = vsub.f32 0.0, %v2999_v11 }
 0x4f8   : > { %v2915_v25 = vpop.f32.mrf.mxu1 }
 0x4f9   : > { %v7192_v62 = vadd.f32 %v2915_v25, %v2770_v60  ;;  %v3032_v45 = vsub.f32 0.0, %v3000_v0  ;;  %8733 = vst [vmem:[#allocation51_spill] sm:$0xff] %v7204_v5  ;;  %4213 = vpow2.f32 %v3062_v27  ;;  %v3001_v50 = vand.u32 2147483647, %v7204_v5 }
 0x4fa   : > { %v2917_v34 = vpop.f32.mrf.mxu1  ;;  %v3064_v19 = vmul.f32 1.442695, %v3031_v44 }
 0x4fb   : > { %8729 = vst [vmem:[#allocation25_spill] sm:$0xff] %v7192_v62  ;;  %v3002_v36 = vand.u32 2147483647, %v7192_v62  ;;  %v3066_v42 = vmul.f32 1.442695, %v3032_v45  ;;  %v7206_v7 = vadd.f32 %v2917_v34, %v2770_v60  ;;  %v3033_v3 = vsub.f32 0.0, %v3001_v50 }
 0x4fc   : > { %v2921_v57 = vpop.f32.mrf.mxu1 }
 0x4fd   : > { %v7194_v20 = vadd.f32 %v2921_v57, %v2775_v29  ;;  %v3034_v33 = vsub.f32 0.0, %v3002_v36  ;;  %8734 = vst [vmem:[#allocation44_spill] sm:$0xff] %v7206_v7  ;;  %4215 = vpow2.f32 %v3066_v42  ;;  %v3003_v8 = vand.u32 2147483647, %v7206_v7 }
 0x4fe   : > { %v2923_v15 = vpop.f32.mrf.mxu1  ;;  %v3068_v16 = vmul.f32 1.442695, %v3033_v3 }
 0x4ff   : > { %8730 = vst [vmem:[#allocation42_spill] sm:$0xff] %v7194_v20  ;;  %v3004_v22 = vand.u32 2147483647, %v7194_v20  ;;  %v3070_v48 = vmul.f32 1.442695, %v3034_v33  ;;  %v7213_v1 = vadd.f32 %v2923_v15, %v2775_v29  ;;  %v3035_v55 = vsub.f32 0.0, %v3003_v8 }
 0x500   : > { %v2927_v17 = vpop.f32.mrf.mxu1 }
 0x501   : > { %v7202_v28 = vadd.f32 %v2927_v17, %v2780_v32  ;;  %v3036_v37 = vsub.f32 0.0, %v3004_v22  ;;  %8735 = vst [vmem:[#allocation55_spill] sm:$0xff] %v7213_v1  ;;  %4217 = vpow2.f32 %v3070_v48  ;;  %v3005_v63 = vand.u32 2147483647, %v7213_v1 }
 0x502   : > { %v2929_v52 = vpop.f32.mrf.mxu1 }
 0x503   : > { %8732 = vst [vmem:[#allocation71_spill] sm:$0xff] %v7202_v28  ;;  %v3006_v56 = vand.u32 2147483647, %v7202_v28  ;;  %v3074_v39 = vmul.f32 1.442695, %v3036_v37  ;;  %v7222_v60 = vadd.f32 %v2929_v52, %v2780_v32  ;;  %v3037_v15 = vsub.f32 0.0, %v3005_v63 }
 0x504   : > { %v2933_v58 = vpop.f32.mrf.mxu1  ;;  %v3072_v32 = vmul.f32 1.442695, %v3035_v55 }
 0x505   : > { %v7217_v24 = vadd.f32 %v2933_v58, %v7184_v18  ;;  %v3038_v2 = vsub.f32 0.0, %v3006_v56  ;;  %8737 = vst [vmem:[#allocation64_spill] sm:$0xff] %v7222_v60  ;;  %4219 = vpow2.f32 %v3074_v39  ;;  %v3007_v52 = vand.u32 2147483647, %v7222_v60 }
 0x506   : > { %v2935_v31 = vpop.f32.mrf.mxu1  ;;  %v7238_v58 = vpop.eup %4213  ;;  %4221 = vpow2.f32 %v3064_v19  ;;  %v3076_v11 = vmul.f32 1.442695, %v3037_v15 }
 0x507   : > { %8736 = vst [vmem:[#allocation62_spill] sm:$0xff] %v7217_v24  ;;  %v3008_v29 = vand.u32 2147483647, %v7217_v24  ;;  %v3078_v43 = vmul.f32 1.442695, %v3038_v2  ;;  %8739 = vst [vmem:[#allocation63_spill] sm:$0xff] %v7238_v58  ;;  %v7246_v42 = vadd.f32 %v2935_v31, %v7184_v18 }
 0x508   : > { %v2939_v51 = vpop.f32.mrf.mxu1  ;;  %v3126_v50 = vadd.f32 1.0, %v7238_v58  ;;  %v3039_v48 = vsub.f32 0.0, %v3007_v52  ;;  %v3129_v2 = vmul.f32 -0.5, %v7238_v58 }
 0x509   : > { %v7226_v25 = vadd.f32 %v2939_v51, %v7180_v6  ;;  %v3040_v45 = vsub.f32 0.0, %v3008_v29  ;;  %4223 = vpow2.f32 %v3078_v43  ;;  %8740 = vst [vmem:[#allocation65_spill] sm:$0xff] %v7246_v42  ;;  %v3009_v63 = vand.u32 2147483647, %v7246_v42 }
 0x50a   : > { %v7199_v41 = vpop.f32.mrf.mxu1  ;;  %v7249_v33 = vpop.eup %4215  ;;  %4225 = vpow2.f32 %v3068_v16 }
 0x50b   : > { %8738 = vst [vmem:[#allocation69_spill] sm:$0xff] %v7226_v25  ;;  %v3010_v36 = vand.u32 2147483647, %v7226_v25  ;;  %8741 = vst [vmem:[#allocation49_spill] sm:$0xff] %v7249_v33  ;;  %4227 = vpow2.f32 %v3072_v32  ;;  %v3082_v31 = vmul.f32 1.442695, %v3040_v45  ;;  %v7258_v44 = vadd.f32 %v7199_v41, %v7180_v6 }
 0x50c   : > { %v2945_v54 = vpop.f32.mrf.mxu1  ;;  %v3144_v3 = vadd.f32 1.0, %v7249_v33  ;;  %4229 = vpow2.f32 %v3076_v11  ;;  %v3147_v6 = vmul.f32 -0.5, %v7249_v33  ;;  %v3080_v41 = vmul.f32 1.442695, %v3039_v48 }
 0x50d   : > { %v7231_v57 = vadd.f32 %v2945_v54, %v7182_v53  ;;  %v3042_v8 = vsub.f32 0.0, %v3010_v36  ;;  %8742 = vst [vmem:[#allocation66_spill] sm:$0xff] %v7258_v44  ;;  %4231 = vlog2.f32 %v3126_v50  ;;  %v3011_v45 = vand.u32 2147483647, %v7258_v44 }
 0x50e   : > { %v7209_v12 = vpop.f32.mrf.mxu1  ;;  %v7268_v16 = vpop.eup %4217  ;;  %4233 = vpow2.f32 %v3082_v31  ;;  %v3041_v11 = vsub.f32 0.0, %v3009_v63 }
 0x50f   : > { %v3012_v22 = vand.u32 2147483647, %v7231_v57  ;;  %8743 = vst [vmem:[#allocation58_spill] sm:$0xff] %v7268_v16  ;;  %v3086_v52 = vmul.f32 1.442695, %v3042_v8  ;;  %4235 = vlog2.f32 %v3144_v3  ;;  %v3162_v50 = vadd.f32 1.0, %v7268_v16 }
 0x510   : > { %v2951_v61 = vpop.f32.mrf.mxu1  ;;  %v3165_v48 = vmul.f32 -0.5, %v7268_v16  ;;  %4237 = vpow2.f32 %v3080_v41 }
 0x511   : > { %v7236_v0 = vadd.f32 %v2951_v61, %v7176_v26  ;;  %v3044_v55 = vsub.f32 0.0, %v3012_v22  ;;  %v7277_v22 = vadd.f32 1.0, %v3129_v2  ;;  %4239 = vpow2.f32 %v3086_v52 }
 0x512   : > { %v7219_v40 = vpop.f32.mrf.mxu1  ;;  %v7279_v47 = vpop.eup %4219  ;;  %v3166_v41 = vadd.f32 1.0, %v3165_v48 }
 0x513   : > { %v3014_v61 = vand.u32 2147483647, %v7236_v0  ;;  %8744 = vst [vmem:[#allocation37_spill] sm:$0xff] %v7277_v22  ;;  %v3090_v14 = vmul.f32 1.442695, %v3044_v55  ;;  %8745 = vst [vmem:[#allocation72_spill] sm:$0xff] %v7279_v47  ;;  %v7295_v27 = vpop.eup %4221 }
 0x514   : > { %v2957_v35 = vpop.f32.mrf.mxu1  ;;  %v3043_v55 = vsub.f32 0.0, %v3011_v45  ;;  %v3180_v8 = vadd.f32 1.0, %v7279_v47  ;;  %v7319_v43 = vmul.f32 %v7268_v16, %v3166_v41 }
 0x515   : > { %v3046_v15 = vsub.f32 0.0, %v3014_v61  ;;  %v7275_v36 = vadd.f32 %v2957_v35, %v7178_v21  ;;  %v7285_v61 = vadd.f32 %v7209_v12, %v7182_v53  ;;  %v3148_v35 = vadd.f32 1.0, %v3147_v6 }
 0x516   : > { %v7228_v34 = vpop.f32.mrf.mxu1  ;;  %v3183_v53 = vmul.f32 -0.5, %v7279_v47  ;;  %v3084_v12 = vmul.f32 1.442695, %v3041_v11  ;;  %4241 = vpow2.f32 %v3090_v14  ;;  %v7301_v6 = vpop.eup %4223  ;;  %v3088_v48 = vmul.f32 1.442695, %v3043_v55  ;;  %8748 = vst [vmem:[#allocation48_spill] sm:$0xff] %v7319_v43 }
 0x517   : > { %8746 = vst [vmem:[#allocation61_spill] sm:$0xff] %v7285_v61  ;;  %v3094_v2 = vmul.f32 1.442695, %v3046_v15  ;;  %v3016_v19 = vand.u32 2147483647, %v7275_v36  ;;  %4243 = vlog2.f32 %v3162_v50  ;;  %v7305_v45 = vpop.eup %4225  ;;  %v7308_v54 = vmul.f32 %v7249_v33, %v3148_v35 }
 0x518   : > { %v2963_v17 = vpop.f32.mrf.mxu1  ;;  %v3013_v15 = vand.u32 2147483647, %v7285_v61  ;;  %v7312_v11 = vpop.eup %4227  ;;  %v3184_v29 = vadd.f32 1.0, %v3183_v53  ;;  %v3201_v63 = vmul.f32 -0.5, %v7301_v6  ;;  %v3198_v55 = vadd.f32 1.0, %v7301_v6 }
 0x519   : > { %v7288_v31 = vadd.f32 %v2963_v17, %v7172_v30  ;;  %8747 = vst [vmem:[#allocation60_spill] sm:$0xff] %v7308_v54  ;;  %4245 = vpow2.f32 %v3094_v2  ;;  %v3048_v18 = vsub.f32 0.0, %v3016_v19  ;;  %v7325_v50 = vpop.eup %4229  ;;  %v7331_v53 = vadd.f32 %v7219_v40, %v7176_v26 }
 0x51a   : > { %v7242_v51 = vpop.f32.mrf.mxu1  ;;  %4247 = vpow2.f32 %v3084_v12  ;;  %v3045_v14 = vsub.f32 0.0, %v3013_v15  ;;  %v7333_v41 = vpop.eup %4231  ;;  %v3202_v37 = vadd.f32 1.0, %v3201_v63 }
 0x51b   : > { %v3018_v52 = vand.u32 2147483647, %v7288_v31  ;;  %4249 = vlog2.f32 %v3180_v8  ;;  %8749 = vst [vmem:[#allocation56_spill] sm:$0xff] %v7331_v53  ;;  %8750 = vst [vmem:[#allocation59_spill] sm:$0xff] %v7333_v41  ;;  %v7340_v8 = vmul.f32 %v7279_v47, %v3184_v29 }
 0x51c   : > { %v2969_v56 = vpop.f32.mrf.mxu1  ;;  %4251 = vpow2.f32 %v3088_v48  ;;  %v3092_v40 = vmul.f32 1.442695, %v3045_v14  ;;  %v7345_v48 = vadd.f32 %v7242_v51, %v7172_v30 }
 0x51d   : > { %v7299_v17 = vadd.f32 %v2969_v56, %v7174_v49  ;;  %v3050_v2 = vsub.f32 0.0, %v3018_v52  ;;  %v7337_v52 = vpop.eup %4233  ;;  %8751 = vst [vmem:[#allocation57_spill] sm:$0xff] %v7340_v8  ;;  %4253 = vlog2.f32 %v3198_v55 }
 0x51e   : > { %v7260_v39 = vpop.f32.mrf.mxu1  ;;  %v4236_v26 = vpop.eup %4235  ;;  %8752 = vst [vmem:[#allocation10_spill] sm:$0xff] %v7345_v48  ;;  %v3216_v14 = vadd.f32 1.0, %v7337_v52  ;;  %v3019_v62 = vand.u32 2147483647, %v7345_v48 }
 0x51f   : > { %v3020_v35 = vand.u32 2147483647, %v7299_v17  ;;  %v7323_v38 = vadd.f32 %v7260_v39, %v7174_v49  ;;  %v3098_v39 = vmul.f32 1.442695, %v3048_v18  ;;  %v3102_v5 = vmul.f32 1.442695, %v3050_v2 }
 0x520   : > { %v7271_v32 = vpop.f32.mrf.mxu1  ;;  %v3015_v49 = vand.u32 2147483647, %v7331_v53  ;;  %v3219_v2 = vmul.f32 -0.5, %v7337_v52  ;;  %v7363_v55 = vmul.f32 0.6931472, %v4236_v26  ;;  %v7366_v18 = vmul.f32 %v7301_v6, %v3202_v37 }
 0x521   : > { %v3052_v9 = vsub.f32 0.0, %v3020_v35  ;;  %v3021_v15 = vand.u32 2147483647, %v7323_v38  ;;  %v7352_v29 = vadd.f32 %v7271_v32, %v7168_v59  ;;  %v7354_v35 = vpop.eup %4237  ;;  %4255 = vpow2.f32 %v3098_v39 }
 0x522   : > { %v7291_v3 = vpop.f32.mrf.mxu1  ;;  %v7361_v51 = vpop.eup %4239  ;;  %8753 = vst [vmem:[#allocation52_spill] sm:$0xff] %v7363_v55  ;;  %8754 = vst [vmem:[#allocation46_spill] sm:$0xff] %v7366_v18  ;;  %4257 = vpow2.f32 %v3102_v5  ;;  %v3047_v7 = vsub.f32 0.0, %v3015_v49 }
 0x523   : > { %v3106_v32 = vmul.f32 1.442695, %v3052_v9  ;;  %v7371_v10 = vpop.eup %4241  ;;  %v3053_v39 = vsub.f32 0.0, %v3021_v15  ;;  %4259 = vpow2.f32 %v3092_v40  ;;  %v3022_v37 = vand.u32 2147483647, %v7352_v29 }
 0x524   : > { %v2981_v56 = vpop.f32.mrf.mxu1  ;;  %v4244_v13 = vpop.eup %4243  ;;  %4261 = vlog2.f32 %v3216_v14  ;;  %v3252_v15 = vadd.f32 1.0, %v7371_v10  ;;  %v7393_v14 = vadd.f32 %v7228_v34, %v7178_v21  ;;  %v3096_v22 = vmul.f32 1.442695, %v3047_v7 }
 0x525   : > { %v7359_v30 = vadd.f32 %v2981_v56, %v7170_v46  ;;  %4263 = vpow2.f32 %v3106_v32  ;;  %v3108_v26 = vmul.f32 1.442695, %v3053_v39  ;;  %v7396_v58 = vmul.f32 0.6931472, %v4244_v13 }
 0x526   : > { %v2983_v12 = vpop.f32.mrf.mxu1  ;;  %v7379_v9 = vpop.eup %4245  ;;  %8755 = vst [vmem:[#allocation21_spill] sm:$0xff] %v7393_v14  ;;  %v3054_v20 = vsub.f32 0.0, %v3022_v37  ;;  %v3017_v7 = vand.u32 2147483647, %v7393_v14 }
 0x527   : > { %v7369_v19 = vadd.f32 %v2983_v12, %v7170_v46  ;;  %v3220_v46 = vadd.f32 1.0, %v3219_v2  ;;  %v3234_v12 = vadd.f32 1.0, %v7361_v51  ;;  %v3024_v5 = vand.u32 2147483647, %v7359_v30  ;;  %v7389_v40 = vpop.eup %4247  ;;  %8756 = vst [vmem:[#allocation67_spill] sm:$0xff] %v7396_v58 }
 0x528   : > { %v2987_v63 = vpop.f32.mrf.mxu1  ;;  %v3051_v2 = vsub.f32 0.0, %v3019_v62  ;;  %v3270_v32 = vadd.f32 1.0, %v7379_v9  ;;  %v3237_v62 = vmul.f32 -0.5, %v7361_v51 }
 0x529   : > { %v7375_v56 = vadd.f32 %v2987_v63, %v7164_v4  ;;  %v7386_v63 = vadd.f32 %v7291_v3, %v7168_v59  ;;  %v3025_v49 = vand.u32 2147483647, %v7369_v19  ;;  %v4250_v59 = vpop.eup %4249  ;;  %v7400_v3 = vmul.f32 %v7337_v52, %v3220_v46 }
 0x52a   : > { %v2989_v54 = vpop.f32.mrf.mxu1  ;;  %4265 = vlog2.f32 %v3234_v12  ;;  %v3056_v1 = vsub.f32 0.0, %v3024_v5  ;;  %v7403_v34 = vpop.eup %4251  ;;  %v3104_v37 = vmul.f32 1.442695, %v3051_v2  ;;  %v3240_v46 = vand.u32 2147483647, %v7361_v51 }
 0x52b   : > { %v3026_v55 = vand.u32 2147483647, %v7375_v56  ;;  %8757 = vst [vmem:[#allocation9_spill] sm:$0xff] %v7400_v3  ;;  %4267 = vlog2.f32 %v3252_v15  ;;  %v3023_v13 = vand.u32 2147483647, %v7386_v63  ;;  %v3057_v39 = vsub.f32 0.0, %v3025_v49  ;;  %v4254_v33 = vpop.eup %4253 }
 0x52c   : > { %v2993_v21 = vpop.f32.mrf.mxu1  ;;  %4269 = vpow2.f32 %v3108_v26  ;;  %v3110_v12 = vmul.f32 1.442695, %v3054_v20  ;;  %v7410_v5 = vadd.f32 %v2989_v54, %v7164_v4  ;;  %v7412_v58 = vmul.f32 0.6931472, %v4250_v59 }
 0x52d   : > { %v3058_v43 = vsub.f32 0.0, %v3026_v55  ;;  %4271 = vlog2.f32 %v3270_v32  ;;  %v3114_v41 = vmul.f32 1.442695, %v3056_v1  ;;  %v3055_v55 = vsub.f32 0.0, %v3023_v13 }
 0x52e   : > { %8758 = vst [vmem:[#allocation20_spill] sm:$0xff] %v7412_v58  ;;  %4273 = vpow2.f32 %v3096_v22  ;;  %v2995_v49 = vpop.f32.mrf.mxu1  ;;  %v7415_v28 = vpop.eup %4255  ;;  %v3116_v2 = vmul.f32 1.442695, %v3057_v39  ;;  %v3027_v32 = vand.u32 2147483647, %v7410_v5  ;;  %v8760_v4 = vmov 0 }
 0x52f   : > { %v8759_v20 = vand.u32 2147483647, %v7301_v6  ;;  %v3238_v54 = vadd.f32 1.0, %v3237_v62  ;;  %v3049_v22 = vsub.f32 0.0, %v3017_v7  ;;  %4275 = vpow2.f32 %v3104_v37  ;;  %v7425_v1 = vpop.eup %4257 }
 0x530   : > { %v3118_v59 = vmul.f32 1.442695, %v3058_v43  ;;  %4277 = vpow2.f32 %v3110_v12  ;;  %v3059_v15 = vsub.f32 0.0, %v3027_v32  ;;  %v7428_v26 = vadd.f32 %v2993_v21, %v7166_v23  ;;  %v7433_v39 = vpop.eup %4259 }
 0x531   : > { %vm7421_vm13 = vcmp.lt.f32.partialorder %v8759_v20, 0.0004427343  ;;  %v7431_v13 = vadd.f32 %v2995_v49, %v7166_v23  ;;  %v3255_v6 = vmul.f32 -0.5, %v7371_v10  ;;  %v3288_v20 = vadd.f32 1.0, %v7415_v28  ;;  %v4262_v43 = vpop.eup %4261 }
 0x532   : > { %v8761_v4 = vsel %vm7421_vm13, 4294967295, %v8760_v4  ;;  %4279 = vpow2.f32 %v3114_v41  ;;  %v8763_v7 = vand.u32 2147483647, %v7337_v52  ;;  %v8764_v37 = vmov 0  ;;  %v7445_v49 = vpop.eup %4263 }
 0x533   : > { %8762 = vst [vmem:[#allocation70_spill] sm:$0xff] %v8761_v4  ;;  %v3112_v21 = vmul.f32 1.442695, %v3055_v55  ;;  %4281 = vpow2.f32 %v3116_v2  ;;  %v3120_v23 = vmul.f32 1.442695, %v3059_v15  ;;  %v7448_v32 = vmul.f32 %v7361_v51, %v3238_v54 }
 0x534   : > { %vm7440_vm14 = vcmp.lt.f32.partialorder %v8763_v7, 0.0004427343  ;;  %v3028_v12 = vand.u32 2147483647, %v7428_v26  ;;  %v3306_v62 = vadd.f32 1.0, %v7425_v1  ;;  %4283 = vpow2.f32 %v3118_v59 }
 0x535   : > { %v8765_v37 = vsel %vm7440_vm14, 4294967295, %v8764_v37  ;;  %8767 = vst [vmem:[#allocation39_spill] sm:$0xff] %v7448_v32  ;;  %v3029_v41 = vand.u32 2147483647, %v7431_v13  ;;  %v7452_v52 = vmul.f32 0.6931472, %v4254_v33  ;;  %4285 = vpow2.f32 %v3120_v23 }
 0x536   : > { %8766 = vst [vmem:[#allocation45_spill] sm:$0xff] %v8765_v37  ;;  %v3100_v7 = vmul.f32 1.442695, %v3049_v22  ;;  %v3060_v60 = vsub.f32 0.0, %v3028_v12  ;;  %v3258_v55 = vand.u32 2147483647, %v7371_v10  ;;  %4287 = vlog2.f32 %v3288_v20 }
 0x537   : > { %8768 = vst [vmem:[#allocation27_spill] sm:$0xff] %v7452_v52  ;;  %v3273_v15 = vmul.f32 -0.5, %v7379_v9  ;;  %v3061_v2 = vsub.f32 0.0, %v3029_v41  ;;  %v4266_v8 = vpop.eup %4265  ;;  %vm7456_vm15 = vcmp.lt.f32.partialorder %v3240_v46, 0.0004427343  ;;  %v8769_v51 = vmov 0 }
 0x538   : > { %v8770_v51 = vsel %vm7456_vm15, 4294967295, %v8769_v51  ;;  %v3256_v54 = vadd.f32 1.0, %v3255_v6  ;;  %v3324_v59 = vadd.f32 1.0, %v7445_v49  ;;  %4289 = vpow2.f32 %v3112_v21  ;;  %v4268_v58 = vpop.eup %4267 }
 0x539   : > { %8771 = vst [vmem:[#allocation24_spill] sm:$0xff] %v8770_v51  ;;  %v3122_v33 = vmul.f32 1.442695, %v3060_v60  ;;  %v7461_v22 = vmul.f32 0.6931472, %v4262_v43  ;;  %4291 = vlog2.f32 %v3306_v62  ;;  %v7464_v42 = vpop.eup %4269  ;;  %v3274_v62 = vadd.f32 1.0, %v3273_v15 }
 0x53a   : > { %v3124_v12 = vmul.f32 1.442695, %v3061_v2  ;;  %v3276_v6 = vand.u32 2147483647, %v7379_v9  ;;  %4293 = vpow2.f32 %v3100_v7  ;;  %v4272_v60 = vpop.eup %4271  ;;  %vm7472_vm1 = vcmp.lt.f32.partialorder %v3258_v55, 0.0004427343 }
 0x53b   : > { %8772 = vst [vmem:[#allocation28_spill] sm:$0xff] %v7461_v22  ;;  %v3291_v21 = vmul.f32 -0.5, %v7415_v28  ;;  %4295 = vpow2.f32 %v3122_v33  ;;  %v7477_v41 = vpop.eup %4273  ;;  %v3254_v2 = vmul.f32 0.6931472, %v4268_v58  ;;  %v3257_v23 = vmul.f32 %v7371_v10, %v3256_v54 }
 0x53c   : > { %v3309_v46 = vmul.f32 -0.5, %v7425_v1  ;;  %4297 = vlog2.f32 %v3324_v59  ;;  %v7485_v55 = vmul.f32 0.6931472, %v4266_v8  ;;  %v3333_v15 = vadd.f32 1.0, %v7464_v42  ;;  %v7488_v20 = vpop.eup %4275 }
 0x53d   : > { %4299 = vpow2.f32 %v3124_v12  ;;  %v3272_v33 = vmul.f32 0.6931472, %v4272_v60  ;;  %vm7490_vm5 = vcmp.lt.f32.partialorder %v3276_v6, 0.0004427343  ;;  %v3327_v10 = vmul.f32 -0.5, %v7445_v49  ;;  %v7496_v59 = vpop.eup %4277 }
 0x53e   : > { %8775 = vst [vmem:[#allocation23_spill] sm:$0xff] %v7485_v55  ;;  %v3275_v7 = vmul.f32 %v7379_v9, %v3274_v62  ;;  %v3292_v8 = vadd.f32 1.0, %v3291_v21  ;;  %v3294_v12 = vand.u32 2147483647, %v7415_v28  ;;  %v3260_v6 = vsel %vm7472_vm1, %v3257_v23, %v3254_v2 }
 0x53f   : > { %v7501_v18 = vpop.eup %4279  ;;  %v3310_v60 = vadd.f32 1.0, %v3309_v46  ;;  %v3312_v4 = vand.u32 2147483647, %v7425_v1  ;;  %4301 = vlog2.f32 %v3333_v15  ;;  %v3328_v46 = vadd.f32 1.0, %v3327_v10 }
 0x540   : > { %v7507_v54 = vpop.eup %4281  ;;  %v3278_v23 = vsel %vm7490_vm5, %v3275_v7, %v3272_v33  ;;  %v3342_v43 = vadd.f32 1.0, %v7496_v59  ;;  %v8778_v22 = vmax.f32 %v7231_v57, 0.0  ;;  %v3293_v62 = vmul.f32 %v7415_v28, %v3292_v8 }
 0x541   : > { %v7515_v52 = vpop.eup %4283  ;;  %vm7528_vm4 = vcmp.lt.f32.partialorder %v3294_v12, 0.0004427343  ;;  %v3360_v58 = vadd.f32 1.0, %v7501_v18  ;;  %v3311_v33 = vmul.f32 %v7425_v1, %v3310_v60  ;;  %vm7534_vm3 = vcmp.lt.f32.partialorder %v3312_v4, 0.0004427343 }
 0x542   : > { %v7521_v24 = vpop.eup %4285  ;;  %v7525_v9 = vadd.f32 %v8778_v22, %v3260_v6  ;;  %v3330_v21 = vand.u32 2147483647, %v7445_v49  ;;  %v3369_v57 = vadd.f32 1.0, %v7507_v54  ;;  %v3336_v22 = vmul.f32 -0.5, %v7464_v42 }
 0x543   : > { %v4288_v7 = vpop.eup %4287  ;;  %v8784_v8 = vmax.f32 %v7236_v0, 0.0  ;;  %v3387_v1 = vadd.f32 1.0, %v7521_v24  ;;  %v3315_v4 = vadd.f32 1.0, %v7488_v20  ;;  %v7551_v2 = vmul.f32 %v7445_v49, %v3328_v46 }
 0x544   : > { %8779 = vst [vmem:[#allocation68_spill] sm:$0xff] %v7525_v9  ;;  %4303 = vlog2.f32 %v3342_v43  ;;  %v3345_v3 = vmul.f32 -0.5, %v7496_v59  ;;  %v3378_v37 = vadd.f32 1.0, %v7515_v52  ;;  %v3290_v0 = vmul.f32 0.6931472, %v4288_v7 }
 0x545   : > { %v7541_v28 = vpop.eup %4289  ;;  %v7545_v12 = vadd.f32 %v8784_v8, %v3278_v23  ;;  %4305 = vlog2.f32 %v3360_v58  ;;  %v3339_v8 = vand.u32 2147483647, %v7464_v42  ;;  %vm7561_vm2 = vcmp.lt.f32.partialorder %v3330_v21, 0.0004427343 }
 0x546   : > { %v4292_v60 = vpop.eup %4291  ;;  %4307 = vlog2.f32 %v3369_v57  ;;  %v3351_v46 = vadd.f32 1.0, %v7541_v28  ;;  %v3337_v43 = vadd.f32 1.0, %v3336_v22  ;;  %v3318_v7 = vmul.f32 -0.5, %v7488_v20 }
 0x547   : > { %8785 = vst [vmem:[#allocation19_spill] sm:$0xff] %v7545_v12  ;;  %v7555_v9 = vpop.eup %4293  ;;  %v3308_v55 = vmul.f32 0.6931472, %v4292_v60  ;;  %4309 = vlog2.f32 %v3387_v1  ;;  %v3346_v32 = vadd.f32 1.0, %v3345_v3  ;;  %v3363_v21 = vmul.f32 -0.5, %v7501_v18 }
 0x548   : > { %v7559_v6 = vpop.eup %4295  ;;  %4311 = vlog2.f32 %v3378_v37  ;;  %v3296_v57 = vsel %vm7528_vm4, %v3293_v62, %v3290_v0  ;;  %v3372_v60 = vmul.f32 -0.5, %v7507_v54  ;;  %v3348_v1 = vand.u32 2147483647, %v7496_v59 }
 0x549   : > { %v4298_v25 = vpop.eup %4297  ;;  %v3396_v58 = vadd.f32 1.0, %v7559_v6  ;;  %v3381_v49 = vmul.f32 -0.5, %v7515_v52  ;;  %v7580_v3 = vmul.f32 %v7464_v42, %v3337_v43  ;;  %vm7582_vm6 = vcmp.lt.f32.partialorder %v3339_v8, 0.0004427343 }
 0x54a   : > { %v7569_v23 = vpop.eup %4299  ;;  %v3314_v62 = vsel %vm7534_vm3, %v3311_v33, %v3308_v55  ;;  %v3326_v15 = vmul.f32 0.6931472, %v4298_v25  ;;  %v3354_v0 = vmul.f32 -0.5, %v7541_v28  ;;  %v8790_v51 = vmax.f32 %v7275_v36, 0.0 }
 0x54b   : > { %4313 = vlog2.f32 %v3396_v58  ;;  %v3405_v22 = vadd.f32 1.0, %v7569_v23  ;;  %v3366_v42 = vand.u32 2147483647, %v7501_v18  ;;  %v7595_v8 = vmul.f32 %v7496_v59, %v3346_v32 }
 0x54c   : > { %4315 = vlog2.f32 %v3351_v46  ;;  %v4302_v58 = vpop.eup %4301  ;;  %v7591_v12 = vadd.f32 %v8790_v51, %v3296_v57  ;;  %v3364_v46 = vadd.f32 1.0, %v3363_v21  ;;  %v3373_v43 = vadd.f32 1.0, %v3372_v60 }
 0x54d   : > { %4317 = vlog2.f32 %v3405_v22  ;;  %v3375_v10 = vand.u32 2147483647, %v7507_v54  ;;  %v3297_v25 = vadd.f32 1.0, %v7555_v9  ;;  %v8792_v55 = vmax.f32 %v7288_v31, 0.0 }
 0x54e   : > { %8791 = vst [vmem:[#allocation26_spill] sm:$0xff] %v7591_v12  ;;  %4319 = vlog2.f32 %v3315_v4  ;;  %v3382_v22 = vadd.f32 1.0, %v3381_v49  ;;  %v3384_v36 = vand.u32 2147483647, %v7515_v52  ;;  %v3390_v51 = vmul.f32 -0.5, %v7521_v24 }
 0x54f   : > { %v7601_v33 = vadd.f32 %v8792_v55, %v3314_v62  ;;  %v3332_v4 = vsel %vm7561_vm2, %v7551_v2, %v3326_v15  ;;  %v3355_v32 = vadd.f32 1.0, %v3354_v0  ;;  %v7608_v59 = vmul.f32 0.6931472, %v4302_v58 }
 0x550   : > { %v3279_v21 = vadd.f32 1.0, %v7477_v41  ;;  %v7612_v57 = vmul.f32 %v7501_v18, %v3364_v46  ;;  %v3399_v31 = vmul.f32 -0.5, %v7559_v6  ;;  %v3393_v49 = vand.u32 2147483647, %v7521_v24 }
 0x551   : > { %8793 = vst [vmem:[#allocation14_spill] sm:$0xff] %v7601_v33  ;;  %v3319_v60 = vadd.f32 1.0, %v3318_v7  ;;  %v4304_v62 = vpop.eup %4303  ;;  %vm7616_vm10 = vcmp.lt.f32.partialorder %v3348_v1, 0.0004427343  ;;  %v3408_v44 = vmul.f32 -0.5, %v7569_v23  ;;  %v7622_v2 = vmul.f32 %v7507_v54, %v3373_v43 }
 0x552   : > { %4321 = vlog2.f32 %v3297_v25  ;;  %v3261_v15 = vadd.f32 1.0, %v7433_v39  ;;  %v4306_v18 = vpop.eup %4305  ;;  %v8796_v0 = vmax.f32 %v7299_v17, 0.0  ;;  %v7630_v7 = vmul.f32 %v7515_v52, %v3382_v22 }
 0x553   : > { %v3391_v1 = vadd.f32 1.0, %v3390_v51  ;;  %v3357_v46 = vand.u32 2147483647, %v7541_v28  ;;  %v4308_v61 = vpop.eup %4307  ;;  %vm7633_vm9 = vcmp.lt.f32.partialorder %v3366_v42, 0.0004427343  ;;  %v7642_v43 = vmul.f32 %v7541_v28, %v3355_v32 }
 0x554   : > { %v7627_v58 = vadd.f32 %v8796_v0, %v3332_v4  ;;  %vm7637_vm8 = vcmp.lt.f32.partialorder %v3384_v36, 0.0004427343  ;;  %4323 = vlog2.f32 %v3279_v21  ;;  %v3243_v52 = vadd.f32 1.0, %v7403_v34  ;;  %v4310_v25 = vpop.eup %4309 }
 0x555   : > { %v3400_v42 = vadd.f32 1.0, %v3399_v31  ;;  %v3402_v22 = vand.u32 2147483647, %v7559_v6  ;;  %vm7650_vm7 = vcmp.lt.f32.partialorder %v3393_v49, 0.0004427343  ;;  %v7659_v28 = vmul.f32 %v7488_v20, %v3319_v60  ;;  %v4312_v4 = vpop.eup %4311 }
 0x556   : > { %8797 = vst [vmem:[#allocation18_spill] sm:$0xff] %v7627_v58  ;;  %vm7654_vm11 = vcmp.lt.f32.partialorder %v3375_v10, 0.0004427343  ;;  %v3344_v32 = vmul.f32 0.6931472, %v4304_v62  ;;  %v3409_v21 = vadd.f32 1.0, %v3408_v44  ;;  %4325 = vlog2.f32 %v3261_v15 }
 0x557   : > { %v3225_v0 = vadd.f32 1.0, %v7389_v40  ;;  %v3362_v17 = vmul.f32 0.6931472, %v4306_v18  ;;  %v3411_v49 = vand.u32 2147483647, %v7569_v23  ;;  %v3392_v16 = vmul.f32 %v7521_v24, %v3391_v1 }
 0x558   : > { %v4314_v31 = vpop.eup %4313  ;;  %vm7664_vm12 = vcmp.lt.f32.partialorder %v3357_v46, 0.0004427343  ;;  %v3300_v53 = vmul.f32 -0.5, %v7555_v9  ;;  %v3389_v47 = vmul.f32 0.6931472, %v4310_v25  ;;  %4327 = vlog2.f32 %v3243_v52 }
 0x559   : > { %v4316_v60 = vpop.eup %4315  ;;  %v3398_v33 = vmul.f32 0.6931472, %v4314_v31  ;;  %v3207_v62 = vadd.f32 1.0, %v7354_v35  ;;  %v3380_v15 = vmul.f32 0.6931472, %v4312_v4  ;;  %v3401_v18 = vmul.f32 %v7559_v6, %v3400_v42 }
 0x55a   : > { %v4318_v44 = vpop.eup %4317  ;;  %vm7671_vm1 = vcmp.lt.f32.partialorder %v3402_v22, 0.0004427343  ;;  %v3371_v24 = vmul.f32 0.6931472, %v4308_v61  ;;  %v3410_v58 = vmul.f32 %v7569_v23, %v3409_v21  ;;  %v8810_v48 = vand.u32 2147483647, %v7488_v20 }
 0x55b   : > { %v4320_v1 = vpop.eup %4319  ;;  %v3407_v46 = vmul.f32 0.6931472, %v4318_v44  ;;  %4329 = vlog2.f32 %v3225_v0  ;;  %v3189_v52 = vadd.f32 1.0, %v7325_v50  ;;  %v3350_v6 = vsel %vm7616_vm10, %v7595_v8, %v3344_v32 }
 0x55c   : > { %vm7678_vm5 = vcmp.lt.f32.partialorder %v8810_v48, 0.0004427343  ;;  %v3404_v61 = vsel %vm7671_vm1, %v3401_v18, %v3398_v33  ;;  %vm3412_vm4 = vcmp.lt.f32.partialorder %v3411_v49, 0.0004427343  ;;  %v3282_v42 = vmul.f32 -0.5, %v7477_v41 }
 0x55d   : > { %v3413_v23 = vsel %vm3412_vm4, %v3410_v58, %v3407_v46  ;;  %v3395_v48 = vsel %vm7650_vm7, %v3392_v16, %v3389_v47  ;;  %v3353_v20 = vmul.f32 0.6931472, %v4316_v60  ;;  %4331 = vlog2.f32 %v3207_v62 }
 0x55e   : > { %v3368_v22 = vsel %vm7633_vm9, %v7612_v57, %v3362_v17  ;;  %v3386_v8 = vsel %vm7637_vm8, %v7630_v7, %v3380_v15  ;;  %v8813_v14 = vmax.f32 %v7431_v13, 0.0  ;;  %v3171_v55 = vadd.f32 1.0, %v7312_v11 }
 0x55f   : > { %v8814_v58 = vmax.f32 %v7428_v26, 0.0  ;;  %v3377_v47 = vsel %vm7654_vm11, %v7622_v2, %v3371_v24  ;;  %4333 = vlog2.f32 %v3189_v52  ;;  %v3153_v16 = vadd.f32 1.0, %v7305_v45  ;;  %v4322_v12 = vpop.eup %4321 }
 0x560   : > { %v3477_v33 = vadd.f32 %v8813_v14, %v3413_v23  ;;  %v8815_v57 = vmax.f32 %v7410_v5, 0.0  ;;  %v3317_v54 = vmul.f32 0.6931472, %v4320_v1  ;;  %v3301_v13 = vadd.f32 1.0, %v3300_v53  ;;  %v8829_v14 = vld [vmem:[#allocation18_spill] sm:$0xff] }
 0x561   : > { %v3476_v4 = vadd.f32 %v8814_v58, %v3404_v61  ;;  %v3303_v17 = vand.u32 2147483647, %v7555_v9  ;;  %v8816_v36 = vmax.f32 %v7375_v56, 0.0  ;;  %v3359_v2 = vsel %vm7664_vm12, %v7642_v43, %v3353_v20  ;;  %v4324_v32 = vpop.eup %4323 }
 0x562   : > { %3485 = vmatprep.subr.mxu0 %v3477_v33  ;;  %v3475_v7 = vadd.f32 %v8815_v57, %v3395_v48  ;;  %v3264_v51 = vmul.f32 -0.5, %v7433_v39  ;;  %4335 = vlog2.f32 %v3171_v55  ;;  %v8817_v21 = vmax.f32 %v7352_v29, 0.0 }
 0x563   : > { %v3474_v26 = vadd.f32 %v8816_v36, %v3386_v8  ;;  %3486 = vmatpush1.msra.mxu0 %v3476_v4  ;;  %v8818_v0 = vmax.f32 %v7359_v30, 0.0  ;;  %v8819_v31 = vmax.f32 %v7369_v19, 0.0  ;;  %v3135_v49 = vadd.f32 1.0, %v7295_v27  ;;  %v4326_v62 = vpop.eup %4325 }
 0x564   : > { %v3470_v5 = vadd.f32 %v8817_v21, %v3350_v6  ;;  %3487 = vmatprep.subr.mxu0 %v3475_v7  ;;  %v3299_v60 = vmul.f32 0.6931472, %v4322_v12  ;;  %v3283_v10 = vadd.f32 1.0, %v3282_v42  ;;  %v3246_v43 = vmul.f32 -0.5, %v7403_v34 }
 0x565   : > { %v3472_v53 = vadd.f32 %v8818_v0, %v3368_v22  ;;  %v3473_v56 = vadd.f32 %v8819_v31, %v3377_v47  ;;  %3488 = vmatpush1.msra.mxu0 %v3474_v26  ;;  %4337 = vlog2.f32 %v3153_v16  ;;  %v8820_v29 = vmax.f32 %v7386_v63, 0.0  ;;  %v4328_v46 = vpop.eup %4327  ;;  %v8830_v47 = vld [vmem:[#allocation21_spill] sm:$0xff] }
 0x566   : > { %v3323_v30 = vsel %vm7678_vm5, %v7659_v28, %v3317_v54  ;;  %v3285_v19 = vand.u32 2147483647, %v7477_v41  ;;  %v3228_v15 = vmul.f32 -0.5, %v7389_v40  ;;  %v3302_v18 = vmul.f32 %v7555_v9, %v3301_v13  ;;  %v8834_v13 = vld [vmem:[#allocation72_spill] sm:$0xff] }
 0x567   : > { %3489 = vmatprep.subr.mxu0 %v3473_v56  ;;  %v3471_v44 = vadd.f32 %v8820_v29, %v3359_v2  ;;  %v3281_v24 = vmul.f32 0.6931472, %v4324_v32  ;;  %v3265_v1 = vadd.f32 1.0, %v3264_v51  ;;  %4339 = vlog2.f32 %v3135_v49 }
 0x568   : > { %3490 = vmatpush1.msra.mxu0 %v3472_v53  ;;  %v8821_v63 = vsel %vm7582_vm6, %v7580_v3, %v7608_v59  ;;  %v8822_v25 = vmax.f32 %v7323_v38, 0.0  ;;  %vm7738_vm3 = vcmp.lt.f32.partialorder %v3303_v17, 0.0004427343  ;;  %v3267_v6 = vand.u32 2147483647, %v7433_v39  ;;  %v4330_v3 = vpop.eup %4329  ;;  %v8825_v38 = vld [vmem:[#allocation10_spill] sm:$0xff] }
 0x569   : > { %3491 = vmatprep.subr.mxu0 %v3471_v44  ;;  %v3210_v9 = vmul.f32 -0.5, %v7354_v35  ;;  %v3305_v61 = vsel %vm7738_vm3, %v3302_v18, %v3299_v60  ;;  %v3284_v37 = vmul.f32 %v7477_v41, %v3283_v10  ;;  %v3263_v42 = vmul.f32 0.6931472, %v4326_v62  ;;  %v8843_v60 = vld [vmem:[#allocation58_spill] sm:$0xff] }
 0x56a   : > { %v3469_v28 = vadd.f32 %v8822_v25, %v8821_v63  ;;  %3492 = vmatpush1.msra.mxu0 %v3470_v5  ;;  %v3247_v23 = vadd.f32 1.0, %v3246_v43  ;;  %v8826_v59 = vmax.f32 %v8825_v38, 0.0  ;;  %vm7749_vm2 = vcmp.lt.f32.partialorder %v3285_v19, 0.0004427343  ;;  %v4332_v4 = vpop.eup %4331  ;;  %v8839_v5 = vld [vmem:[#allocation56_spill] sm:$0xff]  ;;  %v8847_v43 = vld [vmem:[#allocation26_spill] sm:$0xff] }
 0x56b   : > { %v3249_v22 = vand.u32 2147483647, %v7403_v34  ;;  %v3229_v8 = vadd.f32 1.0, %v3228_v15  ;;  %v3287_v33 = vsel %vm7749_vm2, %v3284_v37, %v3281_v24  ;;  %v3266_v41 = vmul.f32 %v7433_v39, %v3265_v1  ;;  %v8838_v39 = vld [vmem:[#allocation14_spill] sm:$0xff]  ;;  %v8852_v63 = vld [vmem:[#allocation19_spill] sm:$0xff] }
 0x56c   : > { %3493 = vmatprep.subr.mxu0 %v3469_v28  ;;  %v3467_v48 = vadd.f32 %v8826_v59, %v3323_v30  ;;  %v3245_v55 = vmul.f32 0.6931472, %v4328_v46  ;;  %v3192_v58 = vmul.f32 -0.5, %v7325_v50  ;;  %v8831_v16 = vmax.f32 %v8830_v47, 0.0  ;;  %v4334_v21 = vpop.eup %4333  ;;  %v8854_v37 = vld [vmem:[#allocation39_spill] sm:$0xff]  ;;  %v8859_v59 = vld [vmem:[#allocation66_spill] sm:$0xff] }
 0x56d   : > { %3494 = vmatpush1.msra.mxu0 %v8829_v14  ;;  %vm7761_vm6 = vcmp.lt.f32.partialorder %v3267_v6, 0.0004427343  ;;  %v3231_v7 = vand.u32 2147483647, %v7389_v40  ;;  %v3211_v54 = vadd.f32 1.0, %v3210_v9  ;;  %v3248_v2 = vmul.f32 %v7403_v34, %v3247_v23  ;;  %v8863_v14 = vld [vmem:[#allocation68_spill] sm:$0xff] }
 0x56e   : > { %3495 = vmatprep.subr.mxu0 %v3467_v48  ;;  %v3465_v12 = vadd.f32 %v8831_v16, %v3305_v61  ;;  %v8835_v17 = vand.u32 2147483647, %v8834_v13  ;;  %v3269_v26 = vsel %vm7761_vm6, %v3266_v41, %v3263_v42  ;;  %v3227_v51 = vmul.f32 0.6931472, %v4330_v3  ;;  %v8855_v42 = vld [vmem:[#allocation23_spill] sm:$0xff]  ;;  %v8857_v3 = vld [vmem:[#allocation69_spill] sm:$0xff] }
 0x56f   : > { %3496 = vmatpush1.msra.mxu0 %v8838_v39  ;;  %v3174_v32 = vmul.f32 -0.5, %v7312_v11  ;;  %v8840_v0 = vmax.f32 %v8839_v5, 0.0  ;;  %vm7779_vm9 = vcmp.lt.f32.partialorder %v3249_v22, 0.0004427343  ;;  %v3230_v56 = vmul.f32 %v7389_v40, %v3229_v8  ;;  %v4336_v19 = vpop.eup %4335  ;;  %v8848_v40 = vld [vmem:[#allocation61_spill] sm:$0xff]  ;;  %v8886_v24 = vld [vmem:[#allocation59_spill] sm:$0xff] }
 0x570   : > { %vm7768_vm10 = vcmp.lt.f32.partialorder %v8835_v17, 0.0004427343  ;;  %3497 = vmatprep.subr.mxu0 %v3465_v12  ;;  %v3213_v49 = vand.u32 2147483647, %v7354_v35  ;;  %v8844_v10 = vand.u32 2147483647, %v8843_v60  ;;  %v3251_v62 = vsel %vm7779_vm9, %v3248_v2, %v3245_v55 }
 0x571   : > { %v3463_v53 = vadd.f32 %v8840_v0, %v3287_v33  ;;  %3498 = vmatpush1.msra.mxu0 %v8847_v43  ;;  %v3209_v29 = vmul.f32 0.6931472, %v4332_v4  ;;  %v3193_v44 = vadd.f32 1.0, %v3192_v58  ;;  %v3156_v30 = vmul.f32 -0.5, %v7305_v45  ;;  %v8865_v16 = vld [vmem:[#allocation9_spill] sm:$0xff]  ;;  %v8866_v12 = vld [vmem:[#allocation28_spill] sm:$0xff] }
 0x572   : > { %vm7787_vm8 = vcmp.lt.f32.partialorder %v8844_v10, 0.0004427343  ;;  %v8849_v15 = vmax.f32 %v8848_v40, 0.0  ;;  %vm7797_vm7 = vcmp.lt.f32.partialorder %v3231_v7, 0.0004427343  ;;  %v3212_v1 = vmul.f32 %v7354_v35, %v3211_v54  ;;  %v4338_v9 = vpop.eup %4337  ;;  %v8868_v7 = vld [vmem:[#allocation62_spill] sm:$0xff] }
 0x573   : > { %3499 = vmatprep.subr.mxu0 %v3463_v53  ;;  %v3195_v46 = vand.u32 2147483647, %v7325_v50  ;;  %v3233_v25 = vsel %vm7797_vm7, %v3230_v56, %v3227_v51  ;;  %v3191_v28 = vmul.f32 0.6931472, %v4334_v21  ;;  %v3175_v52 = vadd.f32 1.0, %v3174_v32  ;;  %v8870_v17 = vld [vmem:[#allocation65_spill] sm:$0xff] }
 0x574   : > { %v3461_v18 = vadd.f32 %v8849_v15, %v3269_v26  ;;  %3500 = vmatpush1.msra.mxu0 %v8852_v63  ;;  %v3138_v6 = vmul.f32 -0.5, %v7295_v27  ;;  %v8856_v23 = vsel %vm7456_vm15, %v8854_v37, %v8855_v42  ;;  %v8858_v38 = vmax.f32 %v8857_v3, 0.0  ;;  %v4340_v4 = vpop.eup %4339  ;;  %v8874_v0 = vld [vmem:[#allocation20_spill] sm:$0xff]  ;;  %v8875_v53 = vld [vmem:[#allocation57_spill] sm:$0xff]  ;;  %v8897_v42 = vld [vmem:[#allocation42_spill] sm:$0xff] }
 0x575   : > { %v8860_v48 = vmax.f32 %v8859_v59, 0.0  ;;  %vm7816_vm11 = vcmp.lt.f32.partialorder %v3213_v49, 0.0004427343  ;;  %v3177_v8 = vand.u32 2147483647, %v7312_v11  ;;  %v3194_v41 = vmul.f32 %v7325_v50, %v3193_v44  ;;  %v8876_v56 = vld [vmem:[#allocation64_spill] sm:$0xff] }
 0x576   : > { %v3458_v35 = vadd.f32 %v8858_v38, %v8856_v23  ;;  %3501 = vmatprep.subr.mxu0 %v3461_v18  ;;  %v3215_v33 = vsel %vm7816_vm11, %v3212_v1, %v3209_v29  ;;  %v3173_v55 = vmul.f32 0.6931472, %v4336_v19  ;;  %v3157_v58 = vadd.f32 1.0, %v3156_v30  ;;  %v8882_v29 = vld [vmem:[#allocation27_spill] sm:$0xff]  ;;  %v8888_v63 = vld [vmem:[#allocation48_spill] sm:$0xff]  ;;  %v8893_v61 = vld [vmem:[#allocation49_spill] sm:$0xff] }
 0x577   : > { %v3459_v20 = vadd.f32 %v8860_v48, %v3251_v62  ;;  %3502 = vmatpush1.msra.mxu0 %v8863_v14  ;;  %v8867_v57 = vsel %vm7440_vm14, %v8865_v16, %v8866_v12  ;;  %v8869_v54 = vmax.f32 %v8868_v7, 0.0  ;;  %v8871_v39 = vmax.f32 %v8870_v17, 0.0  ;;  %v8884_v30 = vld [vmem:[#allocation71_spill] sm:$0xff]  ;;  %v8902_v22 = vld [vmem:[#allocation60_spill] sm:$0xff]  ;;  %v8907_v47 = vld [vmem:[#allocation25_spill] sm:$0xff] }
 0x578   : > { %vm7834_vm15 = vcmp.lt.f32.partialorder %v3195_v46, 0.0004427343  ;;  %v3159_v50 = vand.u32 2147483647, %v7305_v45  ;;  %v3176_v32 = vmul.f32 %v7312_v11, %v3175_v52  ;;  %v3155_v21 = vmul.f32 0.6931472, %v4338_v9 }
 0x579   : > { %v3456_v13 = vadd.f32 %v8869_v54, %v8867_v57  ;;  %3503 = vmatprep.subr.mxu0 %v3459_v20  ;;  %v3457_v26 = vadd.f32 %v8871_v39, %v3233_v25  ;;  %v3197_v51 = vsel %vm7834_vm15, %v3194_v41, %v3191_v28  ;;  %v3139_v5 = vadd.f32 1.0, %v3138_v6  ;;  %v8881_v11 = vld [vmem:[#allocation46_spill] sm:$0xff]  ;;  %v8887_v46 = vld [vmem:[#allocation67_spill] sm:$0xff]  ;;  %v8901_v20 = vld [vmem:[#allocation52_spill] sm:$0xff] }
 0x57a   : > { %3504 = vmatpush1.msra.mxu0 %v3458_v35  ;;  %v3188_v31 = vsel %vm7768_vm10, %v8875_v53, %v8874_v0  ;;  %v8877_v49 = vmax.f32 %v8876_v56, 0.0  ;;  %vm7848_vm14 = vcmp.lt.f32.partialorder %v3177_v8, 0.0004427343  ;;  %v3141_v43 = vand.u32 2147483647, %v7295_v27  ;;  %v8889_v28 = vld [vmem:[#allocation55_spill] sm:$0xff] }
 0x57b   : > { %3505 = vmatprep.subr.mxu0 %v3457_v26  ;;  %v8883_v44 = vsel %vm7421_vm13, %v8881_v11, %v8882_v29  ;;  %v8885_v19 = vmax.f32 %v8884_v30, 0.0  ;;  %v3179_v36 = vsel %vm7848_vm14, %v3176_v32, %v3173_v55  ;;  %v3158_v15 = vmul.f32 %v7305_v45, %v3157_v58  ;;  %v8899_v35 = vld [vmem:[#allocation37_spill] sm:$0xff]  ;;  %v8900_v59 = vld [vmem:[#allocation63_spill] sm:$0xff]  ;;  %v8903_v14 = vld [vmem:[#allocation44_spill] sm:$0xff] }
 0x57c   : > { %v3455_v60 = vadd.f32 %v8877_v49, %v3215_v33  ;;  %3506 = vmatpush1.msra.mxu0 %v3456_v13  ;;  %v3137_v18 = vmul.f32 0.6931472, %v4340_v4  ;;  %v3128_v1 = vmul.f32 0.6931472, %v8886_v24  ;;  %v3170_v25 = vsel %vm7787_vm8, %v8888_v63, %v8887_v46  ;;  %v8906_v58 = vld [vmem:[#allocation54_spill] sm:$0xff]  ;;  %v8910_v13 = vld [vmem:[#allocation51_spill] sm:$0xff] }
 0x57d   : > { %v3454_v40 = vadd.f32 %v8885_v19, %v8883_v44  ;;  %v8890_v52 = vmax.f32 %v8889_v28, 0.0  ;;  %vm7870_vm13 = vcmp.lt.f32.partialorder %v3159_v50, 0.0004427343  ;;  %v8894_v37 = vand.u32 2147483647, %v8893_v61  ;;  %v8909_v7 = vld [vmem:[#allocation22_spill] sm:$0xff] }
 0x57e   : > { %3507 = vmatprep.subr.mxu0 %v3455_v60  ;;  %v8898_v23 = vmax.f32 %v8897_v42, 0.0  ;;  %v3161_v34 = vsel %vm7870_vm13, %v3158_v15, %v3155_v21  ;;  %v3140_v38 = vmul.f32 %v7295_v27, %v3139_v5  ;;  %v3131_v48 = vmul.f32 %v8900_v59, %v8899_v35  ;;  %v8912_v26 = vld [vmem:[#allocation47_spill] sm:$0xff]  ;;  %v4341_v5 = vld [vmem:[%s4539_s23 + $0x8] sm:$0xff]  ;;  %v3483_v15 = vpop.permute.xlu0 %3482 }
 0x57f   : > { %v3453_v6 = vadd.f32 %v8890_v52, %v3197_v51  ;;  %vm7876_vm12 = vcmp.lt.f32.partialorder %v8894_v37, 0.0004427343  ;;  %3508 = vmatpush1.msra.mxu0 %v3454_v40  ;;  %v8904_v33 = vmax.f32 %v8903_v14, 0.0  ;;  %vm3142_vm1 = vcmp.lt.f32.partialorder %v3141_v43, 0.0004427343  ;;  %v3478_v21 = vld [vmem:[%s7965_s10] sm:$0xff] }
 0x580   : > { %v3452_v3 = vadd.f32 %v8898_v23, %v3188_v31  ;;  %v3152_v8 = vsel %vm7876_vm12, %v8902_v22, %v8901_v20  ;;  %v8905_v55 = vand.u32 2147483647, %v8900_v59  ;;  %v3416_v4 = vmax.f32 %v8906_v58, 0.0  ;;  %v4342_v0 = vld [vmem:[%s4539_s23] sm:$0xff]  ;;  %v3557_v56 = vld [vmem:[%s7956_s1 + $0x8] sm:$0xff]  ;;  %s405_s23 = sand.u32 1, %s4395_s22  }
 0x581   : > { %3509 = vmatprep.subr.mxu0 %v3453_v6  ;;  %v3451_v41 = vadd.f32 %v8904_v33, %v3179_v36  ;;  %v8908_v27 = vmax.f32 %v8907_v47, 0.0  ;;  %v3143_v12 = vsel %vm3142_vm1, %v3140_v38, %v3137_v18  ;;  %v3415_v54 = vmax.f32 %v8909_v7, 0.0  ;;  %v3556_v31 = vld [vmem:[%s7956_s1] sm:$0xff]  ;;  %s3759_s28 = sshll.u32 %s405_s23, 4  ;;  %s3682_s26 = scalar_lea.sflag [#allocation3], %s405_s23 }
 0x582   : > { %vm3133_vm5 = vcmp.lt.f32.partialorder %v8905_v55, 0.0004427343  ;;  %3510 = vmatpush1.msra.mxu0 %v3452_v3  ;;  %v8911_v17 = vmax.f32 %v8910_v13, 0.0  ;;  %v3414_v2 = vmax.f32 %v8912_v26, 0.0  ;;  %v3448_v50 = vadd.f32 %v3416_v4, %v3152_v8  ;;  %s407_s16 = scalar_lea.vmem [#allocation2], %s3759_s28  ;;  %s4349_s28 = scalar_lea.vmem %s4348_s30, 512 }
 0x583   : > { %v3450_v16 = vadd.f32 %v8908_v27, %v3170_v25  ;;  %v3134_v57 = vsel %vm3133_vm5, %v3131_v48, %v3128_v1  ;;  %3511 = vmatprep.subr.mxu0 %v3451_v41  ;;  %v3447_v51 = vadd.f32 %v3415_v54, %v3143_v12  ;;  %v8913_v53 = vmov 0.0   ;;  %s3696_s17 = sshll.u32 %s407_s16, 4  ;;  %s3697_s17 = int_to_ptr.vmem [resolvable:$true] %s3696_s17 }
 0x584   : > { %v3449_v39 = vadd.f32 %v8911_v17, %v3161_v34  ;;  %v3446_v32 = vadd.f32 %v3414_v2, %v3134_v57  ;;  %v3643_v49 = vlaneseq  ;;  %v3641_v60 = vsub.f32 1.0, %v4342_v0  ;;  %s4343_s15 = scalar_lea.vmem %s3697_s17, 256  ;;  %p4350_p0 = scmp.lt.s32.totalorder %s3697_s17, %s4348_s30 }
 0x585   : > { %3512 = vmatpush1.msra.mxu0 %v3450_v16  ;;  %v3642_v62 = vsub.f32 1.0, %v4341_v5  ;;  %p4344_p11 = scmp.ne.s32.totalorder %s3697_s17, %s4343_s15  ;;  %p4351_p1 = scmp.lt.s32.totalorder %s4349_s28, %s4343_s15 }
 0x586   : > { %3513 = vmatprep.subr.mxu0 %v3449_v39  ;;  %v3644_v10 = vshrl.u32 %v3643_v49, 7  ;;  %v3665_v44 = vmul.f32 %v4342_v0, %v3641_v60 }
 0x587   : > { %3514 = vmatpush1.msra.mxu0 %v3448_v50  ;;  %v3666_v19 = vmul.f32 %v4341_v5, %v3642_v62  ;;  %p4345_p12 = pnand %p4344_p11, %p4511_p5  ;;  %p4352_p2 = por %p4351_p1, %p4350_p0 }
 0x588   : > { %3515 = vmatprep.subr.mxu0 %v3447_v51  ;;  %v3645_v29 = vsub.s32 0, %v3644_v10 }
 0x589   : > { %3516 = vmatpush1.msra.mxu0 %v3446_v32  ;;  %p4346_p13 = pneg %p4345_p12 }
 0x58a   : > { %3550 = vmatmul.mubr.f32.vlgmr.msra.gmra.mxu0 %v3478_v21  ;;  %3594 = vmatprep.subr.mxu0 %v4341_v5  ;;  %v3646_v40 = vrot.slane %v3641_v60, %v3645_v29  ;;  %v3656_v36 = vrot.slane %v4342_v0, %v3645_v29  ;;  %v3670_v1 = vrot.slane %v3665_v44, %v3645_v29 }
 0x58b   : > { %3595 = vmatpush1.msra.mxu0 %v4342_v0  ;;  %3628 = vmatprep.mubr.f32.mxu0 %v8913_v53  ;;  %v3650_v46 = vrot.slane %v3642_v62, %v3645_v29  ;;  %v3660_v63 = vrot.slane %v4341_v5, %v3645_v29  ;;  %v3674_v52 = vrot.slane %v3666_v19, %v3645_v29  ;;  %p4353_p3 = pnand %p4352_p2, %p4346_p13 }
 0x58e   : > { %3778 = vmatmul.mubr.msk.f32.vlgmr.msra.gmra.mxu0 %vm529_vm0, %v3556_v31 }
 0x58f   : > { %3634 = vmatprep.mubr.f32.mxu0 %v8913_v53 }
 0x592   : > { %3779 = vmatmul.mubr.msk.f32.gmra.mxu0 %vm529_vm0, %v3557_v56 }
 0x64a   : > { %v3551_v43 = vpop.f32.mrf.mxu0 }
 0x64b   : > { %v3552_v24 = vadd.f32 %v3551_v43, %v3483_v15 }
 0x64c   : > { %v3553_v11 = vpop.f32.mrf.mxu0 }
 0x64d   : > { %v3554_v28 = vadd.f32 %v3553_v11, %v3483_v15  ;;  %v3675_v37 = vmul.f32 %v3670_v1, %v3552_v24 }
 0x64e   : > { %v3630_v30 = vpop.f32.mrf.mxu0 }
 0x64f   : > { %v3651_v6 = vmul.f32 %v3646_v40, %v3630_v30  ;;  %v3676_v3 = vmul.f32 %v3674_v52, %v3554_v28 }
 0x650   : > { %v3632_v18 = vpop.f32.mrf.mxu0 }
 0x651   : > { %v3652_v45 = vmul.f32 %v3650_v46, %v3632_v18 }
 0x652   : > { %v3636_v25 = vpop.f32.mrf.mxu0 }
 0x653   : > { %v3661_v9 = vmul.f32 %v3656_v36, %v3636_v25 }
 0x654   : > { %v3638_v61 = vpop.f32.mrf.mxu0 }
 0x655   : > { %v3663_v42 = vadd.f32 %v3661_v9, %v3651_v6  ;;  %v3662_v23 = vmul.f32 %v3660_v63, %v3638_v61 }
 0x657   : > { %v3677_v34 = vadd.f32 %v3675_v37, %v3663_v42  ;;  %v3664_v38 = vadd.f32 %v3662_v23, %v3652_v45 }
 0x659   : > { %v3678_v35 = vadd.f32 %v3676_v3, %v3664_v38  ;;  %3679 = vst [vmem:[%s407_s16] sm:$0xff] %v3677_v34 }
 0x65b   : > { %3680 = vst [vmem:[%s407_s16 + $0x8] sm:$0xff] %v3678_v35 }
 0x65c   : > { %4356 = shalt.err (!%p4353_p3)
}
 0x65d   : > { %s4357_s18 = scalar_lea.hbm %s3694_s20, 256  ;;  %s4361_s16 = scalar_lea.hbm %s7967_s12, 512 }
 0x65e   : > { %p4358_p4 = scmp.ne.s32.totalorder %s3694_s20, %s4357_s18  ;;  %p4362_p9 = scmp.lt.s32.totalorder %s3694_s20, %s7967_s12 }
 0x65f   : > { %p4363_p10 = scmp.lt.s32.totalorder %s4361_s16, %s4357_s18 }
 0x660   : > { %p4359_p7 = pnand %p4358_p4, %p4511_p5 }
 0x661   : > { %p4364_p11 = por %p4363_p10, %p4362_p9 }
 0x662   : > { %p4360_p8 = pneg %p4359_p7 }
 0x664   : > { %p4365_p12 = pnand %p4364_p11, %p4360_p8 }
 0x666   : > { %4368 = shalt.err (!%p4365_p12)
}
 0x667   : > { %3786 = dma.vmem_to_hbm [thread:$0]  (%p4511_p5), %s3697_s17, 256, %s3694_s20, %s3682_s26  }
 0x668 PF: > { %p3792_p13 = scmp.ge.s32.totalorder %s4403_s24, 2  ;;  %s3708_s15 = sand.u32 1, %s4391_s21  }
 0x669   : > { %s3709_s25 = scalar_lea.sflag [#allocation3], %s3708_s15 }
 0x66a   : > { %p3789_p0 = pnand %p3792_p13, %p4515_p6 }
 0x66c   : > { %p3790_p1 = pneg %p3789_p0 }
 0x66e   : > { %4386 = dma.done.wait (%p3790_p1), %s3709_s25, 256  }
 0x66f   : > { %4388 = vsyncadd (%p3790_p1), %s3709_s25, 4294967040  ;;  %s8914_s0 = sld [smem:[#allocation5_spill]]  ;;  %p22_p2 = scmp.ge.s32.totalorder %s4498_s27, 4  }
 0x670   : > { %s8915_s23 = sld [smem:[#allocation6_spill]]  ;;  %s8916_s21 = smov %s4395_s22 }
 0x671   : > { %s8918_s24 = smov %s4498_s27  ;;  %24 = sbr.rel (!%p22_p2) target bundleno = 5 (0x5), region = 103 }
 0x675   : > { %s8917_s22 = smov %s8914_s0 }
 0x676   :  { %3714 = vsyncpa [#allocation3], 1 }
 0x677   :  { %3716 = vsyncpa [#allocation3 + $0x1], 1 }

</bundles_post_ra>
